<compile_context>
chip_gen: v5e
topology: v5e:2x2
jax: 0.10.0
libtpu: 0.0.40
codegen_flags: <defaults>
</compile_context>

<pallas_src>
import math
import jax
import jax.numpy as jnp
from jax.experimental import pallas as pl
from jax.experimental.pallas import tpu as pltpu

# ---------------- problem sizes (small, consistent with the module) -----------
N, CIN, H, W = 2, 4, 16, 16      # batch, in-channels, spatial
COUT = 8                         # conv out channels
FEAT_DIM = 32                    # backbone embedding dim
NUM_CLASS = 10                   # head classes
KH = KW = 3
ARC_S = 32.0                     # ArcFace scale
ARC_M = 0.5                      # ArcFace margin
_COS_M = math.cos(ARC_M)
_SIN_M = math.sin(ARC_M)
_TH = math.cos(math.pi - ARC_M)
_MM = math.sin(math.pi - ARC_M) * ARC_M
_EPS = 1e-12

_VMEM = pl.BlockSpec(memory_space=pltpu.MemorySpace.VMEM)


# ------------------------------ fused kernel ----------------------------------
def face_model_kernel(x_ref, wconv_ref, bconv_ref, wfc_ref, bfc_ref,
                      wheadn_ref, label_ref, out_ref):
    # x     : (N, H+2, W+2, CIN) bf16  zero-padded NHWC input (pre-cast in wrapper)
    # wconv : (KH*KW, CIN, COUT) bf16  per-tap conv weights
    # bconv : (1, COUT) f32
    # wfc   : (COUT, FEAT_DIM) f32,  bfc: (1, FEAT_DIM) f32
    # wheadn: (FEAT_DIM, NUM_CLASS) f32   (already column-L2-normalized)
    # label : (N, 1) int32
    x = x_ref[...]                                        # (N, H+2, W+2, CIN) bf16

    # ---- 3x3 conv as 9 accumulating 2-D MXU matmuls over shifted windows ----
    # Each tap: (N*H*W, CIN) @ (CIN, COUT) -> f32 accumulator.
    # TODO(synk): the kw=1,2 sublane-offset slices are not aligned views; at real
    # image sizes move the shift onto the XLU (pltpu.roll) or into the lane dim.
    acc = None                                            # (N*H*W, COUT) f32
    for kh in range(KH):
        # leading-dim slice + leading-dim-only reshape (layout-trivial)
        xh = x[:, kh:kh + H, :, :].reshape(N * H, W + 2, CIN)
        for kw in range(KW):
            win = xh[:, kw:kw + W, :].reshape(N * H * W, CIN)     # bf16
            tap = jnp.dot(win, wconv_ref[kh * KW + kw],           # (CIN, COUT) bf16
                          preferred_element_type=jnp.float32)     # (N*H*W, COUT) f32
            acc = tap if acc is None else acc + tap

    h = jnp.maximum(acc + bconv_ref[...], 0.0)            # bias + ReLU, (N*H*W, COUT) f32

    # ---- global average pooling: one leading-dim split + one sublane reduce ----
    pooled = jnp.sum(h.reshape(N, H * W, COUT), axis=1) * (1.0 / (H * W))   # (N, COUT)

    # ---- FC embedding ----
    feat = jnp.dot(pooled, wfc_ref[...],
                   preferred_element_type=jnp.float32) + bfc_ref[...]       # (N, D)

    # ---- ArcFace head (head weight already normalized outside the kernel) ----
    feat_n = feat * jax.lax.rsqrt(
        jnp.sum(feat * feat, axis=-1, keepdims=True) + _EPS)
    cos = jnp.dot(feat_n, wheadn_ref[...], preferred_element_type=jnp.float32)
    cos = jnp.clip(cos, -1.0, 1.0)
    sin = jnp.sqrt(jnp.maximum(1.0 - cos * cos, 0.0))
    phi = cos * _COS_M - sin * _SIN_M                     # cos(theta + m)
    phi = jnp.where(cos > _TH, phi, cos - _MM)            # standard (non-easy) margin
    classes = jax.lax.broadcasted_iota(jnp.int32, cos.shape, 1)
    one_hot = (classes == label_ref[...]).astype(jnp.float32)
    # TODO(synk): if NUM_CLASS grows, pad to x128 (zero columns in whead_n) and
    # slice outside so this becomes an unmasked lane-dense store.
    out_ref[...] = ARC_S * (one_hot * phi + (1.0 - one_hot) * cos)


# --------------------------------- wrapper ------------------------------------
@jax.jit
def face_model_forward(data_nchw, label, params):
    """data_nchw: (N, Cin, H, W) f32, label: (N,) int32 -> logits (N, NUM_CLASS)."""
    wconv, bconv, wfc, bfc, whead = (params[k] for k in
                                     ("wconv", "bconv", "wfc", "bfc", "whead"))
    # glue: NCHW -> NHWC + zero pad + single bf16 cast (MXU-native conv operands)
    x = jnp.transpose(data_nchw, (0, 2, 3, 1)).astype(jnp.float32)
    xpad = jnp.pad(x, ((0, 0), (1, 1), (1, 1), (0, 0))).astype(jnp.bfloat16)

    # weight-only preprocessing (legitimate hoists, all fused under this jit)
    wconv_t = wconv.reshape(KH * KW, CIN, COUT).astype(jnp.bfloat16)
    bconv2 = bconv.reshape(1, COUT).astype(jnp.float32)
    bfc2 = bfc.reshape(1, FEAT_DIM).astype(jnp.float32)
    whead_n = whead * jax.lax.rsqrt(
        jnp.sum(whead * whead, axis=0, keepdims=True) + _EPS)       # pre-normalized
    label2 = label.astype(jnp.int32).reshape(N, 1)

    cost = pl.CostEstimate(
        flops=(2 * N * H * W * KH * KW * CIN * COUT       # conv
               + 2 * N * COUT * FEAT_DIM                  # fc
               + 2 * N * FEAT_DIM * NUM_CLASS),           # head
        transcendentals=N * NUM_CLASS + 2 * N,
        bytes_accessed=(xpad.size * 2 + wconv_t.size * 2 + wfc.size * 4
                        + whead_n.size * 4 + (bconv2.size + bfc2.size) * 4
                        + label2.size * 4 + N * NUM_CLASS * 4))

    # TODO(synk): at real (non-toy) sizes, add a grid over N (or N*H) with
    # BlockSpec pipelining and dimension_semantics=("parallel",) to use both
    # v7x TensorCores, sizing double-buffered tiles against v7x's 64 MiB VMEM
    # (not v5e/v6e's 128 MiB), and pad FEAT_DIM/NUM_CLASS to x128.
    return pl.pallas_call(
        face_model_kernel,
        out_shape=jax.ShapeDtypeStruct((N, NUM_CLASS), jnp.float32),
        in_specs=[_VMEM] * 7,
        out_specs=_VMEM,
        cost_estimate=cost,
    )(xpad, wconv_t, bconv2, wfc, bfc2, whead_n, label2)


# ------------------------- pure-JAX reference (checking) ----------------------
def reference_forward(data_nchw, label, params):
    wconv, bconv, wfc, bfc, whead = (params[k] for k in
                                     ("wconv", "bconv", "wfc", "bfc", "whead"))
    x = jnp.transpose(data_nchw, (0, 2, 3, 1)).astype(jnp.float32)
    xp = jnp.pad(x, ((0, 0), (1, 1), (1, 1), (0, 0)))
    patches = jnp.stack(
        [xp[:, kh:kh + H, kw:kw + W, :] for kh in range(KH) for kw in range(KW)],
        axis=3).reshape(N * H * W, KH * KW * CIN)
    # conv with bf16 operands / f32 accumulation (mirrors the kernel's MXU precision)
    h = jnp.dot(patches.astype(jnp.bfloat16),
                wconv.reshape(KH * KW * CIN, COUT).astype(jnp.bfloat16),
                preferred_element_type=jnp.float32) + bconv
    h = jnp.maximum(h, 0.0)
    pooled = h.reshape(N, H * W, COUT).mean(axis=1)
    feat = pooled @ wfc + bfc
    fn = feat * jax.lax.rsqrt(jnp.sum(feat * feat, -1, keepdims=True) + _EPS)
    wn = whead * jax.lax.rsqrt(jnp.sum(whead * whead, 0, keepdims=True) + _EPS)
    cos = jnp.clip(fn @ wn, -1.0, 1.0)
    sin = jnp.sqrt(jnp.maximum(1.0 - cos * cos, 0.0))
    phi = cos * _COS_M - sin * _SIN_M
    phi = jnp.where(cos > _TH, phi, cos - _MM)
    one_hot = jax.nn.one_hot(label, NUM_CLASS, dtype=jnp.float32)
    return ARC_S * (one_hot * phi + (1.0 - one_hot) * cos)


# ----------------------------------- main --------------------------------------
if __name__ == "__main__":
    key = jax.random.PRNGKey(0)
    ks = jax.random.split(key, 7)

    data = jax.random.normal(ks[0], (N, CIN, H, W), jnp.float32)
    label = jax.random.randint(ks[1], (N,), 0, NUM_CLASS, jnp.int32)

    params = {
        "wconv": 0.1 * jax.random.normal(ks[2], (KH, KW, CIN, COUT), jnp.float32),
        "bconv": 0.1 * jax.random.normal(ks[3], (COUT,), jnp.float32),
        "wfc":   0.1 * jax.random.normal(ks[4], (COUT, FEAT_DIM), jnp.float32),
        "bfc":   0.1 * jax.random.normal(ks[5], (FEAT_DIM,), jnp.float32),
        "whead": 0.1 * jax.random.normal(ks[6], (FEAT_DIM, NUM_CLASS), jnp.float32),
    }

    logits = jax.block_until_ready(face_model_forward(data, label, params))

    ref = reference_forward(data, label, params)
    assert logits.shape == (N, NUM_CLASS)
    assert jnp.allclose(logits, ref, atol=5e-4, rtol=5e-4), "mismatch vs reference"

    print("KERNEL_OK")
</pallas_src>

<mosaic_0001>
module attributes {stable_mosaic.version = 11 : i64} {
  func.func @face_model_kernel(%arg0: memref<2x18x18x4xbf16, #tpu.memory_space<vmem>>, %arg1: memref<9x4x8xbf16, #tpu.memory_space<vmem>>, %arg2: memref<1x8xf32, #tpu.memory_space<vmem>>, %arg3: memref<8x32xf32, #tpu.memory_space<vmem>>, %arg4: memref<1x32xf32, #tpu.memory_space<vmem>>, %arg5: memref<32x10xf32, #tpu.memory_space<vmem>>, %arg6: memref<2x1xi32, #tpu.memory_space<vmem>>, %arg7: memref<2x10xf32, #tpu.memory_space<vmem>>) attributes {dimension_semantics = [], scalar_prefetch = 0 : i64, scratch_operands = 0 : i64, tpu.core_type = #tpu.core_type<tc>} {
    %c0 = arith.constant 0 : index
    %c0_0 = arith.constant 0 : index
    %c0_1 = arith.constant 0 : index
    %c0_2 = arith.constant 0 : index
    %0 = vector.load %arg0[%c0, %c0_0, %c0_1, %c0_2] : memref<2x18x18x4xbf16, #tpu.memory_space<vmem>>, vector<2x18x18x4xbf16>
    %1 = vector.extract_strided_slice %0 {offsets = [0, 0, 0, 0], sizes = [2, 16, 18, 4], strides = [1, 1, 1, 1]} : vector<2x18x18x4xbf16> to vector<2x16x18x4xbf16>
    %2 = vector.shape_cast %1 : vector<2x16x18x4xbf16> to vector<32x18x4xbf16>
    %3 = vector.extract_strided_slice %2 {offsets = [0, 0, 0], sizes = [32, 16, 4], strides = [1, 1, 1]} : vector<32x18x4xbf16> to vector<32x16x4xbf16>
    %4 = vector.shape_cast %3 : vector<32x16x4xbf16> to vector<512x4xbf16>
    %c0_3 = arith.constant 0 : index
    %c0_4 = arith.constant 0 : index
    %c0_5 = arith.constant 0 : index
    %5 = vector.load %arg1[%c0_3, %c0_4, %c0_5] : memref<9x4x8xbf16, #tpu.memory_space<vmem>>, vector<1x4x8xbf16>
    %6 = vector.shape_cast %5 : vector<1x4x8xbf16> to vector<4x8xbf16>
    %cst = arith.constant dense<0.000000e+00> : vector<512x8xf32>
    %7 = tpu.matmul %4, %6, %cst {dimension_numbers = #tpu.dot_dimension_numbers<[1], [0], [0], [1], [0, 0, 1, 1], [], []>} : vector<512x4xbf16>, vector<4x8xbf16>, vector<512x8xf32> -> vector<512x8xf32>
    %8 = vector.extract_strided_slice %2 {offsets = [0, 1, 0], sizes = [32, 16, 4], strides = [1, 1, 1]} : vector<32x18x4xbf16> to vector<32x16x4xbf16>
    %9 = vector.shape_cast %8 : vector<32x16x4xbf16> to vector<512x4xbf16>
    %c1 = arith.constant 1 : index
    %c0_6 = arith.constant 0 : index
    %c0_7 = arith.constant 0 : index
    %10 = vector.load %arg1[%c1, %c0_6, %c0_7] : memref<9x4x8xbf16, #tpu.memory_space<vmem>>, vector<1x4x8xbf16>
    %11 = vector.shape_cast %10 : vector<1x4x8xbf16> to vector<4x8xbf16>
    %cst_8 = arith.constant dense<0.000000e+00> : vector<512x8xf32>
    %12 = tpu.matmul %9, %11, %cst_8 {dimension_numbers = #tpu.dot_dimension_numbers<[1], [0], [0], [1], [0, 0, 1, 1], [], []>} : vector<512x4xbf16>, vector<4x8xbf16>, vector<512x8xf32> -> vector<512x8xf32>
    %13 = arith.addf %7, %12 : vector<512x8xf32>
    %14 = vector.extract_strided_slice %2 {offsets = [0, 2, 0], sizes = [32, 16, 4], strides = [1, 1, 1]} : vector<32x18x4xbf16> to vector<32x16x4xbf16>
    %15 = vector.shape_cast %14 : vector<32x16x4xbf16> to vector<512x4xbf16>
    %c2 = arith.constant 2 : index
    %c0_9 = arith.constant 0 : index
    %c0_10 = arith.constant 0 : index
    %16 = vector.load %arg1[%c2, %c0_9, %c0_10] : memref<9x4x8xbf16, #tpu.memory_space<vmem>>, vector<1x4x8xbf16>
    %17 = vector.shape_cast %16 : vector<1x4x8xbf16> to vector<4x8xbf16>
    %cst_11 = arith.constant dense<0.000000e+00> : vector<512x8xf32>
    %18 = tpu.matmul %15, %17, %cst_11 {dimension_numbers = #tpu.dot_dimension_numbers<[1], [0], [0], [1], [0, 0, 1, 1], [], []>} : vector<512x4xbf16>, vector<4x8xbf16>, vector<512x8xf32> -> vector<512x8xf32>
    %19 = arith.addf %13, %18 : vector<512x8xf32>
    %20 = vector.extract_strided_slice %0 {offsets = [0, 1, 0, 0], sizes = [2, 16, 18, 4], strides = [1, 1, 1, 1]} : vector<2x18x18x4xbf16> to vector<2x16x18x4xbf16>
    %21 = vector.shape_cast %20 : vector<2x16x18x4xbf16> to vector<32x18x4xbf16>
    %22 = vector.extract_strided_slice %21 {offsets = [0, 0, 0], sizes = [32, 16, 4], strides = [1, 1, 1]} : vector<32x18x4xbf16> to vector<32x16x4xbf16>
    %23 = vector.shape_cast %22 : vector<32x16x4xbf16> to vector<512x4xbf16>
    %c3 = arith.constant 3 : index
    %c0_12 = arith.constant 0 : index
    %c0_13 = arith.constant 0 : index
    %24 = vector.load %arg1[%c3, %c0_12, %c0_13] : memref<9x4x8xbf16, #tpu.memory_space<vmem>>, vector<1x4x8xbf16>
    %25 = vector.shape_cast %24 : vector<1x4x8xbf16> to vector<4x8xbf16>
    %cst_14 = arith.constant dense<0.000000e+00> : vector<512x8xf32>
    %26 = tpu.matmul %23, %25, %cst_14 {dimension_numbers = #tpu.dot_dimension_numbers<[1], [0], [0], [1], [0, 0, 1, 1], [], []>} : vector<512x4xbf16>, vector<4x8xbf16>, vector<512x8xf32> -> vector<512x8xf32>
    %27 = arith.addf %19, %26 : vector<512x8xf32>
    %28 = vector.extract_strided_slice %21 {offsets = [0, 1, 0], sizes = [32, 16, 4], strides = [1, 1, 1]} : vector<32x18x4xbf16> to vector<32x16x4xbf16>
    %29 = vector.shape_cast %28 : vector<32x16x4xbf16> to vector<512x4xbf16>
    %c4 = arith.constant 4 : index
    %c0_15 = arith.constant 0 : index
    %c0_16 = arith.constant 0 : index
    %30 = vector.load %arg1[%c4, %c0_15, %c0_16] : memref<9x4x8xbf16, #tpu.memory_space<vmem>>, vector<1x4x8xbf16>
    %31 = vector.shape_cast %30 : vector<1x4x8xbf16> to vector<4x8xbf16>
    %cst_17 = arith.constant dense<0.000000e+00> : vector<512x8xf32>
    %32 = tpu.matmul %29, %31, %cst_17 {dimension_numbers = #tpu.dot_dimension_numbers<[1], [0], [0], [1], [0, 0, 1, 1], [], []>} : vector<512x4xbf16>, vector<4x8xbf16>, vector<512x8xf32> -> vector<512x8xf32>
    %33 = arith.addf %27, %32 : vector<512x8xf32>
    %34 = vector.extract_strided_slice %21 {offsets = [0, 2, 0], sizes = [32, 16, 4], strides = [1, 1, 1]} : vector<32x18x4xbf16> to vector<32x16x4xbf16>
    %35 = vector.shape_cast %34 : vector<32x16x4xbf16> to vector<512x4xbf16>
    %c5 = arith.constant 5 : index
    %c0_18 = arith.constant 0 : index
    %c0_19 = arith.constant 0 : index
    %36 = vector.load %arg1[%c5, %c0_18, %c0_19] : memref<9x4x8xbf16, #tpu.memory_space<vmem>>, vector<1x4x8xbf16>
    %37 = vector.shape_cast %36 : vector<1x4x8xbf16> to vector<4x8xbf16>
    %cst_20 = arith.constant dense<0.000000e+00> : vector<512x8xf32>
    %38 = tpu.matmul %35, %37, %cst_20 {dimension_numbers = #tpu.dot_dimension_numbers<[1], [0], [0], [1], [0, 0, 1, 1], [], []>} : vector<512x4xbf16>, vector<4x8xbf16>, vector<512x8xf32> -> vector<512x8xf32>
    %39 = arith.addf %33, %38 : vector<512x8xf32>
    %40 = vector.extract_strided_slice %0 {offsets = [0, 2, 0, 0], sizes = [2, 16, 18, 4], strides = [1, 1, 1, 1]} : vector<2x18x18x4xbf16> to vector<2x16x18x4xbf16>
    %41 = vector.shape_cast %40 : vector<2x16x18x4xbf16> to vector<32x18x4xbf16>
    %42 = vector.extract_strided_slice %41 {offsets = [0, 0, 0], sizes = [32, 16, 4], strides = [1, 1, 1]} : vector<32x18x4xbf16> to vector<32x16x4xbf16>
    %43 = vector.shape_cast %42 : vector<32x16x4xbf16> to vector<512x4xbf16>
    %c6 = arith.constant 6 : index
    %c0_21 = arith.constant 0 : index
    %c0_22 = arith.constant 0 : index
    %44 = vector.load %arg1[%c6, %c0_21, %c0_22] : memref<9x4x8xbf16, #tpu.memory_space<vmem>>, vector<1x4x8xbf16>
    %45 = vector.shape_cast %44 : vector<1x4x8xbf16> to vector<4x8xbf16>
    %cst_23 = arith.constant dense<0.000000e+00> : vector<512x8xf32>
    %46 = tpu.matmul %43, %45, %cst_23 {dimension_numbers = #tpu.dot_dimension_numbers<[1], [0], [0], [1], [0, 0, 1, 1], [], []>} : vector<512x4xbf16>, vector<4x8xbf16>, vector<512x8xf32> -> vector<512x8xf32>
    %47 = arith.addf %39, %46 : vector<512x8xf32>
    %48 = vector.extract_strided_slice %41 {offsets = [0, 1, 0], sizes = [32, 16, 4], strides = [1, 1, 1]} : vector<32x18x4xbf16> to vector<32x16x4xbf16>
    %49 = vector.shape_cast %48 : vector<32x16x4xbf16> to vector<512x4xbf16>
    %c7 = arith.constant 7 : index
    %c0_24 = arith.constant 0 : index
    %c0_25 = arith.constant 0 : index
    %50 = vector.load %arg1[%c7, %c0_24, %c0_25] : memref<9x4x8xbf16, #tpu.memory_space<vmem>>, vector<1x4x8xbf16>
    %51 = vector.shape_cast %50 : vector<1x4x8xbf16> to vector<4x8xbf16>
    %cst_26 = arith.constant dense<0.000000e+00> : vector<512x8xf32>
    %52 = tpu.matmul %49, %51, %cst_26 {dimension_numbers = #tpu.dot_dimension_numbers<[1], [0], [0], [1], [0, 0, 1, 1], [], []>} : vector<512x4xbf16>, vector<4x8xbf16>, vector<512x8xf32> -> vector<512x8xf32>
    %53 = arith.addf %47, %52 : vector<512x8xf32>
    %54 = vector.extract_strided_slice %41 {offsets = [0, 2, 0], sizes = [32, 16, 4], strides = [1, 1, 1]} : vector<32x18x4xbf16> to vector<32x16x4xbf16>
    %55 = vector.shape_cast %54 : vector<32x16x4xbf16> to vector<512x4xbf16>
    %c8 = arith.constant 8 : index
    %c0_27 = arith.constant 0 : index
    %c0_28 = arith.constant 0 : index
    %56 = vector.load %arg1[%c8, %c0_27, %c0_28] : memref<9x4x8xbf16, #tpu.memory_space<vmem>>, vector<1x4x8xbf16>
    %57 = vector.shape_cast %56 : vector<1x4x8xbf16> to vector<4x8xbf16>
    %cst_29 = arith.constant dense<0.000000e+00> : vector<512x8xf32>
    %58 = tpu.matmul %55, %57, %cst_29 {dimension_numbers = #tpu.dot_dimension_numbers<[1], [0], [0], [1], [0, 0, 1, 1], [], []>} : vector<512x4xbf16>, vector<4x8xbf16>, vector<512x8xf32> -> vector<512x8xf32>
    %59 = arith.addf %53, %58 : vector<512x8xf32>
    %c0_30 = arith.constant 0 : index
    %c0_31 = arith.constant 0 : index
    %60 = vector.load %arg2[%c0_30, %c0_31] : memref<1x8xf32, #tpu.memory_space<vmem>>, vector<1x8xf32>
    %61 = vector.broadcast %60 : vector<1x8xf32> to vector<512x8xf32>
    %62 = arith.addf %59, %61 : vector<512x8xf32>
    %cst_32 = arith.constant 0.000000e+00 : f32
    %63 = vector.broadcast %cst_32 : f32 to vector<512x8xf32>
    %64 = arith.maximumf %62, %63 : vector<512x8xf32>
    %65 = vector.shape_cast %64 : vector<512x8xf32> to vector<2x256x8xf32>
    %cst_33 = arith.constant dense<0.000000e+00> : vector<2x8xf32>
    %66 = vector.multi_reduction <add>, %65, %cst_33 [1] : vector<2x256x8xf32> to vector<2x8xf32>
    %cst_34 = arith.constant 3.906250e-03 : f32
    %67 = vector.broadcast %cst_34 : f32 to vector<2x8xf32>
    %68 = arith.mulf %66, %67 : vector<2x8xf32>
    %c0_35 = arith.constant 0 : index
    %c0_36 = arith.constant 0 : index
    %69 = vector.load %arg3[%c0_35, %c0_36] : memref<8x32xf32, #tpu.memory_space<vmem>>, vector<8x32xf32>
    %cst_37 = arith.constant dense<0.000000e+00> : vector<2x32xf32>
    %70 = tpu.matmul %68, %69, %cst_37 {dimension_numbers = #tpu.dot_dimension_numbers<[1], [0], [0], [1], [0, 0, 1, 1], [], []>} : vector<2x8xf32>, vector<8x32xf32>, vector<2x32xf32> -> vector<2x32xf32>
    %c0_38 = arith.constant 0 : index
    %c0_39 = arith.constant 0 : index
    %71 = vector.load %arg4[%c0_38, %c0_39] : memref<1x32xf32, #tpu.memory_space<vmem>>, vector<1x32xf32>
    %72 = vector.broadcast %71 : vector<1x32xf32> to vector<2x32xf32>
    %73 = arith.addf %70, %72 : vector<2x32xf32>
    %74 = arith.mulf %73, %73 : vector<2x32xf32>
    %cst_40 = arith.constant dense<0.000000e+00> : vector<2xf32>
    %75 = vector.multi_reduction <add>, %74, %cst_40 [1] : vector<2x32xf32> to vector<2xf32>
    %76 = vector.shape_cast %75 : vector<2xf32> to vector<2x1xf32>
    %cst_41 = arith.constant 9.99999996E-13 : f32
    %77 = vector.broadcast %cst_41 : f32 to vector<2x1xf32>
    %78 = arith.addf %76, %77 : vector<2x1xf32>
    %79 = math.rsqrt %78 : vector<2x1xf32>
    %80 = vector.broadcast %79 : vector<2x1xf32> to vector<2x32xf32>
    %81 = arith.mulf %73, %80 : vector<2x32xf32>
    %c0_42 = arith.constant 0 : index
    %c0_43 = arith.constant 0 : index
    %82 = vector.load %arg5[%c0_42, %c0_43] : memref<32x10xf32, #tpu.memory_space<vmem>>, vector<32x10xf32>
    %cst_44 = arith.constant dense<0.000000e+00> : vector<2x10xf32>
    %83 = tpu.matmul %81, %82, %cst_44 {dimension_numbers = #tpu.dot_dimension_numbers<[1], [0], [0], [1], [0, 0, 1, 1], [], []>} : vector<2x32xf32>, vector<32x10xf32>, vector<2x10xf32> -> vector<2x10xf32>
    %cst_45 = arith.constant -1.000000e+00 : f32
    %cst_46 = arith.constant 1.000000e+00 : f32
    %84 = vector.broadcast %cst_45 : f32 to vector<2x10xf32>
    %85 = arith.maximumf %84, %83 : vector<2x10xf32>
    %86 = vector.broadcast %cst_46 : f32 to vector<2x10xf32>
    %87 = arith.minimumf %86, %85 : vector<2x10xf32>
    %88 = arith.mulf %87, %87 : vector<2x10xf32>
    %cst_47 = arith.constant 1.000000e+00 : f32
    %89 = vector.broadcast %cst_47 : f32 to vector<2x10xf32>
    %90 = arith.subf %89, %88 : vector<2x10xf32>
    %cst_48 = arith.constant 0.000000e+00 : f32
    %91 = vector.broadcast %cst_48 : f32 to vector<2x10xf32>
    %92 = arith.maximumf %90, %91 : vector<2x10xf32>
    %93 = math.sqrt %92 : vector<2x10xf32>
    %cst_49 = arith.constant 0.87758255 : f32
    %94 = vector.broadcast %cst_49 : f32 to vector<2x10xf32>
    %95 = arith.mulf %87, %94 : vector<2x10xf32>
    %cst_50 = arith.constant 0.47942555 : f32
    %96 = vector.broadcast %cst_50 : f32 to vector<2x10xf32>
    %97 = arith.mulf %93, %96 : vector<2x10xf32>
    %98 = arith.subf %95, %97 : vector<2x10xf32>
    %cst_51 = arith.constant -0.87758255 : f32
    %99 = vector.broadcast %cst_51 : f32 to vector<2x10xf32>
    %100 = arith.cmpf ogt, %87, %99 : vector<2x10xf32>
    %cst_52 = arith.constant 0.239712775 : f32
    %101 = vector.broadcast %cst_52 : f32 to vector<2x10xf32>
    %102 = arith.subf %87, %101 : vector<2x10xf32>
    %103 = arith.select %100, %98, %102 : vector<2x10xi1>, vector<2x10xf32>
    %104 = tpu.iota {dimensions = array<i32: 1>} : vector<2x10xi32>
    %c0_53 = arith.constant 0 : index
    %c0_54 = arith.constant 0 : index
    %105 = vector.load %arg6[%c0_53, %c0_54] : memref<2x1xi32, #tpu.memory_space<vmem>>, vector<2x1xi32>
    %106 = vector.broadcast %105 : vector<2x1xi32> to vector<2x10xi32>
    %107 = arith.cmpi eq, %104, %106 : vector<2x10xi32>
    %108 = arith.extui %107 : vector<2x10xi1> to vector<2x10xi32>
    %109 = arith.sitofp %108 : vector<2x10xi32> to vector<2x10xf32>
    %110 = arith.mulf %109, %103 : vector<2x10xf32>
    %cst_55 = arith.constant 1.000000e+00 : f32
    %111 = vector.broadcast %cst_55 : f32 to vector<2x10xf32>
    %112 = arith.subf %111, %109 : vector<2x10xf32>
    %113 = arith.mulf %112, %87 : vector<2x10xf32>
    %114 = arith.addf %110, %113 : vector<2x10xf32>
    %cst_56 = arith.constant 3.200000e+01 : f32
    %115 = vector.broadcast %cst_56 : f32 to vector<2x10xf32>
    %116 = arith.mulf %115, %114 : vector<2x10xf32>
    %c0_57 = arith.constant 0 : index
    %c0_58 = arith.constant 0 : index
    %117 = vector.load %arg7[%c0_57, %c0_58] : memref<2x10xf32, #tpu.memory_space<vmem>>, vector<2x10xf32>
    tpu.vector_store %arg7[%c0_57, %c0_58], %116 {strides = array<i32>} : memref<2x10xf32, #tpu.memory_space<vmem>>, vector<2x10xf32>,
    return
  }
}

</mosaic_0001>

<bundles_post_ra>
// kernel: face_model_forward.1
= control target key start
LH: loop header
LB: loop body
LE: loop exit
PB: predicated region body
PF: predicated region fallthrough
CT: control target
= control target key end

     0   :  { %vm1103_vm0 = vcmask 1041408   ;;  %vm137_vm1 = vsmask.f32 3328  ;;  %vm138_vm2 = vsmask.f32 7440  ;;  %vm1006_vm3 = vcmask 31744   ;;  %s7508_s0 = inlined_call_operand.vmem [shape: bf16[2,18,18,4], index: 0, kind: input, shape index: {}]   ;;  %s7509_s1 = inlined_call_operand.vmem [shape: bf16[9,4,8], index: 1, kind: input, shape index: {}]   ;;  %s7510_s2 = inlined_call_operand.vmem [shape: f32[1,8], index: 2, kind: input, shape index: {}]   ;;  %s7511_s3 = inlined_call_operand.vmem [shape: f32[8,32], index: 3, kind: input, shape index: {}]   ;;  %s7512_s4 = inlined_call_operand.vmem [shape: f32[1,32], index: 4, kind: input, shape index: {}]   ;;  %s7513_s5 = inlined_call_operand.vmem [shape: f32[32,10], index: 5, kind: input, shape index: {}]   ;;  %s7514_s6 = inlined_call_operand.vmem [shape: s32[2,1], index: 6, kind: input, shape index: {}]   ;;  %s7515_s7 = inlined_call_operand.hbm [shape: f32[2,10], index: 7, kind: output, shape index: {}]  }
   0x1   :  { %v4433_v0 = vld [vmem:[%s7509_s1 + $0x2] sm:$0x3]  ;;  %v29_v3 = vld [vmem:[%s7508_s0 + $0x4] sm:$0xf]  ;;  %v30_v4 = vld [vmem:[%s7508_s0 + $0x8] sm:$0x1] }
   0x2   :  { %v28_v1 = vld [vmem:[%s7508_s0] sm:$0xf]  ;;  %v1105_v2 = vsel %vm1103_vm0, %v4433_v0, 0  ;;  %v150_v7 = vshll.u32 %v29_v3, 16  ;;  %v154_v9 = vshrl.u32 %v29_v3, 16  ;;  %v160_v10 = vshll.u32 %v30_v4, 16  ;;  %vm5175_vm4 = vmor %vm137_vm1, %vm138_vm2 }
   0x3   :  { %v141_v5 = vshrl.u32 %v28_v1, 16  ;;  %1114 = vmatpush.bf16.msra.mxu0 %v1105_v2  ;;  %4950 = vmatpush.bf16.msra.mxu1 %v1105_v2  ;;  %v144_v6 = vshll.u32 %v28_v1, 16  ;;  %v55_v11 = vld [vmem:[%s7508_s0 + $0x6c] sm:$0xf]  ;;  %v56_v14 = vld [vmem:[%s7508_s0 + $0x70] sm:$0xf] }
   0x4   :  { %4952 = vmatpush.bf16.msra.mxu3 %v1105_v2  ;;  %4951 = vmatpush.bf16.msra.mxu2 %v1105_v2  ;;  %v152_v13 = vrot.slane %v150_v7, 5  ;;  %v57_v15 = vld [vmem:[%s7508_s0 + $0x74] sm:$0x1]  ;;  %v156_v16 = vrot.slane %v154_v9, 4  ;;  %v357_v17 = vshrl.u32 %v55_v11, 16  ;;  %v360_v18 = vshll.u32 %v55_v11, 16 }
   0x5   :  { %v143_v8 = vrot.slane %v141_v5, 4  ;;  %v146_v12 = vrot.slane %v144_v6, 5  ;;  %v366_v20 = vshll.u32 %v56_v14, 16  ;;  %v370_v21 = vshrl.u32 %v56_v14, 16  ;;  %v103_v23 = vld [vmem:[%s7508_s0 + $0x12c] sm:$0xf] }
   0x6   :  { %v376_v22 = vshll.u32 %v57_v15, 16  ;;  %v157_v25 = vor.u32 %v156_v16, %v152_v13  ;;  %v162_v26 = vrot.slane %v160_v10, 5  ;;  %v359_v27 = vrot.slane %v357_v17, 4  ;;  %v104_v29 = vld [vmem:[%s7508_s0 + $0x130] sm:$0xf] }
   0x7   :  { %v147_v19 = vor.u32 %v146_v12, %v143_v8  ;;  %v362_v28 = vrot.slane %v360_v18, 5  ;;  %v368_v31 = vrot.slane %v366_v20, 5  ;;  %v372_v32 = vrot.slane %v370_v21, 4  ;;  %v105_v40 = vld [vmem:[%s7508_s0 + $0x134] sm:$0x1] }
   0x8   :  { %v378_v33 = vrot.slane %v376_v22, 5  ;;  %v158_v34 = vrot.slane %v157_v25, 4  ;;  %v693_v36 = vshrl.u32 %v103_v23, 16  ;;  %v696_v37 = vshll.u32 %v103_v23, 16  ;;  %v4691_v51 = vld [vmem:[%s7509_s1 + $0x6] sm:$0x3] }
   0x9   :  { %v148_v30 = vrot.slane %v147_v19, 4  ;;  %v363_v35 = vor.u32 %v362_v28, %v359_v27  ;;  %v373_v39 = vor.u32 %v372_v32, %v368_v31  ;;  %v702_v41 = vshll.u32 %v104_v29, 16  ;;  %v4732_v55 = vld [vmem:[%s7509_s1 + $0x8] sm:$0x3]  ;;  %v31_v56 = vld [vmem:[%s7508_s0 + $0xc] sm:$0xf] }
   0xa   :  { %v706_v42 = vshrl.u32 %v104_v29, 16  ;;  %v163_v43 = vsel %vm5175_vm4, %v158_v34, %v162_v26  ;;  %v695_v46 = vrot.slane %v693_v36, 4  ;;  %v698_v49 = vrot.slane %v696_v37, 5  ;;  %v32_v61 = vld [vmem:[%s7508_s0 + $0x10] sm:$0xf] }
   0xb   :  { %v153_v38 = vsel %vm5175_vm4, %v148_v30, %v152_v13  ;;  %v364_v45 = vrot.slane %v363_v35, 4  ;;  %v911_v47 = vunpack.c.l.b16 %v163_v43  ;;  %v374_v48 = vrot.slane %v373_v39, 4  ;;  %v33_v2 = vld [vmem:[%s7508_s0 + $0x14] sm:$0x1]  ;;  %v58_v11 = vld [vmem:[%s7508_s0 + $0x78] sm:$0xf] }
   0xc   :  { %v910_v44 = vunpack.c.l.b16 %v153_v38  ;;  %v704_v50 = vrot.slane %v702_v41, 5  ;;  %v708_v53 = vrot.slane %v706_v42, 4  ;;  %v712_v54 = vshll.u32 %v105_v40, 16  ;;  %v59_v16 = vld [vmem:[%s7508_s0 + $0x7c] sm:$0xf] }
   0xd   :  { %v369_v52 = vsel %vm5175_vm4, %v364_v45, %v368_v31  ;;  %v379_v58 = vsel %vm5175_vm4, %v374_v48, %v378_v33  ;;  %v699_v60 = vor.u32 %v698_v49, %v695_v46  ;;  %v2412_v1 = vsel %vm1103_vm0, %v4691_v51, 0  ;;  %v60_v21 = vld [vmem:[%s7508_s0 + $0x80] sm:$0x1]  ;;  %v106_v31 = vld [vmem:[%s7508_s0 + $0x138] sm:$0xf] }
   0xe   :  { %v974_v57 = vpack.c.b16 %v911_v47, %v910_v44  ;;  %v928_v59 = vunpack.c.l.b16 %v369_v52  ;;  %v929_v62 = vunpack.c.l.b16 %v379_v58  ;;  %v709_v63 = vor.u32 %v708_v53, %v704_v50  ;;  %2421 = vmatpush.bf16.msrb.mxu3 %v2412_v1  ;;  %v107_v40 = vld [vmem:[%s7508_s0 + $0x13c] sm:$0xf]  ;;  %v108_v43 = vld [vmem:[%s7508_s0 + $0x140] sm:$0x1] }
   0xf   :  { %v714_v0 = vrot.slane %v712_v54, 5  ;;  %v700_v3 = vrot.slane %v699_v60, 4  ;;  %v2710_v4 = vsel %vm1103_vm0, %v4732_v55, 0  ;;  %v165_v5 = vshrl.u32 %v31_v56, 16 }
  0x10   :  { %4434 = vmatmul.msk.bf16.vlgmr.msra.gmra.mxu0 %vm1006_vm3, %v974_v57  ;;  %v168_v6 = vshll.u32 %v31_v56, 16  ;;  %v5211_v7 = vpack.c.b16 %v929_v62, %v928_v59  ;;  %v710_v8 = vrot.slane %v709_v63, 4  ;;  %v174_v9 = vshll.u32 %v32_v61, 16 }
  0x11   :  { %2719 = vmatpush.bf16.msrb.mxu0 %v2710_v4  ;;  %v178_v10 = vshrl.u32 %v32_v61, 16  ;;  %v705_v12 = vsel %vm5175_vm4, %v700_v3, %v704_v50  ;;  %v167_v13 = vrot.slane %v165_v5, 4  ;;  %v184_v15 = vshll.u32 %v33_v2, 16 }
  0x12   :  { %7610 = vst [vmem:[#allocation5_spill] sm:$0xff] %v5211_v7  ;;  %v170_v14 = vrot.slane %v168_v6, 5  ;;  %4443 = vmatmul.msk.bf16.vlgmr.msra.gmra.mxu1 %vm1006_vm3, %v5211_v7  ;;  %v715_v17 = vsel %vm5175_vm4, %v710_v8, %v714_v0  ;;  %v956_v18 = vunpack.c.l.b16 %v705_v12  ;;  %v176_v19 = vrot.slane %v174_v9, 5 }
  0x13   :  { %v180_v20 = vrot.slane %v178_v10, 4  ;;  %v957_v22 = vunpack.c.l.b16 %v715_v17  ;;  %v186_v25 = vrot.slane %v184_v15, 5  ;;  %v381_v26 = vshrl.u32 %v58_v11, 16 }
  0x14   :  { %v171_v23 = vor.u32 %v170_v14, %v167_v13  ;;  %v384_v28 = vshll.u32 %v58_v11, 16  ;;  %v390_v29 = vshll.u32 %v59_v16, 16  ;;  %v394_v30 = vshrl.u32 %v59_v16, 16 }
  0x15   :  { %v181_v27 = vor.u32 %v180_v20, %v176_v19  ;;  %v5231_v32 = vpack.c.b16 %v957_v22, %v956_v18  ;;  %v383_v34 = vrot.slane %v381_v26, 4  ;;  %v400_v35 = vshll.u32 %v60_v21, 16 }
  0x16   :  { %v172_v33 = vrot.slane %v171_v23, 4  ;;  %v386_v37 = vrot.slane %v384_v28, 5  ;;  %v392_v38 = vrot.slane %v390_v29, 5  ;;  %v396_v39 = vrot.slane %v394_v30, 4 }
  0x17   :  { %7611 = vst [vmem:[#allocation6_spill] sm:$0xff] %v5231_v32  ;;  %v182_v36 = vrot.slane %v181_v27, 4  ;;  %4457 = vmatmul.msk.bf16.vlgmr.msra.gmra.mxu3 %vm1006_vm3, %v5231_v32  ;;  %v402_v42 = vrot.slane %v400_v35, 5  ;;  %v717_v44 = vshrl.u32 %v106_v31, 16 }
  0x18   :  { %v177_v41 = vsel %vm5175_vm4, %v172_v33, %v176_v19  ;;  %v387_v47 = vor.u32 %v386_v37, %v383_v34  ;;  %v397_v48 = vor.u32 %v396_v39, %v392_v38 }
  0x19   :  { %v187_v45 = vsel %vm5175_vm4, %v182_v36, %v186_v25  ;;  %v912_v46 = vunpack.c.l.b16 %v177_v41 }
  0x1a   :  { %12 = vsyncpa [#allocation3], 0  ;;  %v913_v49 = vunpack.c.l.b16 %v187_v45  ;;  %v719_v50 = vrot.slane %v717_v44, 4  ;;  %v720_v51 = vshll.u32 %v106_v31, 16  ;;  %v726_v52 = vshll.u32 %v107_v40, 16  ;;  %s4424_s29 = sshll.u32 %s7515_s7, 4  ;;  %s4425_s29 = int_to_ptr.hbm [resolvable:$true] %s4424_s29 }
  0x1b   :  { %v388_v53 = vrot.slane %v387_v47, 4  ;;  %v398_v54 = vrot.slane %v397_v48, 4  ;;  %v730_v55 = vshrl.u32 %v107_v40, 16  ;;  %v736_v56 = vshll.u32 %v108_v43, 16  ;;  %v136_v57 = vld [vmem:[%s7509_s1] sm:$0x3] }
  0x1c   :  { %v5248_v58 = vpack.c.b16 %v913_v49, %v912_v46  ;;  %v722_v59 = vrot.slane %v720_v51, 5  ;;  %v728_v60 = vrot.slane %v726_v52, 5  ;;  %v85_v61 = vld [vmem:[%s7508_s0 + $0xe4] sm:$0xf]  ;;  %v86_v62 = vld [vmem:[%s7508_s0 + $0xe8] sm:$0xf] }
  0x1d   :  { %v393_v63 = vsel %vm5175_vm4, %v388_v53, %v392_v38  ;;  %v403_v0 = vsel %vm5175_vm4, %v398_v54, %v402_v42  ;;  %v732_v1 = vrot.slane %v730_v55, 4  ;;  %v738_v2 = vrot.slane %v736_v56, 5  ;;  %v87_v3 = vld [vmem:[%s7508_s0 + $0xec] sm:$0x1]  ;;  %v34_v17 = vld [vmem:[%s7508_s0 + $0x18] sm:$0xf] }
  0x1e   :  { %v930_v4 = vunpack.c.l.b16 %v393_v63  ;;  %v931_v5 = vunpack.c.l.b16 %v403_v0  ;;  %v723_v6 = vor.u32 %v722_v59, %v719_v50  ;;  %v1533_v8 = vsel %vm1103_vm0, %v136_v57, 0  ;;  %v35_v22 = vld [vmem:[%s7508_s0 + $0x1c] sm:$0xf]  ;;  %v36_v27 = vld [vmem:[%s7508_s0 + $0x20] sm:$0x1] }
  0x1f   :  { %v733_v9 = vor.u32 %v732_v1, %v728_v60  ;;  %1542 = vmatpush.bf16.msrb.mxu1 %v1533_v8  ;;  %v549_v10 = vshrl.u32 %v85_v61, 16  ;;  %v552_v11 = vshll.u32 %v85_v61, 16  ;;  %v558_v12 = vshll.u32 %v86_v62, 16  ;;  %v61_v37 = vld [vmem:[%s7508_s0 + $0x84] sm:$0xf] }
  0x20   :  { %4435 = vmatmul.msk.bf16.gmra.mxu0 %vm1006_vm3, %v5248_v58  ;;  %v5266_v13 = vpack.c.b16 %v931_v5, %v930_v4  ;;  %v724_v14 = vrot.slane %v723_v6, 4  ;;  %v562_v15 = vshrl.u32 %v86_v62, 16  ;;  %v568_v16 = vshll.u32 %v87_v3, 16  ;;  %v62_v46 = vld [vmem:[%s7508_s0 + $0x88] sm:$0xf] }
  0x21   :  { %v734_v18 = vrot.slane %v733_v9, 4  ;;  %v551_v19 = vrot.slane %v549_v10, 4  ;;  %v554_v20 = vrot.slane %v552_v11, 5  ;;  %v560_v21 = vrot.slane %v558_v12, 5  ;;  %v63_v50 = vld [vmem:[%s7508_s0 + $0x8c] sm:$0x1] }
  0x22   :  { %v729_v23 = vsel %vm5175_vm4, %v724_v14, %v728_v60  ;;  %v564_v25 = vrot.slane %v562_v15, 4  ;;  %v570_v26 = vrot.slane %v568_v16, 5  ;;  %4444 = vmatmul.msk.bf16.gmra.mxu1 %vm1006_vm3, %v5266_v13  ;;  %v189_v31 = vshrl.u32 %v34_v17, 16  ;;  %v109_v1 = vld [vmem:[%s7508_s0 + $0x144] sm:$0xf] }
  0x23   :  { %v739_v28 = vsel %vm5175_vm4, %v734_v18, %v738_v2  ;;  %v958_v29 = vunpack.c.l.b16 %v729_v23  ;;  %v555_v30 = vor.u32 %v554_v20, %v551_v19  ;;  %v192_v35 = vshll.u32 %v34_v17, 16  ;;  %v110_v5 = vld [vmem:[%s7508_s0 + $0x148] sm:$0xf]  ;;  %v111_v11 = vld [vmem:[%s7508_s0 + $0x14c] sm:$0x1] }
  0x24   :  { %v959_v33 = vunpack.c.l.b16 %v739_v28  ;;  %v565_v34 = vor.u32 %v564_v25, %v560_v21  ;;  %v198_v36 = vshll.u32 %v35_v22, 16  ;;  %v191_v39 = vrot.slane %v189_v31, 4  ;;  %v89_v31 = vld [vmem:[%s7508_s0 + $0xf4] sm:$0xf] }
  0x25   :  { %v556_v38 = vrot.slane %v555_v30, 4  ;;  %v202_v40 = vshrl.u32 %v35_v22, 16  ;;  %v208_v41 = vshll.u32 %v36_v27, 16  ;;  %v194_v44 = vrot.slane %v192_v35, 5 }
  0x26   :  { %v5286_v42 = vpack.c.b16 %v959_v33, %v958_v29  ;;  %v566_v43 = vrot.slane %v565_v34, 4  ;;  %v200_v45 = vrot.slane %v198_v36, 5  ;;  %v405_v51 = vshrl.u32 %v61_v37, 16  ;;  %v90_v36 = vld [vmem:[%s7508_s0 + $0xf8] sm:$0x1] }
  0x27   :  { %v561_v47 = vsel %vm5175_vm4, %v556_v38, %v560_v21  ;;  %v204_v48 = vrot.slane %v202_v40, 4  ;;  %v210_v49 = vrot.slane %v208_v41, 5  ;;  %v195_v54 = vor.u32 %v194_v44, %v191_v39 }
  0x28   :  { %7612 = vst [vmem:[#allocation7_spill] sm:$0xff] %v5286_v42  ;;  %4458 = vmatmul.msk.bf16.gmra.mxu3 %vm1006_vm3, %v5286_v42  ;;  %v571_v52 = vsel %vm5175_vm4, %v566_v43, %v570_v26  ;;  %v944_v53 = vunpack.c.l.b16 %v561_v47  ;;  %v408_v55 = vshll.u32 %v61_v37, 16  ;;  %v407_v59 = vrot.slane %v405_v51, 4  ;;  %v88_v26 = vld [vmem:[%s7508_s0 + $0xf0] sm:$0xf] }
  0x29   :  { %v945_v56 = vunpack.c.l.b16 %v571_v52  ;;  %v205_v57 = vor.u32 %v204_v48, %v200_v45  ;;  %v414_v60 = vshll.u32 %v62_v46, 16  ;;  %v196_v61 = vrot.slane %v195_v54, 4  ;;  %v4658_v51 = vld [vmem:[%s7509_s1 + $0x4] sm:$0x3] }
  0x2a   :  { %v410_v62 = vrot.slane %v408_v55, 5  ;;  %v418_v63 = vshrl.u32 %v62_v46, 16  ;;  %v424_v0 = vshll.u32 %v63_v50, 16  ;;  %v741_v15 = vshrl.u32 %v109_v1, 16  ;;  %v37_v46 = vld [vmem:[%s7508_s0 + $0x24] sm:$0xf] }
  0x2b   :  { %v5303_v2 = vpack.c.b16 %v945_v56, %v944_v53  ;;  %v206_v3 = vrot.slane %v205_v57, 4  ;;  %v416_v4 = vrot.slane %v414_v60, 5  ;;  %v201_v6 = vsel %vm5175_vm4, %v196_v61, %v200_v45  ;;  %v38_v60 = vld [vmem:[%s7508_s0 + $0x28] sm:$0xf]  ;;  %v39_v61 = vld [vmem:[%s7508_s0 + $0x2c] sm:$0x1] }
  0x2c   :  { %v411_v8 = vor.u32 %v410_v62, %v407_v59  ;;  %v420_v9 = vrot.slane %v418_v63, 4  ;;  %v426_v10 = vrot.slane %v424_v0, 5  ;;  %v914_v14 = vunpack.c.l.b16 %v201_v6 }
  0x2d   :  { %4451 = vmatmul.msk.bf16.vlgmr.msra.gmra.mxu2 %vm1006_vm3, %v5303_v2  ;;  %v211_v12 = vsel %vm5175_vm4, %v206_v3, %v210_v49  ;;  %v744_v16 = vshll.u32 %v109_v1, 16  ;;  %v750_v20 = vshll.u32 %v110_v5, 16  ;;  %v743_v21 = vrot.slane %v741_v15, 4 }
  0x2e   :  { %v915_v17 = vunpack.c.l.b16 %v211_v12  ;;  %v412_v18 = vrot.slane %v411_v8, 4  ;;  %v421_v19 = vor.u32 %v420_v9, %v416_v4  ;;  %v754_v23 = vshrl.u32 %v110_v5, 16  ;;  %v64_v12 = vld [vmem:[%s7508_s0 + $0x90] sm:$0xf] }
  0x2f   :  { %v746_v22 = vrot.slane %v744_v16, 5  ;;  %v760_v25 = vshll.u32 %v111_v11, 16  ;;  %v752_v30 = vrot.slane %v750_v20, 5  ;;  %v573_v39 = vshrl.u32 %v88_v26, 16 }
  0x30   :  { %v5320_v27 = vpack.c.b16 %v915_v17, %v914_v14  ;;  %v417_v28 = vsel %vm5175_vm4, %v412_v18, %v416_v4  ;;  %v422_v29 = vrot.slane %v421_v19, 4  ;;  %v756_v35 = vrot.slane %v754_v23, 4  ;;  %v65_v18 = vld [vmem:[%s7508_s0 + $0x94] sm:$0xf]  ;;  %v66_v23 = vld [vmem:[%s7508_s0 + $0x98] sm:$0x1] }
  0x31   :  { %v932_v33 = vunpack.c.l.b16 %v417_v28  ;;  %v747_v34 = vor.u32 %v746_v22, %v743_v21  ;;  %v762_v38 = vrot.slane %v760_v25, 5  ;;  %v576_v40 = vshll.u32 %v88_v26, 16 }
  0x32   :  { %7613 = vst [vmem:[#allocation8_spill] sm:$0xff] %v5320_v27  ;;  %4436 = vmatmul.msk.bf16.gmra.mxu0 %vm1006_vm3, %v5320_v27  ;;  %v427_v37 = vsel %vm5175_vm4, %v422_v29, %v426_v10  ;;  %v757_v44 = vor.u32 %v756_v35, %v752_v30  ;;  %v582_v45 = vshll.u32 %v89_v31, 16  ;;  %v575_v47 = vrot.slane %v573_v39, 4  ;;  %v112_v39 = vld [vmem:[%s7508_s0 + $0x150] sm:$0xf] }
  0x33   :  { %v933_v41 = vunpack.c.l.b16 %v427_v37  ;;  %v748_v43 = vrot.slane %v747_v34, 4  ;;  %v578_v48 = vrot.slane %v576_v40, 5  ;;  %v586_v49 = vshrl.u32 %v89_v31, 16 }
  0x34   :  { %v592_v50 = vshll.u32 %v90_v36, 16  ;;  %v758_v54 = vrot.slane %v757_v44, 4  ;;  %v584_v55 = vrot.slane %v582_v45, 5  ;;  %v2158_v0 = vsel %vm1103_vm0, %v4658_v51, 0  ;;  %v113_v45 = vld [vmem:[%s7508_s0 + $0x154] sm:$0xf] }
  0x35   :  { %v5340_v52 = vpack.c.b16 %v933_v41, %v932_v33  ;;  %v753_v53 = vsel %vm5175_vm4, %v748_v43, %v752_v30  ;;  %v579_v57 = vor.u32 %v578_v48, %v575_v47  ;;  %v588_v59 = vrot.slane %v586_v49, 4  ;;  %2167 = vmatpush.bf16.msrb.mxu2 %v2158_v0  ;;  %v114_v49 = vld [vmem:[%s7508_s0 + $0x158] sm:$0x1]  ;;  %v91_v0 = vld [vmem:[%s7508_s0 + $0xfc] sm:$0xf] }
  0x36   :  { %v960_v56 = vunpack.c.l.b16 %v753_v53  ;;  %v763_v62 = vsel %vm5175_vm4, %v758_v54, %v762_v38  ;;  %v594_v63 = vrot.slane %v592_v50, 5  ;;  %v213_v1 = vshrl.u32 %v37_v46, 16 }
  0x37   :  { %4445 = vmatmul.msk.bf16.gmra.mxu1 %vm1006_vm3, %v5340_v52  ;;  %v961_v3 = vunpack.c.l.b16 %v763_v62  ;;  %v580_v4 = vrot.slane %v579_v57, 4  ;;  %v589_v5 = vor.u32 %v588_v59, %v584_v55  ;;  %v216_v6 = vshll.u32 %v37_v46, 16 }
  0x38   :  { %v215_v8 = vrot.slane %v213_v1, 4  ;;  %v222_v9 = vshll.u32 %v38_v60, 16  ;;  %v226_v10 = vshrl.u32 %v38_v60, 16  ;;  %v232_v11 = vshll.u32 %v39_v61, 16 }
  0x39   :  { %v5358_v14 = vpack.c.b16 %v961_v3, %v960_v56  ;;  %v585_v15 = vsel %vm5175_vm4, %v580_v4, %v584_v55  ;;  %v590_v16 = vrot.slane %v589_v5, 4  ;;  %v218_v17 = vrot.slane %v216_v6, 5  ;;  %v92_v6 = vld [vmem:[%s7508_s0 + $0x100] sm:$0xf] }
  0x3a   :  { %v946_v19 = vunpack.c.l.b16 %v585_v15  ;;  %v224_v20 = vrot.slane %v222_v9, 5  ;;  %v228_v21 = vrot.slane %v226_v10, 4  ;;  %v234_v22 = vrot.slane %v232_v11, 5  ;;  %v93_v11 = vld [vmem:[%s7508_s0 + $0x104] sm:$0x1] }
  0x3b   :  { %7614 = vst [vmem:[#allocation9_spill] sm:$0xff] %v5358_v14  ;;  %4459 = vmatmul.msk.bf16.gmra.mxu3 %vm1006_vm3, %v5358_v14  ;;  %v595_v25 = vsel %vm5175_vm4, %v590_v16, %v594_v63  ;;  %v219_v26 = vor.u32 %v218_v17, %v215_v8  ;;  %v429_v28 = vshrl.u32 %v64_v12, 16  ;;  %v432_v29 = vshll.u32 %v64_v12, 16 }
  0x3c   :  { %v947_v30 = vunpack.c.l.b16 %v595_v25  ;;  %v229_v31 = vor.u32 %v228_v21, %v224_v20  ;;  %v438_v33 = vshll.u32 %v65_v18, 16  ;;  %v442_v34 = vshrl.u32 %v65_v18, 16 }
  0x3d   :  { %v220_v35 = vrot.slane %v219_v26, 4  ;;  %v431_v36 = vrot.slane %v429_v28, 4  ;;  %v434_v37 = vrot.slane %v432_v29, 5  ;;  %v448_v38 = vshll.u32 %v66_v23, 16 }
  0x3e   :  { %v5375_v40 = vpack.c.b16 %v947_v30, %v946_v19  ;;  %v230_v41 = vrot.slane %v229_v31, 4  ;;  %v440_v43 = vrot.slane %v438_v33, 5  ;;  %v444_v44 = vrot.slane %v442_v34, 4  ;;  %v5416_v34 = vld [vmem:[%s7508_s0 + $0x34] sm:$0xf] }
  0x3f   :  { %v225_v46 = vsel %vm5175_vm4, %v220_v35, %v224_v20  ;;  %v435_v47 = vor.u32 %v434_v37, %v431_v36  ;;  %v450_v48 = vrot.slane %v448_v38, 5  ;;  %v765_v54 = vshrl.u32 %v112_v39, 16  ;;  %v5425_v37 = vld [vmem:[%s7508_s0 + $0x38] sm:$0x1] }
  0x40   :  { %7615 = vst [vmem:[#allocation10_spill] sm:$0xff] %v5375_v40  ;;  %4452 = vmatmul.msk.bf16.gmra.mxu2 %vm1006_vm3, %v5375_v40  ;;  %v235_v50 = vsel %vm5175_vm4, %v230_v41, %v234_v22  ;;  %v916_v51 = vunpack.c.l.b16 %v225_v46  ;;  %v445_v53 = vor.u32 %v444_v44, %v440_v43  ;;  %v768_v57 = vshll.u32 %v112_v39, 16  ;;  %v5409_v22 = vld [vmem:[%s7508_s0 + $0x30] sm:$0xf] }
  0x41   :  { %v917_v55 = vunpack.c.l.b16 %v235_v50  ;;  %v436_v56 = vrot.slane %v435_v47, 4  ;;  %v774_v59 = vshll.u32 %v113_v45, 16  ;;  %v767_v61 = vrot.slane %v765_v54, 4 }
  0x42   :  { %v446_v60 = vrot.slane %v445_v53, 4  ;;  %v778_v62 = vshrl.u32 %v113_v45, 16  ;;  %v784_v63 = vshll.u32 %v114_v49, 16  ;;  %v770_v4 = vrot.slane %v768_v57, 5  ;;  %v67_v45 = vld [vmem:[%s7508_s0 + $0x9c] sm:$0xf] }
  0x43   :  { %v5392_v1 = vpack.c.b16 %v917_v55, %v916_v51  ;;  %v441_v3 = vsel %vm5175_vm4, %v436_v56, %v440_v43  ;;  %v776_v5 = vrot.slane %v774_v59, 5  ;;  %v597_v17 = vshrl.u32 %v91_v0, 16  ;;  %v68_v59 = vld [vmem:[%s7508_s0 + $0xa0] sm:$0xf] }
  0x44   :  { %v451_v8 = vsel %vm5175_vm4, %v446_v60, %v450_v48  ;;  %v934_v9 = vunpack.c.l.b16 %v441_v3  ;;  %v780_v10 = vrot.slane %v778_v62, 4  ;;  %v771_v15 = vor.u32 %v770_v4, %v767_v61  ;;  %v69_v3 = vld [vmem:[%s7508_s0 + $0xa4] sm:$0x1] }
  0x45   :  { %7616 = vst [vmem:[#allocation11_spill] sm:$0xff] %v5392_v1  ;;  %4437 = vmatmul.msk.bf16.gmra.mxu0 %vm1006_vm3, %v5392_v1  ;;  %v935_v12 = vunpack.c.l.b16 %v451_v8  ;;  %v786_v16 = vrot.slane %v784_v63, 5  ;;  %v600_v19 = vshll.u32 %v91_v0, 16  ;;  %v606_v20 = vshll.u32 %v92_v6, 16 }
  0x46   :  { %v781_v18 = vor.u32 %v780_v10, %v776_v5  ;;  %v610_v21 = vshrl.u32 %v92_v6, 16  ;;  %v772_v25 = vrot.slane %v771_v15, 4  ;;  %v599_v26 = vrot.slane %v597_v17, 4  ;;  %v115_v15 = vld [vmem:[%s7508_s0 + $0x15c] sm:$0xf] }
  0x47   :  { %v5411_v23 = vpack.c.b16 %v935_v12, %v934_v9  ;;  %v616_v28 = vshll.u32 %v93_v11, 16  ;;  %v602_v30 = vrot.slane %v600_v19, 5  ;;  %v608_v31 = vrot.slane %v606_v20, 5 }
  0x48   :  { %v782_v29 = vrot.slane %v781_v18, 4  ;;  %v612_v33 = vrot.slane %v610_v21, 4  ;;  %v777_v35 = vsel %vm5175_vm4, %v772_v25, %v776_v5  ;;  %v237_v38 = vshrl.u32 %v5409_v22, 16 }
  0x49   :  { %4446 = vmatmul.msk.bf16.gmra.mxu1 %vm1006_vm3, %v5411_v23  ;;  %v618_v36 = vrot.slane %v616_v28, 5  ;;  %v962_v41 = vunpack.c.l.b16 %v777_v35  ;;  %v603_v43 = vor.u32 %v602_v30, %v599_v26  ;;  %v240_v48 = vshll.u32 %v5409_v22, 16  ;;  %v116_v26 = vld [vmem:[%s7508_s0 + $0x160] sm:$0xf]  ;;  %v117_v30 = vld [vmem:[%s7508_s0 + $0x164] sm:$0x1] }
  0x4a   :  { %v787_v39 = vsel %vm5175_vm4, %v782_v29, %v786_v16  ;;  %v613_v44 = vor.u32 %v612_v33, %v608_v31  ;;  %v239_v47 = vrot.slane %v237_v38, 4  ;;  %v246_v49 = vshll.u32 %v5416_v34, 16 }
  0x4b   :  { %v963_v46 = vunpack.c.l.b16 %v787_v39  ;;  %v604_v50 = vrot.slane %v603_v43, 4  ;;  %v250_v53 = vshrl.u32 %v5416_v34, 16  ;;  %v256_v54 = vshll.u32 %v5425_v37, 16 }
  0x4c   :  { %v614_v51 = vrot.slane %v613_v44, 4  ;;  %v242_v56 = vrot.slane %v240_v48, 5  ;;  %v248_v57 = vrot.slane %v246_v49, 5  ;;  %v453_v60 = vshrl.u32 %v67_v45, 16 }
  0x4d   :  { %v5437_v55 = vpack.c.b16 %v963_v46, %v962_v41  ;;  %v609_v61 = vsel %vm5175_vm4, %v604_v50, %v608_v31  ;;  %v252_v63 = vrot.slane %v250_v53, 4  ;;  %v258_v0 = vrot.slane %v256_v54, 5  ;;  %v94_v50 = vld [vmem:[%s7508_s0 + $0x108] sm:$0xf] }
  0x4e   :  { %v619_v62 = vsel %vm5175_vm4, %v614_v51, %v618_v36  ;;  %v948_v4 = vunpack.c.l.b16 %v609_v61  ;;  %v243_v6 = vor.u32 %v242_v56, %v239_v47  ;;  %v455_v8 = vrot.slane %v453_v60, 4  ;;  %v95_v56 = vld [vmem:[%s7508_s0 + $0x10c] sm:$0xf] }
  0x4f   :  { %7617 = vst [vmem:[#allocation12_spill] sm:$0xff] %v5437_v55  ;;  %4460 = vmatmul.msk.bf16.gmra.mxu3 %vm1006_vm3, %v5437_v55  ;;  %v949_v5 = vunpack.c.l.b16 %v619_v62  ;;  %v253_v9 = vor.u32 %v252_v63, %v248_v57  ;;  %v456_v10 = vshll.u32 %v67_v45, 16  ;;  %v462_v11 = vshll.u32 %v68_v59, 16  ;;  %v96_v62 = vld [vmem:[%s7508_s0 + $0x110] sm:$0x1] }
  0x50   :  { %v466_v12 = vshrl.u32 %v68_v59, 16  ;;  %v244_v17 = vrot.slane %v243_v6, 4  ;;  %v472_v18 = vshll.u32 %v69_v3, 16  ;;  %v789_v31 = vshrl.u32 %v115_v15, 16 }
  0x51   :  { %v5454_v16 = vpack.c.b16 %v949_v5, %v948_v4  ;;  %v254_v19 = vrot.slane %v253_v9, 4  ;;  %v458_v20 = vrot.slane %v456_v10, 5  ;;  %v464_v21 = vrot.slane %v462_v11, 5  ;;  %v5488_v10 = vld [vmem:[%s7508_s0 + $0x3c] sm:$0xf] }
  0x52   :  { %v468_v25 = vrot.slane %v466_v12, 4  ;;  %v249_v28 = vsel %vm5175_vm4, %v244_v17, %v248_v57  ;;  %v474_v29 = vrot.slane %v472_v18, 5  ;;  %v792_v33 = vshll.u32 %v115_v15, 16  ;;  %v5497_v18 = vld [vmem:[%s7508_s0 + $0x40] sm:$0xf] }
  0x53   :  { %7618 = vst [vmem:[#allocation13_spill] sm:$0xff] %v5454_v16  ;;  %4453 = vmatmul.msk.bf16.gmra.mxu2 %vm1006_vm3, %v5454_v16  ;;  %v259_v35 = vsel %vm5175_vm4, %v254_v19, %v258_v0  ;;  %v918_v36 = vunpack.c.l.b16 %v249_v28  ;;  %v459_v38 = vor.u32 %v458_v20, %v455_v8  ;;  %v791_v43 = vrot.slane %v789_v31, 4 }
  0x54   :  { %v469_v39 = vor.u32 %v468_v25, %v464_v21  ;;  %v919_v41 = vunpack.c.l.b16 %v259_v35  ;;  %v794_v44 = vrot.slane %v792_v33, 5  ;;  %v798_v45 = vshll.u32 %v116_v26, 16 }
  0x55   :  { %v460_v46 = vrot.slane %v459_v38, 4  ;;  %v802_v48 = vshrl.u32 %v116_v26, 16  ;;  %v808_v49 = vshll.u32 %v117_v30, 16  ;;  %v621_v4 = vshrl.u32 %v94_v50, 16  ;;  %v70_v38 = vld [vmem:[%s7508_s0 + $0xa8] sm:$0xf] }
  0x56   :  { %v470_v47 = vrot.slane %v469_v39, 4  ;;  %v5471_v51 = vpack.c.b16 %v919_v41, %v918_v36  ;;  %v795_v53 = vor.u32 %v794_v44, %v791_v43  ;;  %v800_v54 = vrot.slane %v798_v45, 5 }
  0x57   :  { %v465_v57 = vsel %vm5175_vm4, %v460_v46, %v464_v21  ;;  %v804_v60 = vrot.slane %v802_v48, 4  ;;  %v810_v61 = vrot.slane %v808_v49, 5  ;;  %v624_v6 = vshll.u32 %v94_v50, 16 }
  0x58   :  { %7619 = vst [vmem:[#allocation14_spill] sm:$0xff] %v5471_v51  ;;  %v475_v59 = vsel %vm5175_vm4, %v470_v47, %v474_v29  ;;  %4438 = vmatmul.msk.bf16.gmra.mxu0 %vm1006_vm3, %v5471_v51  ;;  %v936_v63 = vunpack.c.l.b16 %v465_v57  ;;  %v796_v3 = vrot.slane %v795_v53, 4  ;;  %v630_v8 = vshll.u32 %v95_v56, 16  ;;  %v5504_v29 = vld [vmem:[%s7508_s0 + $0x44] sm:$0x1] }
  0x59   :  { %v937_v0 = vunpack.c.l.b16 %v475_v59  ;;  %v805_v5 = vor.u32 %v804_v60, %v800_v54  ;;  %v634_v9 = vshrl.u32 %v95_v56, 16  ;;  %v623_v15 = vrot.slane %v621_v4, 4 }
  0x5a   :  { %v801_v12 = vsel %vm5175_vm4, %v796_v3, %v800_v54  ;;  %v640_v17 = vshll.u32 %v96_v62, 16  ;;  %v626_v20 = vrot.slane %v624_v6, 5  ;;  %v632_v21 = vrot.slane %v630_v8, 5  ;;  %v71_v54 = vld [vmem:[%s7508_s0 + $0xac] sm:$0xf] }
  0x5b   :  { %v5490_v11 = vpack.c.b16 %v937_v0, %v936_v63  ;;  %v806_v19 = vrot.slane %v805_v5, 4  ;;  %v964_v25 = vunpack.c.l.b16 %v801_v12  ;;  %v636_v26 = vrot.slane %v634_v9, 4 }
  0x5c   :  { %v642_v28 = vrot.slane %v640_v17, 5  ;;  %v261_v30 = vshrl.u32 %v5488_v10, 16  ;;  %v627_v33 = vor.u32 %v626_v20, %v623_v15  ;;  %v264_v35 = vshll.u32 %v5488_v10, 16 }
  0x5d   :  { %7620 = vst [vmem:[#allocation15_spill] sm:$0xff] %v5490_v11  ;;  %4447 = vmatmul.msk.bf16.gmra.mxu1 %vm1006_vm3, %v5490_v11  ;;  %v811_v31 = vsel %vm5175_vm4, %v806_v19, %v810_v61  ;;  %v270_v36 = vshll.u32 %v5497_v18, 16  ;;  %v637_v41 = vor.u32 %v636_v26, %v632_v21  ;;  %v274_v44 = vshrl.u32 %v5497_v18, 16  ;;  %v72_v61 = vld [vmem:[%s7508_s0 + $0xb0] sm:$0x1] }
  0x5e   :  { %v965_v39 = vunpack.c.l.b16 %v811_v31  ;;  %v263_v43 = vrot.slane %v261_v30, 4  ;;  %v628_v45 = vrot.slane %v627_v33, 4  ;;  %v266_v46 = vrot.slane %v264_v35, 5  ;;  %v118_v19 = vld [vmem:[%s7508_s0 + $0x168] sm:$0xf] }
  0x5f   :  { %v272_v47 = vrot.slane %v270_v36, 5  ;;  %v280_v48 = vshll.u32 %v5504_v29, 16  ;;  %v638_v50 = vrot.slane %v637_v41, 4  ;;  %v276_v53 = vrot.slane %v274_v44, 4  ;;  %v120_v30 = vld [vmem:[%s7508_s0 + $0x170] sm:$0x1] }
  0x60   :  { %v5516_v49 = vpack.c.b16 %v965_v39, %v964_v25  ;;  %v477_v56 = vshrl.u32 %v70_v38, 16  ;;  %v633_v57 = vsel %vm5175_vm4, %v628_v45, %v632_v21  ;;  %v267_v59 = vor.u32 %v266_v46, %v263_v43 }
  0x61   :  { %v282_v60 = vrot.slane %v280_v48, 5  ;;  %v480_v62 = vshll.u32 %v70_v38, 16  ;;  %v643_v63 = vsel %vm5175_vm4, %v638_v50, %v642_v28  ;;  %v950_v0 = vunpack.c.l.b16 %v633_v57  ;;  %v119_v28 = vld [vmem:[%s7508_s0 + $0x16c] sm:$0xf]  ;;  %v97_v48 = vld [vmem:[%s7508_s0 + $0x114] sm:$0xf] }
  0x62   :  { %7621 = vst [vmem:[#allocation16_spill] sm:$0xff] %v5516_v49  ;;  %4461 = vmatmul.msk.bf16.gmra.mxu3 %vm1006_vm3, %v5516_v49  ;;  %v277_v3 = vor.u32 %v276_v53, %v272_v47  ;;  %v479_v4 = vrot.slane %v477_v56, 4  ;;  %v951_v5 = vunpack.c.l.b16 %v643_v63  ;;  %v268_v6 = vrot.slane %v267_v59, 4  ;;  %v98_v57 = vld [vmem:[%s7508_s0 + $0x118] sm:$0xf] }
  0x63   :  { %v482_v8 = vrot.slane %v480_v62, 5  ;;  %v486_v9 = vshll.u32 %v71_v54, 16  ;;  %v490_v15 = vshrl.u32 %v71_v54, 16  ;;  %v496_v17 = vshll.u32 %v72_v61, 16 }
  0x64   :  { %v278_v12 = vrot.slane %v277_v3, 4  ;;  %v5533_v20 = vpack.c.b16 %v951_v5, %v950_v0  ;;  %v273_v21 = vsel %vm5175_vm4, %v268_v6, %v272_v47  ;;  %v813_v41 = vshrl.u32 %v118_v19, 16  ;;  %v99_v3 = vld [vmem:[%s7508_s0 + $0x11c] sm:$0x1] }
  0x65   :  { %v483_v25 = vor.u32 %v482_v8, %v479_v4  ;;  %v488_v26 = vrot.slane %v486_v9, 5  ;;  %v920_v33 = vunpack.c.l.b16 %v273_v21  ;;  %v492_v35 = vrot.slane %v490_v15, 4 }
  0x66   :  { %7622 = vst [vmem:[#allocation17_spill] sm:$0xff] %v5533_v20  ;;  %v283_v31 = vsel %vm5175_vm4, %v278_v12, %v282_v60  ;;  %v498_v36 = vrot.slane %v496_v17, 5  ;;  %4454 = vmatmul.msk.bf16.gmra.mxu2 %vm1006_vm3, %v5533_v20  ;;  %v816_v43 = vshll.u32 %v118_v19, 16  ;;  %v822_v45 = vshll.u32 %v119_v28, 16 }
  0x67   :  { %v921_v38 = vunpack.c.l.b16 %v283_v31  ;;  %v484_v39 = vrot.slane %v483_v25, 4  ;;  %v493_v44 = vor.u32 %v492_v35, %v488_v26  ;;  %v826_v46 = vshrl.u32 %v119_v28, 16 }
  0x68   :  { %v832_v47 = vshll.u32 %v120_v30, 16  ;;  %v815_v54 = vrot.slane %v813_v41, 4  ;;  %v818_v56 = vrot.slane %v816_v43, 5  ;;  %v824_v60 = vrot.slane %v822_v45, 5  ;;  %v5567_v30 = vld [vmem:[%s7508_s0 + $0x48] sm:$0xf] }
  0x69   :  { %v5550_v50 = vpack.c.b16 %v921_v38, %v920_v33  ;;  %v489_v53 = vsel %vm5175_vm4, %v484_v39, %v488_v26  ;;  %v494_v59 = vrot.slane %v493_v44, 4  ;;  %v828_v61 = vrot.slane %v826_v46, 4  ;;  %v5581_v38 = vld [vmem:[%s7508_s0 + $0x50] sm:$0x1] }
  0x6a   :  { %v938_v62 = vunpack.c.l.b16 %v489_v53  ;;  %v819_v63 = vor.u32 %v818_v56, %v815_v54  ;;  %v834_v0 = vrot.slane %v832_v47, 5  ;;  %v645_v4 = vshrl.u32 %v97_v48, 16 }
  0x6b   :  { %7623 = vst [vmem:[#allocation18_spill] sm:$0xff] %v5550_v50  ;;  %4439 = vmatmul.msk.bf16.gmra.mxu0 %vm1006_vm3, %v5550_v50  ;;  %v499_v5 = vsel %vm5175_vm4, %v494_v59, %v498_v36  ;;  %v829_v6 = vor.u32 %v828_v61, %v824_v60  ;;  %v648_v8 = vshll.u32 %v97_v48, 16  ;;  %v654_v9 = vshll.u32 %v98_v57, 16  ;;  %v5576_v36 = vld [vmem:[%s7508_s0 + $0x4c] sm:$0xf] }
  0x6c   :  { %v939_v12 = vunpack.c.l.b16 %v499_v5  ;;  %v820_v15 = vrot.slane %v819_v63, 4  ;;  %v647_v17 = vrot.slane %v645_v4, 4  ;;  %v658_v19 = vshrl.u32 %v98_v57, 16  ;;  %v73_v63 = vld [vmem:[%s7508_s0 + $0xb4] sm:$0xf] }
  0x6d   :  { %v830_v21 = vrot.slane %v829_v6, 4  ;;  %v650_v25 = vrot.slane %v648_v8, 5  ;;  %v656_v26 = vrot.slane %v654_v9, 5  ;;  %v664_v28 = vshll.u32 %v99_v3, 16  ;;  %v74_v5 = vld [vmem:[%s7508_s0 + $0xb8] sm:$0xf] }
  0x6e   :  { %v5569_v31 = vpack.c.b16 %v939_v12, %v938_v62  ;;  %v825_v33 = vsel %vm5175_vm4, %v820_v15, %v824_v60  ;;  %v660_v35 = vrot.slane %v658_v19, 4  ;;  %v285_v47 = vshrl.u32 %v5567_v30, 16  ;;  %v75_v6 = vld [vmem:[%s7508_s0 + $0xbc] sm:$0x1] }
  0x6f   :  { %v835_v39 = vsel %vm5175_vm4, %v830_v21, %v834_v0  ;;  %v966_v41 = vunpack.c.l.b16 %v825_v33  ;;  %v651_v43 = vor.u32 %v650_v25, %v647_v17  ;;  %v666_v44 = vrot.slane %v664_v28, 5 }
  0x70   :  { %7624 = vst [vmem:[#allocation19_spill] sm:$0xff] %v5569_v31  ;;  %4448 = vmatmul.msk.bf16.gmra.mxu1 %vm1006_vm3, %v5569_v31  ;;  %v967_v45 = vunpack.c.l.b16 %v835_v39  ;;  %v661_v46 = vor.u32 %v660_v35, %v656_v26  ;;  %v288_v48 = vshll.u32 %v5567_v30, 16  ;;  %v294_v54 = vshll.u32 %v5576_v36, 16 }
  0x71   :  { %v652_v53 = vrot.slane %v651_v43, 4  ;;  %v298_v56 = vshrl.u32 %v5576_v36, 16  ;;  %v304_v57 = vshll.u32 %v5581_v38, 16  ;;  %v287_v61 = vrot.slane %v285_v47, 4 }
  0x72   :  { %v5592_v59 = vpack.c.b16 %v967_v45, %v966_v41  ;;  %v662_v60 = vrot.slane %v661_v46, 4  ;;  %v290_v62 = vrot.slane %v288_v48, 5  ;;  %v296_v3 = vrot.slane %v294_v54, 5  ;;  %v123_v54 = vld [vmem:[%s7508_s0 + $0x17c] sm:$0x1] }
  0x73   :  { %v657_v0 = vsel %vm5175_vm4, %v652_v53, %v656_v26  ;;  %v300_v4 = vrot.slane %v298_v56, 4  ;;  %v306_v15 = vrot.slane %v304_v57, 5  ;;  %v501_v21 = vshrl.u32 %v73_v63, 16  ;;  %v122_v53 = vld [vmem:[%s7508_s0 + $0x178] sm:$0xf] }
  0x74   :  { %7625 = vst [vmem:[#allocation20_spill] sm:$0xff] %v5592_v59  ;;  %4462 = vmatmul.msk.bf16.gmra.mxu3 %vm1006_vm3, %v5592_v59  ;;  %v667_v8 = vsel %vm5175_vm4, %v662_v60, %v666_v44  ;;  %v952_v9 = vunpack.c.l.b16 %v657_v0  ;;  %v291_v12 = vor.u32 %v290_v62, %v287_v61  ;;  %v504_v25 = vshll.u32 %v73_v63, 16  ;;  %v121_v44 = vld [vmem:[%s7508_s0 + $0x174] sm:$0xf] }
  0x75   :  { %v953_v17 = vunpack.c.l.b16 %v667_v8  ;;  %v301_v19 = vor.u32 %v300_v4, %v296_v3  ;;  %v510_v28 = vshll.u32 %v74_v5, 16  ;;  %v514_v33 = vshrl.u32 %v74_v5, 16 }
  0x76   :  { %v292_v26 = vrot.slane %v291_v12, 4  ;;  %v520_v35 = vshll.u32 %v75_v6, 16  ;;  %v503_v43 = vrot.slane %v501_v21, 4  ;;  %v506_v45 = vrot.slane %v504_v25, 5 }
  0x77   :  { %v5609_v39 = vpack.c.b16 %v953_v17, %v952_v9  ;;  %v302_v41 = vrot.slane %v301_v19, 4  ;;  %v512_v47 = vrot.slane %v510_v28, 5  ;;  %v516_v48 = vrot.slane %v514_v33, 4  ;;  %v101_v28 = vld [vmem:[%s7508_s0 + $0x124] sm:$0xf] }
  0x78   :  { %v297_v46 = vsel %vm5175_vm4, %v292_v26, %v296_v3  ;;  %v507_v60 = vor.u32 %v506_v45, %v503_v43  ;;  %v522_v61 = vrot.slane %v520_v35, 5  ;;  %v837_v0 = vshrl.u32 %v121_v44, 16  ;;  %v102_v33 = vld [vmem:[%s7508_s0 + $0x128] sm:$0x1] }
  0x79   :  { %7626 = vst [vmem:[#allocation21_spill] sm:$0xff] %v5609_v39  ;;  %4455 = vmatmul.msk.bf16.gmra.mxu2 %vm1006_vm3, %v5609_v39  ;;  %v307_v56 = vsel %vm5175_vm4, %v302_v41, %v306_v15  ;;  %v922_v57 = vunpack.c.l.b16 %v297_v46  ;;  %v517_v63 = vor.u32 %v516_v48, %v512_v47  ;;  %v840_v3 = vshll.u32 %v121_v44, 16  ;;  %v100_v15 = vld [vmem:[%s7508_s0 + $0x120] sm:$0xf] }
  0x7a   :  { %v923_v62 = vunpack.c.l.b16 %v307_v56  ;;  %v508_v4 = vrot.slane %v507_v60, 4  ;;  %v846_v5 = vshll.u32 %v122_v53, 16  ;;  %v850_v6 = vshrl.u32 %v122_v53, 16 }
  0x7b   :  { %v856_v8 = vshll.u32 %v123_v54, 16  ;;  %v518_v12 = vrot.slane %v517_v63, 4  ;;  %v839_v17 = vrot.slane %v837_v0, 4  ;;  %v842_v19 = vrot.slane %v840_v3, 5 }
  0x7c   :  { %v5626_v9 = vpack.c.b16 %v923_v62, %v922_v57  ;;  %v513_v21 = vsel %vm5175_vm4, %v508_v4, %v512_v47  ;;  %v848_v25 = vrot.slane %v846_v5, 5  ;;  %v852_v26 = vrot.slane %v850_v6, 4  ;;  %v5655_v6 = vld [vmem:[%s7508_s0 + $0x58] sm:$0xf] }
  0x7d   :  { %v523_v35 = vsel %vm5175_vm4, %v518_v12, %v522_v61  ;;  %v940_v41 = vunpack.c.l.b16 %v513_v21  ;;  %v843_v43 = vor.u32 %v842_v19, %v839_v17  ;;  %v858_v45 = vrot.slane %v856_v8, 5  ;;  %v5648_v61 = vld [vmem:[%s7508_s0 + $0x54] sm:$0xf]  ;;  %v5660_v8 = vld [vmem:[%s7508_s0 + $0x5c] sm:$0x1] }
  0x7e   :  { %7627 = vst [vmem:[#allocation22_spill] sm:$0xff] %v5626_v9  ;;  %4440 = vmatmul.msk.bf16.gmra.mxu0 %vm1006_vm3, %v5626_v9  ;;  %v941_v44 = vunpack.c.l.b16 %v523_v35  ;;  %v853_v46 = vor.u32 %v852_v26, %v848_v25  ;;  %v669_v47 = vshrl.u32 %v100_v15, 16  ;;  %v672_v48 = vshll.u32 %v100_v15, 16 }
  0x7f   :  { %v844_v53 = vrot.slane %v843_v43, 4  ;;  %v678_v54 = vshll.u32 %v101_v28, 16  ;;  %v682_v56 = vshrl.u32 %v101_v28, 16  ;;  %v688_v57 = vshll.u32 %v102_v33, 16 }
  0x80   :  { %v5643_v60 = vpack.c.b16 %v941_v44, %v940_v41  ;;  %v854_v62 = vrot.slane %v853_v46, 4  ;;  %v671_v63 = vrot.slane %v669_v47, 4  ;;  %v674_v0 = vrot.slane %v672_v48, 5  ;;  %v82_v48 = vld [vmem:[%s7508_s0 + $0xd8] sm:$0xf] }
  0x81   :  { %v849_v3 = vsel %vm5175_vm4, %v844_v53, %v848_v25  ;;  %v680_v4 = vrot.slane %v678_v54, 5  ;;  %v684_v5 = vrot.slane %v682_v56, 4  ;;  %v690_v15 = vrot.slane %v688_v57, 5  ;;  %v5681_v57 = vld [vmem:[%s7508_s0 + $0xdc] sm:$0xf] }
  0x82   :  { %4449 = vmatmul.msk.bf16.gmra.mxu1 %vm1006_vm3, %v5643_v60  ;;  %v859_v12 = vsel %vm5175_vm4, %v854_v62, %v858_v45  ;;  %v968_v17 = vunpack.c.l.b16 %v849_v3  ;;  %v675_v19 = vor.u32 %v674_v0, %v671_v63  ;;  %v309_v26 = vshrl.u32 %v5648_v61, 16  ;;  %v5686_v62 = vld [vmem:[%s7508_s0 + $0xe0] sm:$0x1] }
  0x83   :  { %v969_v21 = vunpack.c.l.b16 %v859_v12  ;;  %v685_v25 = vor.u32 %v684_v5, %v680_v4  ;;  %v312_v28 = vshll.u32 %v5648_v61, 16  ;;  %v318_v35 = vshll.u32 %v5655_v6, 16 }
  0x84   :  { %v676_v33 = vrot.slane %v675_v19, 4  ;;  %v322_v41 = vshrl.u32 %v5655_v6, 16  ;;  %v328_v43 = vshll.u32 %v5660_v8, 16  ;;  %v311_v45 = vrot.slane %v309_v26, 4 }
  0x85   :  { %v5671_v44 = vpack.c.b16 %v969_v21, %v968_v17  ;;  %v686_v46 = vrot.slane %v685_v25, 4  ;;  %v314_v47 = vrot.slane %v312_v28, 5  ;;  %v320_v54 = vrot.slane %v318_v35, 5 }
  0x86   :  { %v681_v53 = vsel %vm5175_vm4, %v676_v33, %v680_v4  ;;  %v324_v56 = vrot.slane %v322_v41, 4  ;;  %v330_v4 = vrot.slane %v328_v43, 5  ;;  %v525_v17 = vshrl.u32 %v82_v48, 16  ;;  %v124_v43 = vld [vmem:[%s7508_s0 + $0x180] sm:$0xf] }
  0x87   :  { %7628 = vst [vmem:[#allocation23_spill] sm:$0xff] %v5671_v44  ;;  %4463 = vmatmul.msk.bf16.gmra.mxu3 %vm1006_vm3, %v5671_v44  ;;  %v691_v63 = vsel %vm5175_vm4, %v686_v46, %v690_v15  ;;  %v954_v0 = vunpack.c.l.b16 %v681_v53  ;;  %v315_v3 = vor.u32 %v314_v47, %v311_v45  ;;  %v528_v19 = vshll.u32 %v82_v48, 16  ;;  %v125_v53 = vld [vmem:[%s7508_s0 + $0x184] sm:$0xf] }
  0x88   :  { %v955_v5 = vunpack.c.l.b16 %v691_v63  ;;  %v325_v12 = vor.u32 %v324_v56, %v320_v54  ;;  %v534_v25 = vshll.u32 %v5681_v57, 16  ;;  %v538_v26 = vshrl.u32 %v5681_v57, 16  ;;  %v126_v56 = vld [vmem:[%s7508_s0 + $0x188] sm:$0x1] }
  0x89   :  { %v316_v21 = vrot.slane %v315_v3, 4  ;;  %v544_v28 = vshll.u32 %v5686_v62, 16  ;;  %v527_v15 = vrot.slane %v525_v17, 4  ;;  %v530_v46 = vrot.slane %v528_v19, 5 }
  0x8a   :  { %v5697_v35 = vpack.c.b16 %v955_v5, %v954_v0  ;;  %v326_v41 = vrot.slane %v325_v12, 4  ;;  %v536_v47 = vrot.slane %v534_v25, 5  ;;  %v540_v48 = vrot.slane %v538_v26, 4 }
  0x8b   :  { %v321_v45 = vsel %vm5175_vm4, %v316_v21, %v320_v54  ;;  %v531_v3 = vor.u32 %v530_v46, %v527_v15  ;;  %v546_v5 = vrot.slane %v544_v28, 5  ;;  %v861_v19 = vshrl.u32 %v124_v43, 16 }
  0x8c   :  { %7629 = vst [vmem:[#allocation24_spill] sm:$0xff] %v5697_v35  ;;  %4456 = vmatmul.msk.bf16.gmra.mxu2 %vm1006_vm3, %v5697_v35  ;;  %v331_v63 = vsel %vm5175_vm4, %v326_v41, %v330_v4  ;;  %v924_v0 = vunpack.c.l.b16 %v321_v45  ;;  %v541_v17 = vor.u32 %v540_v48, %v536_v47  ;;  %v864_v21 = vshll.u32 %v124_v43, 16  ;;  %v4963_v4 = vld [vmem:[%s7508_s0 + $0x8] sm:$0x1]  ;;  %v5726_v43 = vld [vmem:[%s7508_s0 + $0x60] sm:$0xf] }
  0x8d   :  { %v5695_v33 = vpop.f32.mrf.mxu0  ;;  %v925_v12 = vunpack.c.l.b16 %v331_v63  ;;  %v532_v25 = vrot.slane %v531_v3, 4  ;;  %v870_v26 = vshll.u32 %v125_v53, 16  ;;  %v874_v44 = vshrl.u32 %v125_v53, 16 }
  0x8e   :  { %v880_v59 = vshll.u32 %v126_v56, 16  ;;  %v542_v55 = vrot.slane %v541_v17, 4  ;;  %v863_v14 = vrot.slane %v861_v19, 4  ;;  %v866_v42 = vrot.slane %v864_v21, 5 }
  0x8f   :  { %v5714_v54 = vpop.f32.mrf.mxu1  ;;  %v5716_v49 = vpack.c.b16 %v925_v12, %v924_v0  ;;  %v1744_v28 = vrot.slane %v4963_v4, 5  ;;  %v537_v41 = vsel %vm5175_vm4, %v532_v25, %v536_v47  ;;  %v872_v15 = vrot.slane %v870_v26, 5  ;;  %v5735_v47 = vld [vmem:[%s7508_s0 + $0x64] sm:$0xf] }
  0x90   :  { %v876_v46 = vrot.slane %v874_v44, 4  ;;  %v547_v45 = vsel %vm5175_vm4, %v542_v55, %v546_v5  ;;  %v942_v48 = vunpack.c.l.b16 %v537_v41  ;;  %v867_v53 = vor.u32 %v866_v42, %v863_v14  ;;  %v4964_v42 = vld [vmem:[%s7508_s0] sm:$0xf]  ;;  %v4965_v55 = vld [vmem:[%s7508_s0 + $0x4] sm:$0xf] }
  0x91   :  { %7630 = vst [vmem:[#allocation25_spill] sm:$0xff] %v5716_v49  ;;  %4441 = vmatmul.msk.bf16.gmra.mxu0 %vm1006_vm3, %v5716_v49  ;;  %v882_v56 = vrot.slane %v880_v59, 5  ;;  %v943_v63 = vunpack.c.l.b16 %v547_v45  ;;  %vm1736_vm5 = vcmask 1042432   ;;  %vm1737_vm6 = vcmask 1046532   ;;  %v5761_v45 = vld [vmem:[%s7508_s0 + $0x68] sm:$0x1] }
  0x92   :  { %v877_v0 = vor.u32 %v876_v46, %v872_v15  ;;  %v868_v3 = vrot.slane %v867_v53, 4  ;;  %vm5739_vm7 = vmor %vm1736_vm5, %vm1737_vm6  ;;  %v4626_v14 = vrot.slane %v4964_v42, 9  ;;  %v1741_v59 = vrot.slane %v4965_v55, 5 }
  0x93   :  { %v333_v5 = vshrl.u32 %v5726_v43, 16  ;;  %v990_v17 = vpack.c.b16 %v943_v63, %v942_v48  ;;  %v336_v21 = vshll.u32 %v5726_v43, 16  ;;  %v342_v25 = vshll.u32 %v5735_v47, 16 }
  0x94   :  { %v878_v19 = vrot.slane %v877_v0, 4  ;;  %v873_v4 = vsel %vm5175_vm4, %v868_v3, %v872_v15  ;;  %v1742_v41 = vsel %vm5739_vm7, %v4626_v14, %v1741_v59  ;;  %v1743_v46 = vrot.slane %v1741_v59, 4  ;;  %v127_v15 = vld [vmem:[%s7508_s0 + $0x18c] sm:$0xf] }
  0x95   :  { %v5737_v44 = vpop.f32.mrf.mxu0  ;;  %v335_v48 = vrot.slane %v333_v5, 4  ;;  %4450 = vmatmul.msk.bf16.gmra.mxu1 %vm1006_vm3, %v990_v17  ;;  %v970_v63 = vunpack.c.l.b16 %v873_v4  ;;  %v1965_v0 = vunpack.c.l.b16 %v1742_v41  ;;  %v338_v42 = vrot.slane %v336_v21, 5  ;;  %v128_v5 = vld [vmem:[%s7508_s0 + $0x190] sm:$0xf] }
  0x96   :  { %v883_v53 = vsel %vm5175_vm4, %v878_v19, %v882_v56  ;;  %v1745_v14 = vsel %vm5739_vm7, %v1743_v46, %v1744_v28  ;;  %v344_v55 = vrot.slane %v342_v25, 5  ;;  %v346_v59 = vshrl.u32 %v5735_v47, 16  ;;  %v129_v28 = vld [vmem:[%s7508_s0 + $0x194] sm:$0x1] }
  0x97   :  { %v5752_v26 = vpop.f32.mrf.mxu1  ;;  %v971_v3 = vunpack.c.l.b16 %v883_v53  ;;  %v1966_v56 = vunpack.c.l.b16 %v1745_v14  ;;  %v339_v19 = vor.u32 %v338_v42, %v335_v48  ;;  %v352_v21 = vshll.u32 %v5761_v45, 16 }
  0x98   :  { %v348_v41 = vrot.slane %v346_v59, 4  ;;  %v885_v25 = vshrl.u32 %v127_v15, 16  ;;  %v888_v46 = vshll.u32 %v127_v15, 16  ;;  %v894_v20 = vshll.u32 %v128_v5, 16 }
  0x99   :  { %v5778_v4 = vpack.c.b16 %v971_v3, %v970_v63  ;;  %v2029_v32 = vpack.c.b16 %v1966_v56, %v1965_v0  ;;  %v340_v35 = vrot.slane %v339_v19, 4  ;;  %v354_v39 = vrot.slane %v352_v21, 5  ;;  %v4800_v0 = vld [vmem:[%s7509_s1 + $0xc] sm:$0x3] }
  0x9a   :  { %v5775_v17 = vpop.f32.mrf.mxu3  ;;  %v349_v48 = vor.u32 %v348_v41, %v344_v55  ;;  %v887_v42 = vrot.slane %v885_v25, 4  ;;  %v890_v63 = vrot.slane %v888_v46, 5  ;;  %v898_v3 = vshrl.u32 %v128_v5, 16  ;;  %v4841_v5 = vld [vmem:[%s7509_s1 + $0xe] sm:$0x3] }
  0x9b   :  { %7633 = vst [vmem:[#allocation26_spill] sm:$0xff] %v5775_v17  ;;  %4464 = vmatmul.msk.bf16.gmra.mxu3 %vm1006_vm3, %v5778_v4  ;;  %v345_v14 = vsel %vm5175_vm4, %v340_v35, %v344_v55  ;;  %v896_v59 = vrot.slane %v894_v20, 5  ;;  %v904_v15 = vshll.u32 %v129_v28, 16  ;;  %v4966_v20 = vld [vmem:[%s7508_s0 + $0xc] sm:$0xf]  ;;  %vm4161_vm8 = vcmask 64512  }
  0x9c   :  { %7634 = vst [vmem:[#allocation27_spill] sm:$0xff] %v5778_v4  ;;  %4659 = vmatmul.msk.bf16.vlgmr.msrb.gmra.mxu2 %vm1006_vm3, %v2029_v32  ;;  %v350_v56 = vrot.slane %v349_v48, 4  ;;  %v926_v19 = vunpack.c.l.b16 %v345_v14  ;;  %v891_v21 = vor.u32 %v890_v63, %v887_v42  ;;  %v900_v41 = vrot.slane %v898_v3, 4  ;;  %v4967_v55 = vld [vmem:[%s7508_s0 + $0x10] sm:$0xf] }
  0x9d   :  { %v5783_v53 = vpop.f32.mrf.mxu0  ;;  %v906_v32 = vrot.slane %v904_v15, 5  ;;  %v4627_v35 = vrot.slane %v4966_v20, 9  ;;  %v1748_v28 = vrot.slane %v4967_v55, 5  ;;  %v4968_v25 = vld [vmem:[%s7508_s0 + $0x14] sm:$0x1]  ;;  %v3230_v15 = vsel %vm1103_vm0, %v4800_v0, 0 }
  0x9e   :  { %v1751_v46 = vrot.slane %v4968_v25, 5  ;;  %v4767_v48 = vld [vmem:[%s7509_s1 + $0xa] sm:$0x3]  ;;  %v355_v42 = vsel %vm5175_vm4, %v350_v56, %v354_v39  ;;  %v892_v63 = vrot.slane %v891_v21, 4  ;;  %v901_v3 = vor.u32 %v900_v41, %v896_v59  ;;  %v4876_v20 = vld [vmem:[%s7509_s1 + $0x10] sm:$0x3]  ;;  %3239 = vmatpush.bf16.msra.mxu2 %v3230_v15 }
  0x9f   :  { %v5790_v17 = vpop.f32.mrf.mxu1  ;;  %v927_v55 = vunpack.c.l.b16 %v355_v42  ;;  %v1750_v4 = vrot.slane %v1748_v28, 4  ;;  %v3528_v25 = vsel %vm1103_vm0, %v4841_v5, 0  ;;  %v1749_v39 = vsel %vm5739_vm7, %v4627_v35, %v1748_v28  ;;  %v4914_v41 = vld [vmem:[%s7508_s0] sm:$0xff] }
  0xa0   :  { %v897_v16 = vsel %vm5175_vm4, %v892_v63, %v896_v59  ;;  %v902_v40 = vrot.slane %v901_v3, 4  ;;  %3537 = vmatpush.bf16.msra.mxu3 %v3528_v25  ;;  %v2976_v56 = vsel %vm1103_vm0, %v4767_v48, 0  ;;  %v3794_v59 = vsel %vm1103_vm0, %v4876_v20, 0  ;;  %v4970_v20 = vld [vmem:[%s7508_s0 + $0x18] sm:$0xf] }
  0xa1   :  { %v5826_v21 = vpack.c.b16 %v927_v55, %v926_v19  ;;  %v1752_v5 = vsel %vm5739_vm7, %v1750_v4, %v1751_v46  ;;  %2985 = vmatpush.bf16.msra.mxu1 %v2976_v56  ;;  %v972_v28 = vunpack.c.l.b16 %v897_v16  ;;  %3803 = vmatpush.bf16.msra.mxu0 %v3794_v59  ;;  %v1967_v48 = vunpack.c.l.b16 %v1749_v39  ;;  %v4971_v39 = vld [vmem:[%s7508_s0 + $0x20] sm:$0x1] }
  0xa2   :  { %v5812_v14 = vpop.f32.mrf.mxu3  ;;  %v907_v35 = vsel %vm5175_vm4, %v902_v40, %v906_v32  ;;  %v1968_v42 = vunpack.c.l.b16 %v1752_v5  ;;  %v4969_v40 = vld [vmem:[%s7508_s0 + $0x1c] sm:$0xf]  ;;  %v4628_v55 = vrot.slane %v4970_v20, 9  ;;  %v1758_v56 = vrot.slane %v4971_v39, 5  ;;  %v4973_v39 = vld [vmem:[%s7508_s0 + $0x24] sm:$0xf] }
  0xa3   :  { %7635 = vst [vmem:[#allocation28_spill] sm:$0xff] %v5812_v14  ;;  %4442 = vmatmul.msk.bf16.gmra.mxu0 %vm1006_vm3, %v5826_v21  ;;  %v973_v19 = vunpack.c.l.b16 %v907_v35  ;;  %v1755_v16 = vrot.slane %v4969_v40, 5  ;;  %vm4309_vm9 = vcmask 1041409   ;;  %vm4334_vm10 = vcmask 254976  }
  0xa4   :  { %7636 = vst [vmem:[#allocation29_spill] sm:$0xff] %v5826_v21  ;;  %v5845_v46 = vpack.c.b16 %v1968_v42, %v1967_v48  ;;  %vm4354_vm14 = vcmask 261120  }
  0xa5   :  { %v5824_v0 = vpop.f32.mrf.mxu0  ;;  %4594 = vmatmul.msk.bf16.vlgmr.msrb.gmra.mxu1 %vm1006_vm3, %v4914_v41  ;;  %v5841_v3 = vpack.c.b16 %v973_v19, %v972_v28  ;;  %v1757_v25 = vrot.slane %v1755_v16, 4  ;;  %v1756_v59 = vsel %vm5739_vm7, %v4628_v55, %v1755_v16  ;;  %v4915_v28 = vld [vmem:[%s7508_s0 + $0xc] sm:$0xff]  ;;  %v4972_v16 = vld [vmem:[%s7508_s0 + $0x28] sm:$0xf] }
  0xa6   :  { %7639 = vst [vmem:[#allocation32_spill] sm:$0xff] %v5845_v46  ;;  %v1969_v19 = vunpack.c.l.b16 %v1756_v59  ;;  %v1762_v55 = vrot.slane %v4972_v16, 5 }
  0xa7   :  { %v5839_v63 = vpop.f32.mrf.mxu1  ;;  %7637 = vst [vmem:[#allocation30_spill] sm:$0xff] %v5841_v3  ;;  %v1759_v35 = vsel %vm5739_vm7, %v1757_v25, %v1758_v56  ;;  %v4629_v56 = vrot.slane %v4973_v39, 9  ;;  %v4916_v39 = vld [vmem:[%s7508_s0 + $0x18] sm:$0xff] }
  0xa8   :  { %v1970_v48 = vunpack.c.l.b16 %v1759_v35  ;;  %v1764_v59 = vrot.slane %v1762_v55, 4  ;;  %v4974_v35 = vld [vmem:[%s7508_s0 + $0x2c] sm:$0x1] }
  0xaa   :  { %v5882_v20 = vpack.c.b16 %v1970_v48, %v1969_v19  ;;  %v1765_v19 = vrot.slane %v4974_v35, 5 }
  0xab   :  { %v5843_v4 = vpop.f32.mrf.mxu3  ;;  %4465 = vmatmul.msk.bf16.gmra.mxu3 %vm1006_vm3, %v5841_v3 }
  0xac   :  { %7638 = vst [vmem:[#allocation31_spill] sm:$0xff] %v5843_v4  ;;  %4660 = vmatmul.msk.bf16.gmra.mxu2 %vm1006_vm3, %v5845_v46 }
  0xad   :  { %7642 = vst [vmem:[#allocation35_spill] sm:$0xff] %v5882_v20 }
  0xaf   :  { %v5852_v32 = vpop.f32.mrf.mxu0 }
  0xb0   :  { %v5856_v15 = vpop.f32.mrf.mxu2 }
  0xb3   :  { %v5866_v5 = vpop.f32.mrf.mxu3  ;;  %4733 = vmatmul.msk.bf16.vlgmr.msrb.gmra.mxu0 %vm1006_vm3, %v5248_v58 }
  0xb4   :  { %v5864_v41 = vpop.f32.mrf.mxu1  ;;  %7640 = vst [vmem:[#allocation33_spill] sm:$0xff] %v5866_v5 }
  0xb5   :  { %4595 = vmatmul.msk.bf16.gmra.mxu1 %vm1006_vm3, %v4915_v28 }
  0xb7   :  { %v5877_v42 = vpop.f32.mrf.mxu0 }
  0xb8   :  { %v5880_v40 = vpop.f32.mrf.mxu2 }
  0xb9   :  { %7641 = vst [vmem:[#allocation34_spill] sm:$0xff] %v5880_v40 }
  0xbb   :  { %4700 = vmatmul.msk.bf16.vlgmr.msrb.gmra.mxu3 %vm1006_vm3, %v4915_v28  ;;  %v1763_v28 = vsel %vm5739_vm7, %v4629_v56, %v1762_v55  ;;  %v1769_v56 = vrot.slane %v5416_v34, 5 }
  0xbc   :  { %v5887_v25 = vpop.f32.mrf.mxu1  ;;  %4661 = vmatmul.msk.bf16.gmra.mxu2 %vm1006_vm3, %v5882_v20  ;;  %v1766_v20 = vsel %vm5739_vm7, %v1764_v59, %v1765_v19 }
  0xbd   :  { %v1972_v5 = vunpack.c.l.b16 %v1766_v20  ;;  %v4630_v20 = vrot.slane %v5409_v22, 9  ;;  %v1771_v19 = vrot.slane %v1769_v56, 4 }
  0xbe   :  { %v5890_v58 = vpop.f32.mrf.mxu3 }
  0xbf   :  { %7643 = vst [vmem:[#allocation36_spill] sm:$0xff] %v5890_v58  ;;  %v1971_v58 = vunpack.c.l.b16 %v1763_v28  ;;  %v1772_v28 = vrot.slane %v5425_v37, 5 }
  0xc1   :  { %v5918_v4 = vpack.c.b16 %v1972_v5, %v1971_v58  ;;  %v1770_v58 = vsel %vm5739_vm7, %v4630_v20, %v1769_v56  ;;  %v1773_v34 = vsel %vm5739_vm7, %v1771_v19, %v1772_v28  ;;  %v1776_v19 = vrot.slane %v5497_v18, 5 }
  0xc2   :  { %v5900_v48 = vpop.f32.mrf.mxu0  ;;  %v1973_v22 = vunpack.c.l.b16 %v1770_v58  ;;  %v1974_v37 = vunpack.c.l.b16 %v1773_v34  ;;  %v4631_v58 = vrot.slane %v5488_v10, 9 }
  0xc3   :  { %v5902_v16 = vpop.f32.mrf.mxu2  ;;  %4734 = vmatmul.msk.bf16.gmra.mxu0 %vm1006_vm3, %v5320_v27  ;;  %7646 = vst [vmem:[#allocation39_spill] sm:$0xff] %v5918_v4  ;;  %v1778_v34 = vrot.slane %v1776_v19, 4 }
  0xc4   :  { %7644 = vst [vmem:[#allocation37_spill] sm:$0xff] %v5902_v16 }
  0xc5   :  { %4596 = vmatmul.msk.bf16.gmra.mxu1 %vm1006_vm3, %v4916_v39 }
  0xc6   :  { %v5913_v35 = vpop.f32.mrf.mxu1  ;;  %v5915_v46 = vpop.f32.mrf.mxu3 }
  0xc7   :  { %7645 = vst [vmem:[#allocation38_spill] sm:$0xff] %v5915_v46 }
  0xca   :  { %v5920_v55 = vpop.f32.mrf.mxu0 }
  0xcb   :  { %v5923_v59 = vpop.f32.mrf.mxu2  ;;  %4701 = vmatmul.msk.bf16.gmra.mxu3 %vm1006_vm3, %v4916_v39  ;;  %v4917_v39 = vld [vmem:[%s7508_s0 + $0x24] sm:$0xff] }
  0xcc   :  { %7647 = vst [vmem:[#allocation40_spill] sm:$0xff] %v5923_v59  ;;  %4662 = vmatmul.msk.bf16.gmra.mxu2 %vm1006_vm3, %v5918_v4 }
  0xce   :  { %v5930_v46 = vpop.f32.mrf.mxu1 }
  0xd2   :  { %v5932_v5 = vpop.f32.mrf.mxu3 }
  0xd3   :  { %7648 = vst [vmem:[#allocation41_spill] sm:$0xff] %v5932_v5  ;;  %4735 = vmatmul.msk.bf16.gmra.mxu0 %vm1006_vm3, %v5392_v1  ;;  %v5948_v5 = vpack.c.b16 %v1974_v37, %v1973_v22  ;;  %v1779_v1 = vrot.slane %v5504_v29, 5  ;;  %v1777_v37 = vsel %vm5739_vm7, %v4631_v58, %v1776_v19  ;;  %v1783_v58 = vrot.slane %v5576_v36, 5 }
  0xd4   :  { %v1975_v10 = vunpack.c.l.b16 %v1777_v37  ;;  %v1786_v37 = vrot.slane %v5581_v38, 5 }
  0xd5   :  { %v5941_v4 = vpop.f32.mrf.mxu0  ;;  %4597 = vmatmul.msk.bf16.gmra.mxu1 %vm1006_vm3, %v4917_v39  ;;  %7650 = vst [vmem:[#allocation43_spill] sm:$0xff] %v5948_v5  ;;  %v1780_v18 = vsel %vm5739_vm7, %v1778_v34, %v1779_v1 }
  0xd6   :  { %v5945_v27 = vpop.f32.mrf.mxu2  ;;  %v1976_v29 = vunpack.c.l.b16 %v1780_v18  ;;  %v4632_v18 = vrot.slane %v5567_v30, 9 }
  0xd7   :  { %7649 = vst [vmem:[#allocation42_spill] sm:$0xff] %v5945_v27 }
  0xd8   :  { %v5980_v19 = vpack.c.b16 %v1976_v29, %v1975_v10  ;;  %v1784_v36 = vsel %vm5739_vm7, %v4632_v18, %v1783_v58  ;;  %v1793_v18 = vrot.slane %v5660_v8, 5 }
  0xd9   :  { %v1977_v38 = vunpack.c.l.b16 %v1784_v36  ;;  %v4633_v36 = vrot.slane %v5648_v61, 9 }
  0xda   :  { %v5950_v56 = vpop.f32.mrf.mxu1  ;;  %v5952_v20 = vpop.f32.mrf.mxu3  ;;  %7654 = vst [vmem:[#allocation47_spill] sm:$0xff] %v5980_v19 }
  0xdb   :  { %7651 = vst [vmem:[#allocation44_spill] sm:$0xff] %v5952_v20  ;;  %4702 = vmatmul.msk.bf16.gmra.mxu3 %vm1006_vm3, %v4917_v39  ;;  %v4918_v39 = vld [vmem:[%s7508_s0 + $0x30] sm:$0xff] }
  0xdc   :  { %4663 = vmatmul.msk.bf16.gmra.mxu2 %vm1006_vm3, %v5948_v5 }
  0xdd   :  { %v5958_v28 = vpop.f32.mrf.mxu0 }
  0xde   :  { %v5962_v22 = vpop.f32.mrf.mxu2 }
  0xdf   :  { %7652 = vst [vmem:[#allocation45_spill] sm:$0xff] %v5962_v22 }
  0xe2   :  { %v5971_v5 = vpop.f32.mrf.mxu1 }
  0xe3   :  { %4736 = vmatmul.msk.bf16.gmra.mxu0 %vm1006_vm3, %v5471_v51 }
  0xe5   :  { %v5973_v20 = vpop.f32.mrf.mxu3  ;;  %4598 = vmatmul.msk.bf16.gmra.mxu1 %vm1006_vm3, %v4918_v39 }
  0xe6   :  { %7653 = vst [vmem:[#allocation46_spill] sm:$0xff] %v5973_v20  ;;  %v1785_v20 = vrot.slane %v1783_v58, 4  ;;  %v1790_v58 = vrot.slane %v5655_v6, 5 }
  0xe8   :  { %v5978_v14 = vpop.f32.mrf.mxu0  ;;  %v1791_v6 = vsel %vm5739_vm7, %v4633_v36, %v1790_v58 }
  0xe9   :  { %v5982_v1 = vpop.f32.mrf.mxu2  ;;  %v1979_v61 = vunpack.c.l.b16 %v1791_v6  ;;  %v4634_v6 = vrot.slane %v5726_v43, 9 }
  0xea   :  { %7655 = vst [vmem:[#allocation48_spill] sm:$0xff] %v5982_v1 }
  0xeb   :  { %4703 = vmatmul.msk.bf16.gmra.mxu3 %vm1006_vm3, %v4918_v39  ;;  %v1787_v39 = vsel %vm5739_vm7, %v1785_v20, %v1786_v37 }
  0xec   :  { %4664 = vmatmul.msk.bf16.gmra.mxu2 %vm1006_vm3, %v5980_v19  ;;  %v4919_v19 = vld [vmem:[%s7508_s0 + $0x3c] sm:$0xff]  ;;  %v1978_v30 = vunpack.c.l.b16 %v1787_v39  ;;  %v1792_v39 = vrot.slane %v1790_v58, 4 }
  0xed   :  { %v5986_v34 = vpop.f32.mrf.mxu3  ;;  %v5990_v51 = vpop.f32.mrf.mxu1 }
  0xee   :  { %7656 = vst [vmem:[#allocation49_spill] sm:$0xff] %v5986_v34 }
  0xf0   :  { %v5994_v10 = vpop.f32.mrf.mxu0 }
  0xf1   :  { %v5996_v29 = vpop.f32.mrf.mxu2 }
  0xf2   :  { %7657 = vst [vmem:[#allocation50_spill] sm:$0xff] %v5996_v29  ;;  %v6012_v29 = vpack.c.b16 %v1978_v30, %v1977_v38  ;;  %v4920_v30 = vld [vmem:[%s7508_s0 + $0x48] sm:$0xff] }
  0xf3   :  { %4737 = vmatmul.msk.bf16.gmra.mxu0 %vm1006_vm3, %v5550_v50 }
  0xf4   :  { %7659 = vst [vmem:[#allocation52_spill] sm:$0xff] %v6012_v29 }
  0xf5   :  { %v6007_v34 = vpop.f32.mrf.mxu1  ;;  %4599 = vmatmul.msk.bf16.gmra.mxu1 %vm1006_vm3, %v4919_v19 }
  0xf7   :  { %v6010_v3 = vpop.f32.mrf.mxu3 }
  0xf8   :  { %7658 = vst [vmem:[#allocation51_spill] sm:$0xff] %v6010_v3 }
  0xfb   :  { %v6015_v20 = vpop.f32.mrf.mxu0  ;;  %4704 = vmatmul.msk.bf16.gmra.mxu3 %vm1006_vm3, %v4919_v19  ;;  %v1794_v19 = vsel %vm5739_vm7, %v1792_v39, %v1793_v18  ;;  %v1797_v18 = vrot.slane %v5735_v47, 5  ;;  %v1800_v39 = vrot.slane %v5761_v45, 5 }
  0xfc   :  { %v6018_v37 = vpop.f32.mrf.mxu2  ;;  %4665 = vmatmul.msk.bf16.gmra.mxu2 %vm1006_vm3, %v6012_v29  ;;  %v1980_v29 = vunpack.c.l.b16 %v1794_v19 }
  0xfd   :  { %7660 = vst [vmem:[#allocation53_spill] sm:$0xff] %v6018_v37  ;;  %v1799_v19 = vrot.slane %v1797_v18, 4 }
  0xff   :  { %v6024_v50 = vpop.f32.mrf.mxu1  ;;  %v6026_v38 = vpop.f32.mrf.mxu3  ;;  %v1801_v47 = vsel %vm5739_vm7, %v1799_v19, %v1800_v39 }
 0x100   :  { %7661 = vst [vmem:[#allocation54_spill] sm:$0xff] %v6026_v38  ;;  %v6042_v38 = vpack.c.b16 %v1980_v29, %v1979_v61  ;;  %v1798_v61 = vsel %vm5739_vm7, %v4634_v6, %v1797_v18  ;;  %v4975_v6 = vld [vmem:[%s7508_s0 + $0x70] sm:$0xf] }
 0x101   :  { %v1981_v43 = vunpack.c.l.b16 %v1798_v61  ;;  %v1804_v19 = vrot.slane %v4975_v6, 5  ;;  %v4976_v61 = vld [vmem:[%s7508_s0 + $0x74] sm:$0x1] }
 0x102   :  { %7663 = vst [vmem:[#allocation56_spill] sm:$0xff] %v6042_v38 }
 0x103   :  { %4738 = vmatmul.msk.bf16.gmra.mxu0 %vm1006_vm3, %v5626_v9  ;;  %v6037_v8 = vpop.f32.mrf.mxu0 }
 0x104   :  { %v6039_v3 = vpop.f32.mrf.mxu2 }
 0x105   :  { %7662 = vst [vmem:[#allocation55_spill] sm:$0xff] %v6039_v3  ;;  %4600 = vmatmul.msk.bf16.gmra.mxu1 %vm1006_vm3, %v4920_v30 }
 0x107   :  { %v6044_v58 = vpop.f32.mrf.mxu1 }
 0x10a   :  { %v6047_v36 = vpop.f32.mrf.mxu3 }
 0x10b   :  { %7664 = vst [vmem:[#allocation57_spill] sm:$0xff] %v6047_v36  ;;  %4705 = vmatmul.msk.bf16.gmra.mxu3 %vm1006_vm3, %v4920_v30  ;;  %v4921_v30 = vld [vmem:[%s7508_s0 + $0x54] sm:$0xff]  ;;  %v1982_v36 = vunpack.c.l.b16 %v1801_v47  ;;  %v1807_v47 = vrot.slane %v4976_v61, 5  ;;  %v4922_v61 = vld [vmem:[%s7508_s0 + $0x60] sm:$0xff] }
 0x10c   :  { %4666 = vmatmul.msk.bf16.gmra.mxu2 %vm1006_vm3, %v6042_v38 }
 0x10d   :  { %v6076_v39 = vpack.c.b16 %v1982_v36, %v1981_v43  ;;  %v4977_v36 = vld [vmem:[%s7508_s0 + $0x6c] sm:$0xf] }
 0x10e   :  { %v6054_v9 = vpop.f32.mrf.mxu0  ;;  %v4635_v43 = vrot.slane %v4977_v36, 9 }
 0x10f   :  { %v6056_v29 = vpop.f32.mrf.mxu2  ;;  %7668 = vst [vmem:[#allocation61_spill] sm:$0xff] %v6076_v39 }
 0x110   :  { %7665 = vst [vmem:[#allocation58_spill] sm:$0xff] %v6056_v29  ;;  %v1805_v3 = vsel %vm5739_vm7, %v4635_v43, %v1804_v19 }
 0x111   :  { %v1983_v36 = vunpack.c.l.b16 %v1805_v3 }
 0x112   :  { %v6065_v38 = vpop.f32.mrf.mxu1  ;;  %v6067_v45 = vpop.f32.mrf.mxu3 }
 0x113   :  { %7666 = vst [vmem:[#allocation59_spill] sm:$0xff] %v6067_v45  ;;  %4739 = vmatmul.msk.bf16.gmra.mxu0 %vm1006_vm3, %v5716_v49  ;;  %v1806_v49 = vrot.slane %v1804_v19, 4 }
 0x115   :  { %4601 = vmatmul.msk.bf16.gmra.mxu1 %vm1006_vm3, %v4921_v30 }
 0x116   :  { %v6072_v29 = vpop.f32.mrf.mxu0 }
 0x117   :  { %v6074_v18 = vpop.f32.mrf.mxu2 }
 0x118   :  { %7667 = vst [vmem:[#allocation60_spill] sm:$0xff] %v6074_v18 }
 0x11a   :  { %v6082_v45 = vpop.f32.mrf.mxu1 }
 0x11b   :  { %4706 = vmatmul.msk.bf16.gmra.mxu3 %vm1006_vm3, %v4921_v30 }
 0x11c   :  { %4667 = vmatmul.msk.bf16.gmra.mxu2 %vm1006_vm3, %v6076_v39  ;;  %v1808_v39 = vsel %vm5739_vm7, %v1806_v49, %v1807_v47  ;;  %v4978_v47 = vld [vmem:[%s7508_s0 + $0x7c] sm:$0xf] }
 0x11e   :  { %v6092_v18 = vpop.f32.mrf.mxu3 }
 0x11f   :  { %7669 = vst [vmem:[#allocation62_spill] sm:$0xff] %v6092_v18  ;;  %v2169_v6 = vpop.f32.mrf.mxu2  ;;  %v1984_v18 = vunpack.c.l.b16 %v1808_v39  ;;  %v4980_v39 = vld [vmem:[%s7508_s0 + $0x78] sm:$0xf] }
 0x120   :  { %v6094_v30 = vpop.f32.mrf.mxu0 }
 0x121   :  { %v6109_v43 = vpack.c.b16 %v1984_v18, %v1983_v36 }
 0x122   :  { %v1544_v37 = vpop.f32.mrf.mxu1 }
 0x123   :  { %v1545_v1 = vadd.f32 %v1544_v37, %v5695_v33  ;;  %4740 = vmatmul.msk.bf16.gmra.mxu0 %vm1006_vm3, %v5826_v21  ;;  %7671 = vst [vmem:[#allocation64_spill] sm:$0xff] %v6109_v43  ;;  %v1811_v33 = vrot.slane %v4978_v47, 5 }
 0x125   :  { %v2329_v27 = vadd.f32 %v2169_v6, %v1545_v1  ;;  %4602 = vmatmul.msk.bf16.gmra.mxu1 %vm1006_vm3, %v4922_v61  ;;  %v4979_v1 = vld [vmem:[%s7508_s0 + $0x80] sm:$0x1]  ;;  %v4636_v6 = vrot.slane %v4980_v39, 9  ;;  %v1813_v36 = vrot.slane %v1811_v33, 4 }
 0x126   :  { %v6106_v22 = vpop.f32.mrf.mxu3  ;;  %v1814_v18 = vrot.slane %v4979_v1, 5  ;;  %v4923_v1 = vld [vmem:[%s7508_s0 + $0x6c] sm:$0xff] }
 0x127   :  { %7670 = vst [vmem:[#allocation63_spill] sm:$0xff] %v6106_v22  ;;  %v2171_v19 = vpop.f32.mrf.mxu2 }
 0x128   :  { %v6111_v49 = vpop.f32.mrf.mxu0 }
 0x12a   :  { %v1546_v37 = vpop.f32.mrf.mxu1 }
 0x12b   :  { %4707 = vmatmul.msk.bf16.gmra.mxu3 %vm1006_vm3, %v4922_v61  ;;  %v1547_v3 = vadd.f32 %v1546_v37, %v5737_v44  ;;  %v1812_v44 = vsel %vm5739_vm7, %v4636_v6, %v1811_v33  ;;  %v1815_v37 = vsel %vm5739_vm7, %v1813_v36, %v1814_v18  ;;  %v4981_v36 = vld [vmem:[%s7508_s0 + $0x88] sm:$0xf] }
 0x12c   :  { %4668 = vmatmul.msk.bf16.gmra.mxu2 %vm1006_vm3, %v6109_v43  ;;  %v1985_v39 = vunpack.c.l.b16 %v1812_v44  ;;  %v1818_v16 = vrot.slane %v4981_v36, 5  ;;  %v4983_v44 = vld [vmem:[%s7508_s0 + $0x84] sm:$0xf] }
 0x12d   :  { %v2330_v61 = vadd.f32 %v2171_v19, %v1547_v3  ;;  %v1986_v19 = vunpack.c.l.b16 %v1815_v37  ;;  %v4637_v37 = vrot.slane %v4983_v44, 9 }
 0x12e   :  { %v6126_v47 = vpop.f32.mrf.mxu3 }
 0x12f   :  { %7672 = vst [vmem:[#allocation65_spill] sm:$0xff] %v6126_v47  ;;  %v2174_v21 = vpop.f32.mrf.mxu2  ;;  %v6141_v6 = vpack.c.b16 %v1986_v19, %v1985_v39  ;;  %v1820_v39 = vrot.slane %v1818_v16, 4 }
 0x130   :  { %v2721_v22 = vpop.f32.mrf.mxu0 }
 0x131   :  { %7674 = vst [vmem:[#allocation67_spill] sm:$0xff] %v6141_v6 }
 0x132   :  { %v1549_v43 = vpop.f32.mrf.mxu1 }
 0x133   :  { %v1550_v59 = vadd.f32 %v1549_v43, %v5783_v53  ;;  %4741 = vmatmul.msk.bf16.gmra.mxu0 %vm1006_vm3, %v5211_v7 }
 0x135   :  { %v2331_v47 = vadd.f32 %v2174_v21, %v1550_v59  ;;  %4603 = vmatmul.msk.bf16.gmra.mxu1 %vm1006_vm3, %v4923_v1  ;;  %v4982_v21 = vld [vmem:[%s7508_s0 + $0x8c] sm:$0x1] }
 0x136   :  { %v6138_v3 = vpop.f32.mrf.mxu3  ;;  %v1821_v59 = vrot.slane %v4982_v21, 5  ;;  %v4924_v21 = vld [vmem:[%s7508_s0 + $0x78] sm:$0xff] }
 0x137   :  { %7673 = vst [vmem:[#allocation66_spill] sm:$0xff] %v6138_v3  ;;  %v2176_v33 = vpop.f32.mrf.mxu2 }
 0x138   :  { %v2723_v18 = vpop.f32.mrf.mxu0 }
 0x13a   :  { %v1551_v53 = vpop.f32.mrf.mxu1 }
 0x13b   :  { %4708 = vmatmul.msk.bf16.gmra.mxu3 %vm1006_vm3, %v4923_v1  ;;  %v1552_v43 = vadd.f32 %v1551_v53, %v5824_v0  ;;  %v1819_v0 = vsel %vm5739_vm7, %v4637_v37, %v1818_v16  ;;  %v1822_v53 = vsel %vm5739_vm7, %v1820_v39, %v1821_v59  ;;  %v4984_v39 = vld [vmem:[%s7508_s0 + $0x94] sm:$0xf] }
 0x13c   :  { %4669 = vmatmul.msk.bf16.gmra.mxu2 %vm1006_vm3, %v6141_v6 }
 0x13d   :  { %v2332_v36 = vadd.f32 %v2176_v33, %v1552_v43  ;;  %v1988_v33 = vunpack.c.l.b16 %v1822_v53  ;;  %v4986_v53 = vld [vmem:[%s7508_s0 + $0x90] sm:$0xf] }
 0x13e   :  { %v2423_v19 = vpop.f32.mrf.mxu3 }
 0x13f   :  { %v2583_v1 = vadd.f32 %v2423_v19, %v2329_v27  ;;  %v2179_v7 = vpop.f32.mrf.mxu2  ;;  %v1987_v27 = vunpack.c.l.b16 %v1819_v0 }
 0x140   :  { %v2726_v3 = vpop.f32.mrf.mxu0 }
 0x141   :  { %v6160_v6 = vadd.f32 %v2721_v22, %v2583_v1  ;;  %v6169_v22 = vpack.c.b16 %v1988_v33, %v1987_v27  ;;  %v1825_v1 = vrot.slane %v4984_v39, 5 }
 0x142   :  { %v1554_v40 = vpop.f32.mrf.mxu1 }
 0x143   :  { %v1555_v44 = vadd.f32 %v1554_v40, %v5852_v32  ;;  %4742 = vmatmul.msk.bf16.gmra.mxu0 %vm1006_vm3, %v5266_v13  ;;  %7675 = vst [vmem:[#allocation68_spill] sm:$0xff] %v6169_v22 }
 0x145   :  { %v2333_v19 = vadd.f32 %v2179_v7, %v1555_v44  ;;  %4604 = vmatmul.msk.bf16.gmra.mxu1 %vm1006_vm3, %v4924_v21  ;;  %v4985_v7 = vld [vmem:[%s7508_s0 + $0x98] sm:$0x1]  ;;  %v4638_v44 = vrot.slane %v4986_v53, 9 }
 0x146   :  { %v2425_v43 = vpop.f32.mrf.mxu3 }
 0x147   :  { %v2584_v16 = vadd.f32 %v2425_v43, %v2330_v61  ;;  %v2181_v59 = vpop.f32.mrf.mxu2  ;;  %v1828_v61 = vrot.slane %v4985_v7, 5  ;;  %v4925_v7 = vld [vmem:[%s7508_s0 + $0x84] sm:$0xff] }
 0x148   :  { %v2728_v37 = vpop.f32.mrf.mxu0 }
 0x149   :  { %v6174_v32 = vadd.f32 %v2723_v18, %v2584_v16  ;;  %v1827_v18 = vrot.slane %v1825_v1, 4 }
 0x14a   :  { %v1556_v40 = vpop.f32.mrf.mxu1 }
 0x14b   :  { %4709 = vmatmul.msk.bf16.gmra.mxu3 %vm1006_vm3, %v4924_v21  ;;  %v1557_v0 = vadd.f32 %v1556_v40, %v5877_v42  ;;  %v1826_v42 = vsel %vm5739_vm7, %v4638_v44, %v1825_v1  ;;  %v1829_v39 = vsel %vm5739_vm7, %v1827_v18, %v1828_v61  ;;  %v4987_v18 = vld [vmem:[%s7508_s0 + $0xa0] sm:$0xf] }
 0x14c   :  { %4670 = vmatmul.msk.bf16.gmra.mxu2 %vm1006_vm3, %v6169_v22 }
 0x14d   :  { %v2334_v33 = vadd.f32 %v2181_v59, %v1557_v0  ;;  %v1990_v59 = vunpack.c.l.b16 %v1829_v39  ;;  %v4989_v39 = vld [vmem:[%s7508_s0 + $0x9c] sm:$0xf] }
 0x14e   :  { %v2428_v27 = vpop.f32.mrf.mxu3 }
 0x14f   :  { %v2585_v21 = vadd.f32 %v2428_v27, %v2331_v47  ;;  %v2184_v43 = vpop.f32.mrf.mxu2  ;;  %v1989_v47 = vunpack.c.l.b16 %v1826_v42 }
 0x150   :  { %v2731_v16 = vpop.f32.mrf.mxu0 }
 0x151   :  { %v6190_v40 = vadd.f32 %v2726_v3, %v2585_v21  ;;  %v6199_v3 = vpack.c.b16 %v1990_v59, %v1989_v47  ;;  %v1832_v21 = vrot.slane %v4987_v18, 5 }
 0x152   :  { %v1559_v22 = vpop.f32.mrf.mxu1 }
 0x153   :  { %v1560_v53 = vadd.f32 %v1559_v22, %v5900_v48  ;;  %4743 = vmatmul.msk.bf16.gmra.mxu0 %vm1006_vm3, %v5340_v52  ;;  %7676 = vst [vmem:[#allocation69_spill] sm:$0xff] %v6199_v3 }
 0x155   :  { %v2335_v27 = vadd.f32 %v2184_v43, %v1560_v53  ;;  %4605 = vmatmul.msk.bf16.gmra.mxu1 %vm1006_vm3, %v4925_v7  ;;  %v4639_v53 = vrot.slane %v4989_v39, 9 }
 0x156   :  { %v2430_v0 = vpop.f32.mrf.mxu3 }
 0x157   :  { %v2586_v1 = vadd.f32 %v2430_v0, %v2332_v36  ;;  %v2186_v61 = vpop.f32.mrf.mxu2  ;;  %v4988_v36 = vld [vmem:[%s7508_s0 + $0xa4] sm:$0x1] }
 0x158   :  { %v2733_v44 = vpop.f32.mrf.mxu0  ;;  %v1835_v43 = vrot.slane %v4988_v36, 5  ;;  %v4926_v36 = vld [vmem:[%s7508_s0 + $0x90] sm:$0xff] }
 0x159   :  { %v6204_v48 = vadd.f32 %v2728_v37, %v2586_v1  ;;  %v1834_v37 = vrot.slane %v1832_v21, 4 }
 0x15a   :  { %v1561_v22 = vpop.f32.mrf.mxu1 }
 0x15b   :  { %4710 = vmatmul.msk.bf16.gmra.mxu3 %vm1006_vm3, %v4925_v7  ;;  %v1562_v42 = vadd.f32 %v1561_v22, %v5920_v55  ;;  %v1833_v55 = vsel %vm5739_vm7, %v4639_v53, %v1832_v21  ;;  %v1836_v18 = vsel %vm5739_vm7, %v1834_v37, %v1835_v43  ;;  %v4990_v37 = vld [vmem:[%s7508_s0 + $0xac] sm:$0xf] }
 0x15c   :  { %4671 = vmatmul.msk.bf16.gmra.mxu2 %vm1006_vm3, %v6199_v3 }
 0x15d   :  { %v2336_v59 = vadd.f32 %v2186_v61, %v1562_v42  ;;  %v1992_v61 = vunpack.c.l.b16 %v1836_v18  ;;  %v4992_v18 = vld [vmem:[%s7508_s0 + $0xa8] sm:$0xf] }
 0x15e   :  { %v2433_v47 = vpop.f32.mrf.mxu3 }
 0x15f   :  { %v2587_v7 = vadd.f32 %v2433_v47, %v2333_v19  ;;  %v2189_v0 = vpop.f32.mrf.mxu2  ;;  %v1991_v19 = vunpack.c.l.b16 %v1833_v55 }
 0x160   :  { %v2736_v1 = vpop.f32.mrf.mxu0 }
 0x161   :  { %v6220_v22 = vadd.f32 %v2731_v16, %v2587_v7  ;;  %v6229_v16 = vpack.c.b16 %v1992_v61, %v1991_v19  ;;  %v1839_v7 = vrot.slane %v4990_v37, 5 }
 0x162   :  { %v1564_v3 = vpop.f32.mrf.mxu1 }
 0x163   :  { %v1565_v39 = vadd.f32 %v1564_v3, %v5941_v4  ;;  %4744 = vmatmul.msk.bf16.gmra.mxu0 %vm1006_vm3, %v5411_v23  ;;  %7677 = vst [vmem:[#allocation70_spill] sm:$0xff] %v6229_v16 }
 0x165   :  { %v2337_v47 = vadd.f32 %v2189_v0, %v1565_v39  ;;  %4606 = vmatmul.msk.bf16.gmra.mxu1 %vm1006_vm3, %v4926_v36  ;;  %v4640_v39 = vrot.slane %v4992_v18, 9 }
 0x166   :  { %v2435_v42 = vpop.f32.mrf.mxu3 }
 0x167   :  { %v2588_v21 = vadd.f32 %v2435_v42, %v2334_v33  ;;  %v2191_v43 = vpop.f32.mrf.mxu2  ;;  %v4991_v33 = vld [vmem:[%s7508_s0 + $0xb0] sm:$0x1] }
 0x168   :  { %v2738_v53 = vpop.f32.mrf.mxu0  ;;  %v1842_v0 = vrot.slane %v4991_v33, 5  ;;  %v4927_v33 = vld [vmem:[%s7508_s0 + $0x9c] sm:$0xff] }
 0x169   :  { %v6234_v4 = vadd.f32 %v2733_v44, %v2588_v21  ;;  %v1841_v44 = vrot.slane %v1839_v7, 4 }
 0x16a   :  { %v1566_v3 = vpop.f32.mrf.mxu1 }
 0x16b   :  { %4711 = vmatmul.msk.bf16.gmra.mxu3 %vm1006_vm3, %v4926_v36  ;;  %v1567_v55 = vadd.f32 %v1566_v3, %v5958_v28  ;;  %v1840_v28 = vsel %vm5739_vm7, %v4640_v39, %v1839_v7  ;;  %v1843_v37 = vsel %vm5739_vm7, %v1841_v44, %v1842_v0  ;;  %v4993_v44 = vld [vmem:[%s7508_s0 + $0xb8] sm:$0xf] }
 0x16c   :  { %4672 = vmatmul.msk.bf16.gmra.mxu2 %vm1006_vm3, %v6229_v16 }
 0x16d   :  { %v2338_v61 = vadd.f32 %v2191_v43, %v1567_v55  ;;  %v1994_v43 = vunpack.c.l.b16 %v1843_v37  ;;  %v4995_v37 = vld [vmem:[%s7508_s0 + $0xb4] sm:$0xf] }
 0x16e   :  { %v2438_v19 = vpop.f32.mrf.mxu3 }
 0x16f   :  { %v2589_v36 = vadd.f32 %v2438_v19, %v2335_v27  ;;  %v2194_v42 = vpop.f32.mrf.mxu2  ;;  %v1993_v27 = vunpack.c.l.b16 %v1840_v28 }
 0x170   :  { %v2741_v21 = vpop.f32.mrf.mxu0 }
 0x171   :  { %v6250_v3 = vadd.f32 %v2736_v1, %v2589_v36  ;;  %v6259_v1 = vpack.c.b16 %v1994_v43, %v1993_v27  ;;  %v1846_v36 = vrot.slane %v4993_v44, 5 }
 0x172   :  { %v1569_v16 = vpop.f32.mrf.mxu1 }
 0x173   :  { %v1570_v18 = vadd.f32 %v1569_v16, %v5978_v14  ;;  %4745 = vmatmul.msk.bf16.gmra.mxu0 %vm1006_vm3, %v5490_v11  ;;  %7678 = vst [vmem:[#allocation71_spill] sm:$0xff] %v6259_v1 }
 0x175   :  { %v2339_v19 = vadd.f32 %v2194_v42, %v1570_v18  ;;  %4607 = vmatmul.msk.bf16.gmra.mxu1 %vm1006_vm3, %v4927_v33  ;;  %v4641_v18 = vrot.slane %v4995_v37, 9 }
 0x176   :  { %v2440_v55 = vpop.f32.mrf.mxu3 }
 0x177   :  { %v2590_v7 = vadd.f32 %v2440_v55, %v2336_v59  ;;  %v2196_v0 = vpop.f32.mrf.mxu2  ;;  %v4994_v59 = vld [vmem:[%s7508_s0 + $0xbc] sm:$0x1] }
 0x178   :  { %v2743_v39 = vpop.f32.mrf.mxu0  ;;  %v1849_v42 = vrot.slane %v4994_v59, 5  ;;  %v4928_v59 = vld [vmem:[%s7508_s0 + $0xa8] sm:$0xff] }
 0x179   :  { %v6264_v14 = vadd.f32 %v2738_v53, %v2590_v7  ;;  %v1848_v53 = vrot.slane %v1846_v36, 4  ;;  %v1847_v7 = vsel %vm5739_vm7, %v4641_v18, %v1846_v36  ;;  %v76_v36 = vld [vmem:[%s7508_s0 + $0xc0] sm:$0xf] }
 0x17a   :  { %v1571_v16 = vpop.f32.mrf.mxu1 }
 0x17b   :  { %4712 = vmatmul.msk.bf16.gmra.mxu3 %vm1006_vm3, %v4927_v33  ;;  %v1572_v28 = vadd.f32 %v1571_v16, %v5994_v10  ;;  %v1850_v44 = vsel %vm5739_vm7, %v1848_v53, %v1849_v42 }
 0x17c   :  { %4673 = vmatmul.msk.bf16.gmra.mxu2 %vm1006_vm3, %v6259_v1 }
 0x17d   :  { %v6276_v43 = vadd.f32 %v2196_v0, %v1572_v28  ;;  %v1996_v0 = vunpack.c.l.b16 %v1850_v44  ;;  %v2651_v44 = vshll.u32 %v76_v36, 16 }
 0x17e   :  { %v2443_v27 = vpop.f32.mrf.mxu3 }
 0x17f   :  { %v2591_v33 = vadd.f32 %v2443_v27, %v2337_v47  ;;  %v2199_v55 = vpop.f32.mrf.mxu2  ;;  %v1995_v47 = vunpack.c.l.b16 %v1847_v7  ;;  %v1853_v27 = vrot.slane %v5681_v57, 5  ;;  %v4996_v57 = vld [vmem:[%s7508_s0 + $0xd8] sm:$0xf] }
 0x180   :  { %v2746_v10 = vpop.f32.mrf.mxu0 }
 0x181   :  { %v6282_v16 = vadd.f32 %v2741_v21, %v2591_v33  ;;  %v77_v21 = vld [vmem:[%s7508_s0 + $0xc4] sm:$0xf]  ;;  %v6299_v53 = vpack.c.b16 %v1996_v0, %v1995_v47  ;;  %v2648_v33 = vshrl.u32 %v76_v36, 16  ;;  %v1855_v47 = vrot.slane %v1853_v27, 4 }
 0x182   :  { %v1574_v37 = vpop.f32.mrf.mxu1  ;;  %v2653_v36 = vrot.slane %v2651_v44, 5 }
 0x183   :  { %7679 = vst [vmem:[#allocation72_spill] sm:$0xff] %v6282_v16  ;;  %v1575_v1 = vadd.f32 %v1574_v37, %v6015_v20  ;;  %4746 = vmatmul.msk.bf16.gmra.mxu0 %vm1006_vm3, %v5569_v31  ;;  %v2657_v37 = vshll.u32 %v77_v21, 16  ;;  %v2661_v31 = vshrl.u32 %v77_v21, 16  ;;  %v2650_v0 = vrot.slane %v2648_v33, 4 }
 0x184   :  { %7680 = vst [vmem:[#allocation73_spill] sm:$0xff] %v6299_v53 }
 0x185   :  { %v6293_v42 = vadd.f32 %v2199_v55, %v1575_v1  ;;  %4608 = vmatmul.msk.bf16.gmra.mxu1 %vm1006_vm3, %v4928_v59  ;;  %v1856_v55 = vrot.slane %v5686_v62, 5  ;;  %v78_v62 = vld [vmem:[%s7508_s0 + $0xc8] sm:$0x1] }
 0x186   :  { %v2445_v28 = vpop.f32.mrf.mxu3  ;;  %v2667_v44 = vshll.u32 %v78_v62, 16 }
 0x187   :  { %v2592_v18 = vadd.f32 %v2445_v28, %v2338_v61  ;;  %v2201_v20 = vpop.f32.mrf.mxu2  ;;  %v4642_v61 = vrot.slane %v4996_v57, 9  ;;  %v2663_v28 = vrot.slane %v2661_v31, 4  ;;  %v4929_v31 = vld [vmem:[%s7508_s0 + $0xb4] sm:$0xff] }
 0x188   :  { %v2748_v7 = vpop.f32.mrf.mxu0 }
 0x189   :  { %v6302_v11 = vadd.f32 %v2743_v39, %v2592_v18  ;;  %v2659_v39 = vrot.slane %v2657_v37, 5 }
 0x18a   :  { %v1576_v1 = vpop.f32.mrf.mxu1 }
 0x18b   :  { %7681 = vst [vmem:[#allocation74_spill] sm:$0xff] %v6302_v11  ;;  %4713 = vmatmul.msk.bf16.gmra.mxu3 %vm1006_vm3, %v4928_v59  ;;  %v1577_v16 = vadd.f32 %v1576_v1, %v6037_v8  ;;  %v1854_v1 = vsel %vm5739_vm7, %v4642_v61, %v1853_v27  ;;  %v2654_v11 = vor.u32 %v2653_v36, %v2650_v0 }
 0x18c   :  { %4674 = vmatmul.msk.bf16.gmra.mxu2 %vm1006_vm3, %v6299_v53  ;;  %v1857_v53 = vsel %vm5739_vm7, %v1855_v47, %v1856_v55  ;;  %v2664_v33 = vor.u32 %v2663_v28, %v2659_v39  ;;  %v2669_v47 = vrot.slane %v2667_v44, 5 }
 0x18d   :  { %v2342_v59 = vadd.f32 %v2201_v20, %v1577_v16  ;;  %v1997_v20 = vunpack.c.l.b16 %v1854_v1  ;;  %v1998_v27 = vunpack.c.l.b16 %v1857_v53  ;;  %v2655_v61 = vrot.slane %v2654_v11, 4  ;;  %v4997_v11 = vld [vmem:[%s7508_s0 + $0xe8] sm:$0xf] }
 0x18e   :  { %v2448_v21 = vpop.f32.mrf.mxu3  ;;  %v2665_v55 = vrot.slane %v2664_v33, 4  ;;  %v1860_v53 = vrot.slane %v4997_v11, 5 }
 0x18f   :  { %v2593_v8 = vadd.f32 %v2448_v21, %v2339_v19  ;;  %v2204_v18 = vpop.f32.mrf.mxu2  ;;  %v2045_v21 = vpack.c.b16 %v1998_v27, %v1997_v20 }
 0x190   :  { %v2751_v57 = vpop.f32.mrf.mxu0  ;;  %v1862_v20 = vrot.slane %v1860_v53, 4 }
 0x191   :  { %v6319_v37 = vadd.f32 %v2746_v10, %v2593_v8  ;;  %v2670_v8 = vsel %vm5175_vm4, %v2665_v55, %v2669_v47 }
 0x192   :  { %v1579_v16 = vpop.f32.mrf.mxu1  ;;  %v2698_v44 = vunpack.c.l.b16 %v2670_v8 }
 0x193   :  { %v1580_v19 = vadd.f32 %v1579_v16, %v6054_v9  ;;  %4747 = vmatmul.msk.bf16.gmra.mxu0 %vm1006_vm3, %v5643_v60  ;;  %v2660_v9 = vsel %vm5175_vm4, %v2655_v61, %v2659_v39  ;;  %v4998_v39 = vld [vmem:[%s7508_s0 + $0xec] sm:$0x1] }
 0x194   :  { %v2697_v33 = vunpack.c.l.b16 %v2660_v9  ;;  %v1863_v16 = vrot.slane %v4998_v39, 5  ;;  %v4932_v9 = vld [vmem:[%s7508_s0 + $0xd8] sm:$0xff] }
 0x195   :  { %v2343_v36 = vadd.f32 %v2204_v18, %v1580_v19  ;;  %4609 = vmatmul.msk.bf16.gmra.mxu1 %vm1006_vm3, %v4929_v31  ;;  %v4999_v19 = vld [vmem:[%s7508_s0 + $0xe4] sm:$0xf] }
 0x196   :  { %v2450_v0 = vpop.f32.mrf.mxu3  ;;  %v6348_v55 = vpack.c.b16 %v2698_v44, %v2697_v33 }
 0x197   :  { %v2594_v10 = vadd.f32 %v2450_v0, %v6276_v43  ;;  %v2206_v28 = vpop.f32.mrf.mxu2 }
 0x198   :  { %v2753_v62 = vpop.f32.mrf.mxu0 }
 0x199   :  { %v6336_v1 = vadd.f32 %v2748_v7, %v2594_v10  ;;  %v4643_v7 = vrot.slane %v4999_v19, 9  ;;  %v1864_v10 = vsel %vm5739_vm7, %v1862_v20, %v1863_v16  ;;  %v5001_v20 = vld [vmem:[%s7508_s0 + $0xf8] sm:$0x1] }
 0x19a   :  { %v1581_v18 = vpop.f32.mrf.mxu1  ;;  %v2000_v11 = vunpack.c.l.b16 %v1864_v10 }
 0x19b   :  { %4714 = vmatmul.msk.bf16.gmra.mxu3 %vm1006_vm3, %v4929_v31  ;;  %v1582_v43 = vadd.f32 %v1581_v18, %v6072_v29  ;;  %v1861_v0 = vsel %vm5739_vm7, %v4643_v7, %v1860_v53 }
 0x19c   :  { %4675 = vmatmul.msk.bf16.gmra.mxu2 %vm1006_vm3, %v2045_v21 }
 0x19d   :  { %v2344_v31 = vadd.f32 %v2206_v28, %v1582_v43 }
 0x19e   :  { %v2453_v27 = vpop.f32.mrf.mxu3 }
 0x19f   :  { %v2595_v61 = vadd.f32 %v2453_v27, %v6293_v42  ;;  %v2209_v29 = vpop.f32.mrf.mxu2  ;;  %v1999_v42 = vunpack.c.l.b16 %v1861_v0  ;;  %v1870_v27 = vrot.slane %v5001_v20, 5 }
 0x1a0   :  { %v2756_v47 = vpop.f32.mrf.mxu0 }
 0x1a1   :  { %v6354_v21 = vadd.f32 %v2751_v57, %v2595_v61  ;;  %v4930_v57 = vld [vmem:[%s7508_s0 + $0xc0] sm:$0xff]  ;;  %v6366_v44 = vpack.c.b16 %v2000_v11, %v1999_v42  ;;  %v5002_v61 = vld [vmem:[%s7508_s0 + $0xf0] sm:$0xf] }
 0x1a2   :  { %v1584_v8 = vpop.f32.mrf.mxu1 }
 0x1a3   :  { %v1585_v28 = vadd.f32 %v1584_v8, %v6094_v30  ;;  %4748 = vmatmul.msk.bf16.gmra.mxu0 %vm1006_vm3, %v6348_v55  ;;  %v5000_v30 = vld [vmem:[%s7508_s0 + $0xf4] sm:$0xf] }
 0x1a4   :  { %v1867_v16 = vrot.slane %v5000_v30, 5 }
 0x1a5   :  { %v2345_v43 = vadd.f32 %v2209_v29, %v1585_v28  ;;  %4610 = vmatmul.msk.bf16.gmra.mxu1 %vm1006_vm3, %v4932_v9  ;;  %v4644_v29 = vrot.slane %v5002_v61, 9 }
 0x1a6   :  { %v2455_v18 = vpop.f32.mrf.mxu3 }
 0x1a7   :  { %v2596_v53 = vadd.f32 %v2455_v18, %v2342_v59  ;;  %v2211_v33 = vpop.f32.mrf.mxu2  ;;  %v4933_v18 = vld [vmem:[%s7508_s0 + $0xe4] sm:$0xff] }
 0x1a8   :  { %v2758_v39 = vpop.f32.mrf.mxu0 }
 0x1a9   :  { %v6371_v19 = vadd.f32 %v2753_v62, %v2596_v53  ;;  %v1869_v62 = vrot.slane %v1867_v16, 4 }
 0x1aa   :  { %v1586_v7 = vpop.f32.mrf.mxu1 }
 0x1ab   :  { %4715 = vmatmul.msk.bf16.gmra.mxu3 %vm1006_vm3, %v4930_v57  ;;  %v1587_v59 = vadd.f32 %v1586_v7, %v6111_v49  ;;  %v1868_v49 = vsel %vm5739_vm7, %v4644_v29, %v1867_v16  ;;  %v1871_v42 = vsel %vm5739_vm7, %v1869_v62, %v1870_v27  ;;  %v5003_v27 = vld [vmem:[%s7508_s0 + $0x100] sm:$0xf] }
 0x1ac   :  { %4676 = vmatmul.msk.bf16.gmra.mxu2 %vm1006_vm3, %v6366_v44  ;;  %v1874_v61 = vrot.slane %v5003_v27, 5  ;;  %v7682_v27 = vld [vmem:[#allocation10_spill] sm:$0xff] }
 0x1ad   :  { %v2346_v10 = vadd.f32 %v2211_v33, %v1587_v59  ;;  %v2002_v33 = vunpack.c.l.b16 %v1871_v42 }
 0x1ae   :  { %v2458_v0 = vpop.f32.mrf.mxu3 }
 0x1af   :  { %v2597_v9 = vadd.f32 %v2458_v0, %v2343_v36  ;;  %v2214_v8 = vpop.f32.mrf.mxu2  ;;  %v2001_v36 = vunpack.c.l.b16 %v1868_v49  ;;  %v5005_v0 = vld [vmem:[%s7508_s0 + $0xfc] sm:$0xf] }
 0x1b0   :  { %v2761_v28 = vpop.f32.mrf.mxu0 }
 0x1b1   :  { %v6387_v11 = vadd.f32 %v2756_v47, %v2597_v9  ;;  %v6396_v47 = vpack.c.b16 %v2002_v33, %v2001_v36  ;;  %v4645_v9 = vrot.slane %v5005_v0, 9  ;;  %v4934_v33 = vld [vmem:[%s7508_s0 + $0xf0] sm:$0xff]  ;;  %v5006_v0 = vld [vmem:[%s7508_s0 + $0x10c] sm:$0xf] }
 0x1b2   :  { %v1589_v53 = vpop.f32.mrf.mxu1 }
 0x1b3   :  { %v1590_v57 = vadd.f32 %v1589_v53, %v5714_v54  ;;  %4749 = vmatmul.msk.bf16.gmra.mxu0 %vm1006_vm3, %v5303_v2 }
 0x1b5   :  { %v2347_v7 = vadd.f32 %v2214_v8, %v1590_v57  ;;  %4611 = vmatmul.msk.bf16.gmra.mxu1 %vm1006_vm3, %v4933_v18 }
 0x1b6   :  { %v2460_v30 = vpop.f32.mrf.mxu3 }
 0x1b7   :  { %v2598_v16 = vadd.f32 %v2460_v30, %v2344_v31  ;;  %v2216_v59 = vpop.f32.mrf.mxu2  ;;  %v5004_v31 = vld [vmem:[%s7508_s0 + $0x104] sm:$0x1] }
 0x1b8   :  { %v2763_v20 = vpop.f32.mrf.mxu0  ;;  %v1877_v62 = vrot.slane %v5004_v31, 5 }
 0x1b9   :  { %v6401_v54 = vadd.f32 %v2758_v39, %v2598_v16  ;;  %v1876_v39 = vrot.slane %v1874_v61, 4 }
 0x1ba   :  { %v1591_v2 = vpop.f32.mrf.mxu1 }
 0x1bb   :  { %4716 = vmatmul.msk.bf16.gmra.mxu3 %vm1006_vm3, %v4933_v18  ;;  %v1592_v29 = vadd.f32 %v1591_v2, %v5752_v26  ;;  %v1875_v26 = vsel %vm5739_vm7, %v4645_v9, %v1874_v61  ;;  %v1878_v57 = vsel %vm5739_vm7, %v1876_v39, %v1877_v62  ;;  %v1881_v9 = vrot.slane %v5006_v0, 5 }
 0x1bc   :  { %4677 = vmatmul.msk.bf16.gmra.mxu2 %vm1006_vm3, %v6396_v47 }
 0x1bd   :  { %v2348_v49 = vadd.f32 %v2216_v59, %v1592_v29  ;;  %v2004_v59 = vunpack.c.l.b16 %v1878_v57 }
 0x1be   :  { %v2463_v8 = vpop.f32.mrf.mxu3 }
 0x1bf   :  { %v2599_v42 = vadd.f32 %v2463_v8, %v2345_v43  ;;  %v2219_v18 = vpop.f32.mrf.mxu2  ;;  %v2003_v43 = vunpack.c.l.b16 %v1875_v26 }
 0x1c0   :  { %v2766_v53 = vpop.f32.mrf.mxu0 }
 0x1c1   :  { %v6417_v36 = vadd.f32 %v2761_v28, %v2599_v42  ;;  %v6426_v28 = vpack.c.b16 %v2004_v59, %v2003_v43 }
 0x1c2   :  { %v1594_v30 = vpop.f32.mrf.mxu1 }
 0x1c3   :  { %v1595_v16 = vadd.f32 %v1594_v30, %v5790_v17  ;;  %4750 = vmatmul.msk.bf16.gmra.mxu0 %vm1006_vm3, %v7682_v27 }
 0x1c5   :  { %v2349_v29 = vadd.f32 %v2219_v18, %v1595_v16  ;;  %4612 = vmatmul.msk.bf16.gmra.mxu1 %vm1006_vm3, %v4934_v33  ;;  %v5008_v18 = vld [vmem:[%s7508_s0 + $0x108] sm:$0xf] }
 0x1c6   :  { %v2465_v2 = vpop.f32.mrf.mxu3  ;;  %v4646_v26 = vrot.slane %v5008_v18, 9 }
 0x1c7   :  { %v2600_v61 = vadd.f32 %v2465_v2, %v2346_v10  ;;  %v2221_v31 = vpop.f32.mrf.mxu2  ;;  %v5007_v10 = vld [vmem:[%s7508_s0 + $0x110] sm:$0x1] }
 0x1c8   :  { %v2768_v62 = vpop.f32.mrf.mxu0  ;;  %v1884_v42 = vrot.slane %v5007_v10, 5  ;;  %v7683_v10 = vld [vmem:[#allocation13_spill] sm:$0xff] }
 0x1c9   :  { %v6431_v17 = vadd.f32 %v2763_v20, %v2600_v61  ;;  %v1883_v20 = vrot.slane %v1881_v9, 4  ;;  %v4935_v61 = vld [vmem:[%s7508_s0 + $0xfc] sm:$0xff] }
 0x1ca   :  { %v1596_v39 = vpop.f32.mrf.mxu1 }
 0x1cb   :  { %4717 = vmatmul.msk.bf16.gmra.mxu3 %vm1006_vm3, %v4934_v33  ;;  %v1597_v8 = vadd.f32 %v1596_v39, %v5839_v63  ;;  %v1882_v63 = vsel %vm5739_vm7, %v4646_v26, %v1881_v9  ;;  %v1885_v59 = vsel %vm5739_vm7, %v1883_v20, %v1884_v42  ;;  %v5009_v20 = vld [vmem:[%s7508_s0 + $0x118] sm:$0xf] }
 0x1cc   :  { %4678 = vmatmul.msk.bf16.gmra.mxu2 %vm1006_vm3, %v6426_v28 }
 0x1cd   :  { %v2350_v30 = vadd.f32 %v2221_v31, %v1597_v8  ;;  %v2006_v31 = vunpack.c.l.b16 %v1885_v59  ;;  %v5011_v59 = vld [vmem:[%s7508_s0 + $0x114] sm:$0xf] }
 0x1ce   :  { %v2468_v57 = vpop.f32.mrf.mxu3 }
 0x1cf   :  { %v2601_v33 = vadd.f32 %v2468_v57, %v2347_v7  ;;  %v2224_v16 = vpop.f32.mrf.mxu2  ;;  %v2005_v7 = vunpack.c.l.b16 %v1882_v63  ;;  %v1888_v57 = vrot.slane %v5009_v20, 5 }
 0x1d0   :  { %v2771_v43 = vpop.f32.mrf.mxu0 }
 0x1d1   :  { %v6447_v2 = vadd.f32 %v2766_v53, %v2601_v33  ;;  %v6456_v53 = vpack.c.b16 %v2006_v31, %v2005_v7 }
 0x1d2   :  { %v1599_v0 = vpop.f32.mrf.mxu1 }
 0x1d3   :  { %v1600_v39 = vadd.f32 %v1599_v0, %v5864_v41  ;;  %4751 = vmatmul.msk.bf16.gmra.mxu0 %vm1006_vm3, %v7683_v10  ;;  %7684 = vst [vmem:[#allocation10_spill] sm:$0xff] %v6456_v53  ;;  %v4647_v0 = vrot.slane %v5011_v59, 9 }
 0x1d5   :  { %v2351_v18 = vadd.f32 %v2224_v16, %v1600_v39  ;;  %4613 = vmatmul.msk.bf16.gmra.mxu1 %vm1006_vm3, %v4935_v61 }
 0x1d6   :  { %v2470_v8 = vpop.f32.mrf.mxu3 }
 0x1d7   :  { %v2602_v9 = vadd.f32 %v2470_v8, %v2348_v49  ;;  %v2226_v42 = vpop.f32.mrf.mxu2  ;;  %v5010_v49 = vld [vmem:[%s7508_s0 + $0x11c] sm:$0x1] }
 0x1d8   :  { %v2773_v26 = vpop.f32.mrf.mxu0  ;;  %v1891_v16 = vrot.slane %v5010_v49, 5 }
 0x1d9   :  { %v6461_v41 = vadd.f32 %v2768_v62, %v2602_v9  ;;  %v1890_v62 = vrot.slane %v1888_v57, 4 }
 0x1da   :  { %v1601_v33 = vpop.f32.mrf.mxu1 }
 0x1db   :  { %4718 = vmatmul.msk.bf16.gmra.mxu3 %vm1006_vm3, %v4935_v61  ;;  %v1602_v63 = vadd.f32 %v1601_v33, %v5887_v25  ;;  %v1889_v25 = vsel %vm5739_vm7, %v4647_v0, %v1888_v57  ;;  %v1892_v9 = vsel %vm5739_vm7, %v1890_v62, %v1891_v16  ;;  %v4936_v33 = vld [vmem:[%s7508_s0 + $0x108] sm:$0xff]  ;;  %v5012_v62 = vld [vmem:[%s7508_s0 + $0x124] sm:$0xf] }
 0x1dc   :  { %4679 = vmatmul.msk.bf16.gmra.mxu2 %vm1006_vm3, %v6456_v53  ;;  %v7685_v53 = vld [vmem:[#allocation17_spill] sm:$0xff] }
 0x1dd   :  { %v2352_v7 = vadd.f32 %v2226_v42, %v1602_v63  ;;  %v2008_v42 = vunpack.c.l.b16 %v1892_v9 }
 0x1de   :  { %v2473_v39 = vpop.f32.mrf.mxu3 }
 0x1df   :  { %v2603_v61 = vadd.f32 %v2473_v39, %v2349_v29  ;;  %v2229_v31 = vpop.f32.mrf.mxu2  ;;  %v2007_v29 = vunpack.c.l.b16 %v1889_v25 }
 0x1e0   :  { %v2776_v8 = vpop.f32.mrf.mxu0 }
 0x1e1   :  { %v6477_v20 = vadd.f32 %v2771_v43, %v2603_v61  ;;  %v6486_v43 = vpack.c.b16 %v2008_v42, %v2007_v29  ;;  %v1895_v61 = vrot.slane %v5012_v62, 5 }
 0x1e2   :  { %v1604_v49 = vpop.f32.mrf.mxu1 }
 0x1e3   :  { %v1605_v59 = vadd.f32 %v1604_v49, %v5913_v35  ;;  %4752 = vmatmul.msk.bf16.gmra.mxu0 %vm1006_vm3, %v7685_v53  ;;  %7686 = vst [vmem:[#allocation13_spill] sm:$0xff] %v6486_v43  ;;  %v5014_v49 = vld [vmem:[%s7508_s0 + $0x120] sm:$0xf] }
 0x1e4   :  { %v7687_v53 = vld [vmem:[#allocation21_spill] sm:$0xff] }
 0x1e5   :  { %v2353_v39 = vadd.f32 %v2229_v31, %v1605_v59  ;;  %4614 = vmatmul.msk.bf16.gmra.mxu1 %vm1006_vm3, %v4936_v33  ;;  %v4648_v59 = vrot.slane %v5014_v49, 9 }
 0x1e6   :  { %v2475_v63 = vpop.f32.mrf.mxu3 }
 0x1e7   :  { %v2604_v57 = vadd.f32 %v2475_v63, %v2350_v30  ;;  %v2231_v16 = vpop.f32.mrf.mxu2  ;;  %v5013_v30 = vld [vmem:[%s7508_s0 + $0x128] sm:$0x1] }
 0x1e8   :  { %v2778_v0 = vpop.f32.mrf.mxu0  ;;  %v1898_v31 = vrot.slane %v5013_v30, 5  ;;  %v4937_v30 = vld [vmem:[%s7508_s0 + $0x114] sm:$0xff] }
 0x1e9   :  { %v6491_v35 = vadd.f32 %v2773_v26, %v2604_v57  ;;  %v1897_v26 = vrot.slane %v1895_v61, 4 }
 0x1ea   :  { %v1606_v25 = vpop.f32.mrf.mxu1 }
 0x1eb   :  { %4719 = vmatmul.msk.bf16.gmra.mxu3 %vm1006_vm3, %v4936_v33  ;;  %v1607_v9 = vadd.f32 %v1606_v25, %v5930_v46  ;;  %v1896_v46 = vsel %vm5739_vm7, %v4648_v59, %v1895_v61  ;;  %v1899_v62 = vsel %vm5739_vm7, %v1897_v26, %v1898_v31  ;;  %v5015_v26 = vld [vmem:[%s7508_s0 + $0x130] sm:$0xf] }
 0x1ec   :  { %4680 = vmatmul.msk.bf16.gmra.mxu2 %vm1006_vm3, %v6486_v43 }
 0x1ed   :  { %v2354_v42 = vadd.f32 %v2231_v16, %v1607_v9  ;;  %v2010_v16 = vunpack.c.l.b16 %v1899_v62  ;;  %v5017_v62 = vld [vmem:[%s7508_s0 + $0x12c] sm:$0xf] }
 0x1ee   :  { %v2478_v29 = vpop.f32.mrf.mxu3 }
 0x1ef   :  { %v2605_v33 = vadd.f32 %v2478_v29, %v2351_v18  ;;  %v2234_v63 = vpop.f32.mrf.mxu2  ;;  %v2009_v18 = vunpack.c.l.b16 %v1896_v46 }
 0x1f0   :  { %v2781_v57 = vpop.f32.mrf.mxu0 }
 0x1f1   :  { %v6507_v25 = vadd.f32 %v2776_v8, %v2605_v33  ;;  %v6516_v8 = vpack.c.b16 %v2010_v16, %v2009_v18  ;;  %v1902_v33 = vrot.slane %v5015_v26, 5 }
 0x1f2   :  { %v1609_v43 = vpop.f32.mrf.mxu1 }
 0x1f3   :  { %v1610_v49 = vadd.f32 %v1609_v43, %v5950_v56  ;;  %4753 = vmatmul.msk.bf16.gmra.mxu0 %vm1006_vm3, %v7687_v53  ;;  %7688 = vst [vmem:[#allocation75_spill] sm:$0xff] %v6516_v8  ;;  %v7689_v53 = vld [vmem:[#allocation24_spill] sm:$0xff] }
 0x1f5   :  { %v2355_v29 = vadd.f32 %v2234_v63, %v1610_v49  ;;  %4615 = vmatmul.msk.bf16.gmra.mxu1 %vm1006_vm3, %v4937_v30  ;;  %v4649_v49 = vrot.slane %v5017_v62, 9 }
 0x1f6   :  { %v2480_v9 = vpop.f32.mrf.mxu3 }
 0x1f7   :  { %v2606_v61 = vadd.f32 %v2480_v9, %v2352_v7  ;;  %v2236_v31 = vpop.f32.mrf.mxu2  ;;  %v5016_v7 = vld [vmem:[%s7508_s0 + $0x134] sm:$0x1] }
 0x1f8   :  { %v2783_v59 = vpop.f32.mrf.mxu0  ;;  %v1905_v63 = vrot.slane %v5016_v7, 5  ;;  %v4938_v7 = vld [vmem:[%s7508_s0 + $0x120] sm:$0xff] }
 0x1f9   :  { %v6521_v56 = vadd.f32 %v2778_v0, %v2606_v61  ;;  %v1904_v0 = vrot.slane %v1902_v33, 4 }
 0x1fa   :  { %v1611_v43 = vpop.f32.mrf.mxu1 }
 0x1fb   :  { %4720 = vmatmul.msk.bf16.gmra.mxu3 %vm1006_vm3, %v4937_v30  ;;  %v1612_v46 = vadd.f32 %v1611_v43, %v5971_v5  ;;  %v1903_v5 = vsel %vm5739_vm7, %v4649_v49, %v1902_v33  ;;  %v1906_v26 = vsel %vm5739_vm7, %v1904_v0, %v1905_v63  ;;  %v5018_v0 = vld [vmem:[%s7508_s0 + $0x13c] sm:$0xf] }
 0x1fc   :  { %4681 = vmatmul.msk.bf16.gmra.mxu2 %vm1006_vm3, %v6516_v8 }
 0x1fd   :  { %v2356_v16 = vadd.f32 %v2236_v31, %v1612_v46  ;;  %v2012_v31 = vunpack.c.l.b16 %v1906_v26  ;;  %v5020_v26 = vld [vmem:[%s7508_s0 + $0x138] sm:$0xf] }
 0x1fe   :  { %v2483_v18 = vpop.f32.mrf.mxu3 }
 0x1ff   :  { %v2607_v30 = vadd.f32 %v2483_v18, %v2353_v39  ;;  %v2239_v9 = vpop.f32.mrf.mxu2  ;;  %v2011_v39 = vunpack.c.l.b16 %v1903_v5 }
 0x200   :  { %v2786_v61 = vpop.f32.mrf.mxu0 }
 0x201   :  { %v6537_v43 = vadd.f32 %v2781_v57, %v2607_v30  ;;  %v6546_v57 = vpack.c.b16 %v2012_v31, %v2011_v39  ;;  %v1909_v30 = vrot.slane %v5018_v0, 5 }
 0x202   :  { %v1614_v8 = vpop.f32.mrf.mxu1 }
 0x203   :  { %v1615_v62 = vadd.f32 %v1614_v8, %v5990_v51  ;;  %4754 = vmatmul.msk.bf16.gmra.mxu0 %vm1006_vm3, %v7689_v53  ;;  %7690 = vst [vmem:[#allocation76_spill] sm:$0xff] %v6546_v57  ;;  %v7691_v53 = vld [vmem:[#allocation6_spill] sm:$0xff] }
 0x205   :  { %v2357_v18 = vadd.f32 %v2239_v9, %v1615_v62  ;;  %4616 = vmatmul.msk.bf16.gmra.mxu1 %vm1006_vm3, %v4938_v7  ;;  %v4650_v62 = vrot.slane %v5020_v26, 9 }
 0x206   :  { %v2485_v46 = vpop.f32.mrf.mxu3 }
 0x207   :  { %v2608_v33 = vadd.f32 %v2485_v46, %v2354_v42  ;;  %v2241_v63 = vpop.f32.mrf.mxu2  ;;  %v5019_v42 = vld [vmem:[%s7508_s0 + $0x140] sm:$0x1] }
 0x208   :  { %v2788_v49 = vpop.f32.mrf.mxu0  ;;  %v1912_v9 = vrot.slane %v5019_v42, 5  ;;  %v4939_v42 = vld [vmem:[%s7508_s0 + $0x12c] sm:$0xff] }
 0x209   :  { %v6551_v51 = vadd.f32 %v2783_v59, %v2608_v33  ;;  %v1911_v59 = vrot.slane %v1909_v30, 4 }
 0x20a   :  { %v1616_v8 = vpop.f32.mrf.mxu1 }
 0x20b   :  { %4721 = vmatmul.msk.bf16.gmra.mxu3 %vm1006_vm3, %v4938_v7  ;;  %v1617_v5 = vadd.f32 %v1616_v8, %v6007_v34  ;;  %v1910_v34 = vsel %vm5739_vm7, %v4650_v62, %v1909_v30  ;;  %v1913_v0 = vsel %vm5739_vm7, %v1911_v59, %v1912_v9  ;;  %v5021_v59 = vld [vmem:[%s7508_s0 + $0x148] sm:$0xf] }
 0x20c   :  { %4682 = vmatmul.msk.bf16.gmra.mxu2 %vm1006_vm3, %v6546_v57 }
 0x20d   :  { %v2358_v31 = vadd.f32 %v2241_v63, %v1617_v5  ;;  %v2014_v63 = vunpack.c.l.b16 %v1913_v0  ;;  %v5023_v0 = vld [vmem:[%s7508_s0 + $0x144] sm:$0xf] }
 0x20e   :  { %v2488_v39 = vpop.f32.mrf.mxu3 }
 0x20f   :  { %v2609_v7 = vadd.f32 %v2488_v39, %v2355_v29  ;;  %v2244_v46 = vpop.f32.mrf.mxu2  ;;  %v2013_v29 = vunpack.c.l.b16 %v1910_v34 }
 0x210   :  { %v2791_v33 = vpop.f32.mrf.mxu0 }
 0x211   :  { %v6567_v8 = vadd.f32 %v2786_v61, %v2609_v7  ;;  %v6576_v61 = vpack.c.b16 %v2014_v63, %v2013_v29  ;;  %v1916_v7 = vrot.slane %v5021_v59, 5 }
 0x212   :  { %v1619_v57 = vpop.f32.mrf.mxu1 }
 0x213   :  { %v1620_v26 = vadd.f32 %v1619_v57, %v6024_v50  ;;  %4755 = vmatmul.msk.bf16.gmra.mxu0 %vm1006_vm3, %v7691_v53  ;;  %7692 = vst [vmem:[#allocation77_spill] sm:$0xff] %v6576_v61  ;;  %v7695_v53 = vld [vmem:[#allocation7_spill] sm:$0xff] }
 0x215   :  { %v2359_v39 = vadd.f32 %v2244_v46, %v1620_v26  ;;  %4617 = vmatmul.msk.bf16.gmra.mxu1 %vm1006_vm3, %v4939_v42  ;;  %v4651_v26 = vrot.slane %v5023_v0, 9 }
 0x216   :  { %v2490_v5 = vpop.f32.mrf.mxu3 }
 0x217   :  { %v2610_v30 = vadd.f32 %v2490_v5, %v2356_v16  ;;  %v2246_v9 = vpop.f32.mrf.mxu2  ;;  %v5022_v16 = vld [vmem:[%s7508_s0 + $0x14c] sm:$0x1] }
 0x218   :  { %v2793_v62 = vpop.f32.mrf.mxu0  ;;  %v1919_v46 = vrot.slane %v5022_v16, 5  ;;  %v4940_v16 = vld [vmem:[%s7508_s0 + $0x138] sm:$0xff] }
 0x219   :  { %v6581_v50 = vadd.f32 %v2788_v49, %v2610_v30  ;;  %v1918_v49 = vrot.slane %v1916_v7, 4 }
 0x21a   :  { %v1621_v57 = vpop.f32.mrf.mxu1 }
 0x21b   :  { %7693 = vst [vmem:[#allocation78_spill] sm:$0xff] %v6581_v50  ;;  %4722 = vmatmul.msk.bf16.gmra.mxu3 %vm1006_vm3, %v4939_v42  ;;  %v1622_v34 = vadd.f32 %v1621_v57, %v6044_v58  ;;  %v1917_v58 = vsel %vm5739_vm7, %v4651_v26, %v1916_v7  ;;  %v1920_v59 = vsel %vm5739_vm7, %v1918_v49, %v1919_v46  ;;  %v5024_v49 = vld [vmem:[%s7508_s0 + $0x154] sm:$0xf] }
 0x21c   :  { %4683 = vmatmul.msk.bf16.gmra.mxu2 %vm1006_vm3, %v6576_v61 }
 0x21d   :  { %v2360_v63 = vadd.f32 %v2246_v9, %v1622_v34  ;;  %v2016_v9 = vunpack.c.l.b16 %v1920_v59  ;;  %v5026_v59 = vld [vmem:[%s7508_s0 + $0x150] sm:$0xf] }
 0x21e   :  { %v2493_v29 = vpop.f32.mrf.mxu3 }
 0x21f   :  { %v2611_v42 = vadd.f32 %v2493_v29, %v2357_v18  ;;  %v2249_v5 = vpop.f32.mrf.mxu2  ;;  %v2015_v18 = vunpack.c.l.b16 %v1917_v58 }
 0x220   :  { %v2796_v30 = vpop.f32.mrf.mxu0 }
 0x221   :  { %v6597_v57 = vadd.f32 %v2791_v33, %v2611_v42  ;;  %v6606_v33 = vpack.c.b16 %v2016_v9, %v2015_v18  ;;  %v1923_v42 = vrot.slane %v5024_v49, 5 }
 0x222   :  { %v1624_v61 = vpop.f32.mrf.mxu1 }
 0x223   :  { %7694 = vst [vmem:[#allocation79_spill] sm:$0xff] %v6597_v57  ;;  %v1625_v0 = vadd.f32 %v1624_v61, %v6065_v38  ;;  %4756 = vmatmul.msk.bf16.gmra.mxu0 %vm1006_vm3, %v7695_v53  ;;  %v7699_v53 = vld [vmem:[#allocation9_spill] sm:$0xff] }
 0x224   :  { %7696 = vst [vmem:[#allocation80_spill] sm:$0xff] %v6606_v33 }
 0x225   :  { %v2361_v29 = vadd.f32 %v2249_v5, %v1625_v0  ;;  %4618 = vmatmul.msk.bf16.gmra.mxu1 %vm1006_vm3, %v4940_v16  ;;  %v4652_v0 = vrot.slane %v5026_v59, 9 }
 0x226   :  { %v2495_v34 = vpop.f32.mrf.mxu3 }
 0x227   :  { %v2612_v7 = vadd.f32 %v2495_v34, %v2358_v31  ;;  %v2251_v46 = vpop.f32.mrf.mxu2  ;;  %v5025_v31 = vld [vmem:[%s7508_s0 + $0x158] sm:$0x1] }
 0x228   :  { %v2798_v26 = vpop.f32.mrf.mxu0  ;;  %v1926_v5 = vrot.slane %v5025_v31, 5  ;;  %v4941_v31 = vld [vmem:[%s7508_s0 + $0x144] sm:$0xff] }
 0x229   :  { %v6611_v38 = vadd.f32 %v2793_v62, %v2612_v7  ;;  %v1925_v62 = vrot.slane %v1923_v42, 4 }
 0x22a   :  { %v1626_v61 = vpop.f32.mrf.mxu1 }
 0x22b   :  { %7697 = vst [vmem:[#allocation81_spill] sm:$0xff] %v6611_v38  ;;  %4723 = vmatmul.msk.bf16.gmra.mxu3 %vm1006_vm3, %v4940_v16  ;;  %v1627_v58 = vadd.f32 %v1626_v61, %v6082_v45  ;;  %v1924_v45 = vsel %vm5739_vm7, %v4652_v0, %v1923_v42  ;;  %v1927_v49 = vsel %vm5739_vm7, %v1925_v62, %v1926_v5  ;;  %v5027_v62 = vld [vmem:[%s7508_s0 + $0x160] sm:$0xf] }
 0x22c   :  { %4684 = vmatmul.msk.bf16.gmra.mxu2 %vm1006_vm3, %v6606_v33 }
 0x22d   :  { %v2362_v9 = vadd.f32 %v2251_v46, %v1627_v58  ;;  %v2018_v46 = vunpack.c.l.b16 %v1927_v49 }
 0x22e   :  { %v2498_v18 = vpop.f32.mrf.mxu3 }
 0x22f   :  { %v2613_v16 = vadd.f32 %v2498_v18, %v2359_v39  ;;  %v2254_v34 = vpop.f32.mrf.mxu2  ;;  %v2017_v39 = vunpack.c.l.b16 %v1924_v45  ;;  %v7702_v45 = vld [vmem:[#allocation34_spill] sm:$0xff] }
 0x230   :  { %v2801_v7 = vpop.f32.mrf.mxu0 }
 0x231   :  { %v6627_v61 = vadd.f32 %v2796_v30, %v2613_v16  ;;  %v6636_v30 = vpack.c.b16 %v2018_v46, %v2017_v39  ;;  %v1930_v16 = vrot.slane %v5027_v62, 5 }
 0x232   :  { %v1629_v33 = vpop.f32.mrf.mxu1 }
 0x233   :  { %7698 = vst [vmem:[#allocation82_spill] sm:$0xff] %v6627_v61  ;;  %v1630_v59 = vadd.f32 %v1629_v33, %v5856_v15  ;;  %4757 = vmatmul.msk.bf16.gmra.mxu0 %vm1006_vm3, %v7699_v53  ;;  %v7705_v61 = vld [vmem:[#allocation12_spill] sm:$0xff] }
 0x234   :  { %7700 = vst [vmem:[#allocation83_spill] sm:$0xff] %v6636_v30 }
 0x235   :  { %v2363_v18 = vadd.f32 %v2254_v34, %v1630_v59  ;;  %4619 = vmatmul.msk.bf16.gmra.mxu1 %vm1006_vm3, %v4941_v31  ;;  %v5029_v59 = vld [vmem:[%s7508_s0 + $0x15c] sm:$0xf] }
 0x236   :  { %v2500_v58 = vpop.f32.mrf.mxu3  ;;  %v4653_v39 = vrot.slane %v5029_v59, 9  ;;  %v7704_v59 = vld [vmem:[#allocation37_spill] sm:$0xff] }
 0x237   :  { %v2614_v42 = vadd.f32 %v2500_v58, %v2360_v63  ;;  %v2256_v5 = vpop.f32.mrf.mxu2  ;;  %v5028_v63 = vld [vmem:[%s7508_s0 + $0x164] sm:$0x1] }
 0x238   :  { %v2803_v0 = vpop.f32.mrf.mxu0  ;;  %v1933_v34 = vrot.slane %v5028_v63, 5  ;;  %v4942_v63 = vld [vmem:[%s7508_s0 + $0x150] sm:$0xff] }
 0x239   :  { %v6641_v15 = vadd.f32 %v2798_v26, %v2614_v42  ;;  %v1932_v26 = vrot.slane %v1930_v16, 4 }
 0x23a   :  { %v1631_v33 = vpop.f32.mrf.mxu1 }
 0x23b   :  { %7701 = vst [vmem:[#allocation84_spill] sm:$0xff] %v6641_v15  ;;  %4724 = vmatmul.msk.bf16.gmra.mxu3 %vm1006_vm3, %v4941_v31  ;;  %v1632_v49 = vadd.f32 %v1631_v33, %v7702_v45  ;;  %v1931_v33 = vsel %vm5739_vm7, %v4653_v39, %v1930_v16  ;;  %v1934_v45 = vsel %vm5739_vm7, %v1932_v26, %v1933_v34  ;;  %v5030_v26 = vld [vmem:[%s7508_s0 + $0x16c] sm:$0xf] }
 0x23c   :  { %4685 = vmatmul.msk.bf16.gmra.mxu2 %vm1006_vm3, %v6636_v30 }
 0x23d   :  { %v2364_v58 = vadd.f32 %v2256_v5, %v1632_v49  ;;  %v2020_v5 = vunpack.c.l.b16 %v1934_v45  ;;  %v7708_v45 = vld [vmem:[#allocation40_spill] sm:$0xff] }
 0x23e   :  { %v2503_v46 = vpop.f32.mrf.mxu3 }
 0x23f   :  { %v2615_v31 = vadd.f32 %v2503_v46, %v2361_v29  ;;  %v2259_v42 = vpop.f32.mrf.mxu2  ;;  %v2019_v29 = vunpack.c.l.b16 %v1931_v33 }
 0x240   :  { %v2806_v62 = vpop.f32.mrf.mxu0 }
 0x241   :  { %v6657_v30 = vadd.f32 %v2801_v7, %v2615_v31  ;;  %v6666_v7 = vpack.c.b16 %v2020_v5, %v2019_v29  ;;  %v1937_v31 = vrot.slane %v5030_v26, 5 }
 0x242   :  { %v1634_v53 = vpop.f32.mrf.mxu1 }
 0x243   :  { %7703 = vst [vmem:[#allocation34_spill] sm:$0xff] %v6657_v30  ;;  %v1635_v15 = vadd.f32 %v1634_v53, %v7704_v59  ;;  %4758 = vmatmul.msk.bf16.gmra.mxu0 %vm1006_vm3, %v7705_v61  ;;  %v7711_v30 = vld [vmem:[#allocation16_spill] sm:$0xff] }
 0x244   :  { %7706 = vst [vmem:[#allocation37_spill] sm:$0xff] %v6666_v7 }
 0x245   :  { %v2365_v46 = vadd.f32 %v2259_v42, %v1635_v15  ;;  %4620 = vmatmul.msk.bf16.gmra.mxu1 %vm1006_vm3, %v4942_v63  ;;  %v5032_v42 = vld [vmem:[%s7508_s0 + $0x168] sm:$0xf] }
 0x246   :  { %v2505_v49 = vpop.f32.mrf.mxu3  ;;  %v4654_v29 = vrot.slane %v5032_v42, 9  ;;  %v7710_v42 = vld [vmem:[#allocation42_spill] sm:$0xff] }
 0x247   :  { %v2616_v16 = vadd.f32 %v2505_v49, %v2362_v9  ;;  %v2261_v34 = vpop.f32.mrf.mxu2  ;;  %v5031_v9 = vld [vmem:[%s7508_s0 + $0x170] sm:$0x1] }
 0x248   :  { %v2808_v39 = vpop.f32.mrf.mxu0  ;;  %v1940_v15 = vrot.slane %v5031_v9, 5  ;;  %v4943_v9 = vld [vmem:[%s7508_s0 + $0x15c] sm:$0xff] }
 0x249   :  { %v6671_v53 = vadd.f32 %v2803_v0, %v2616_v16  ;;  %v1939_v0 = vrot.slane %v1937_v31, 4 }
 0x24a   :  { %v1636_v33 = vpop.f32.mrf.mxu1 }
 0x24b   :  { %7707 = vst [vmem:[#allocation85_spill] sm:$0xff] %v6671_v53  ;;  %4725 = vmatmul.msk.bf16.gmra.mxu3 %vm1006_vm3, %v4942_v63  ;;  %v1637_v59 = vadd.f32 %v1636_v33, %v7708_v45  ;;  %v1938_v33 = vsel %vm5739_vm7, %v4654_v29, %v1937_v31  ;;  %v1941_v45 = vsel %vm5739_vm7, %v1939_v0, %v1940_v15  ;;  %v5033_v0 = vld [vmem:[%s7508_s0 + $0x178] sm:$0xf] }
 0x24c   :  { %4686 = vmatmul.msk.bf16.gmra.mxu2 %vm1006_vm3, %v6666_v7 }
 0x24d   :  { %v2366_v49 = vadd.f32 %v2261_v34, %v1637_v59  ;;  %v2022_v34 = vunpack.c.l.b16 %v1941_v45  ;;  %v7714_v45 = vld [vmem:[#allocation45_spill] sm:$0xff] }
 0x24e   :  { %v2508_v5 = vpop.f32.mrf.mxu3 }
 0x24f   :  { %v2617_v63 = vadd.f32 %v2508_v5, %v2363_v18  ;;  %v2264_v16 = vpop.f32.mrf.mxu2  ;;  %v2021_v18 = vunpack.c.l.b16 %v1938_v33 }
 0x250   :  { %v2811_v26 = vpop.f32.mrf.mxu0 }
 0x251   :  { %v6687_v7 = vadd.f32 %v2806_v62, %v2617_v63  ;;  %v6696_v62 = vpack.c.b16 %v2022_v34, %v2021_v18  ;;  %v1944_v63 = vrot.slane %v5033_v0, 5 }
 0x252   :  { %v1639_v61 = vpop.f32.mrf.mxu1 }
 0x253   :  { %7709 = vst [vmem:[#allocation40_spill] sm:$0xff] %v6687_v7  ;;  %v1640_v53 = vadd.f32 %v1639_v61, %v7710_v42  ;;  %4759 = vmatmul.msk.bf16.gmra.mxu0 %vm1006_vm3, %v7711_v30  ;;  %v7717_v7 = vld [vmem:[#allocation20_spill] sm:$0xff] }
 0x254   :  { %7712 = vst [vmem:[#allocation42_spill] sm:$0xff] %v6696_v62 }
 0x255   :  { %v2367_v5 = vadd.f32 %v2264_v16, %v1640_v53  ;;  %4621 = vmatmul.msk.bf16.gmra.mxu1 %vm1006_vm3, %v4943_v9  ;;  %v5035_v16 = vld [vmem:[%s7508_s0 + $0x174] sm:$0xf] }
 0x256   :  { %v2510_v59 = vpop.f32.mrf.mxu3  ;;  %v4655_v18 = vrot.slane %v5035_v16, 9  ;;  %v7716_v16 = vld [vmem:[#allocation48_spill] sm:$0xff] }
 0x257   :  { %v2618_v31 = vadd.f32 %v2510_v59, %v2364_v58  ;;  %v2266_v15 = vpop.f32.mrf.mxu2  ;;  %v5034_v58 = vld [vmem:[%s7508_s0 + $0x17c] sm:$0x1] }
 0x258   :  { %v2813_v29 = vpop.f32.mrf.mxu0  ;;  %v1947_v53 = vrot.slane %v5034_v58, 5  ;;  %v4944_v58 = vld [vmem:[%s7508_s0 + $0x168] sm:$0xff] }
 0x259   :  { %v6701_v61 = vadd.f32 %v2808_v39, %v2618_v31  ;;  %v1946_v39 = vrot.slane %v1944_v63, 4 }
 0x25a   :  { %v1641_v33 = vpop.f32.mrf.mxu1 }
 0x25b   :  { %7713 = vst [vmem:[#allocation86_spill] sm:$0xff] %v6701_v61  ;;  %4726 = vmatmul.msk.bf16.gmra.mxu3 %vm1006_vm3, %v4943_v9  ;;  %v1642_v42 = vadd.f32 %v1641_v33, %v7714_v45  ;;  %v1945_v33 = vsel %vm5739_vm7, %v4655_v18, %v1944_v63  ;;  %v1948_v45 = vsel %vm5739_vm7, %v1946_v39, %v1947_v53  ;;  %v5036_v39 = vld [vmem:[%s7508_s0 + $0x184] sm:$0xf] }
 0x25c   :  { %4687 = vmatmul.msk.bf16.gmra.mxu2 %vm1006_vm3, %v6696_v62 }
 0x25d   :  { %v2368_v59 = vadd.f32 %v2266_v15, %v1642_v42  ;;  %v2024_v15 = vunpack.c.l.b16 %v1948_v45  ;;  %v7720_v45 = vld [vmem:[#allocation50_spill] sm:$0xff] }
 0x25e   :  { %v2513_v34 = vpop.f32.mrf.mxu3 }
 0x25f   :  { %v2619_v9 = vadd.f32 %v2513_v34, %v2365_v46  ;;  %v2269_v31 = vpop.f32.mrf.mxu2  ;;  %v2023_v46 = vunpack.c.l.b16 %v1945_v33 }
 0x260   :  { %v2816_v0 = vpop.f32.mrf.mxu0 }
 0x261   :  { %v6717_v62 = vadd.f32 %v2811_v26, %v2619_v9  ;;  %v6726_v26 = vpack.c.b16 %v2024_v15, %v2023_v46  ;;  %v1951_v9 = vrot.slane %v5036_v39, 5 }
 0x262   :  { %v1644_v30 = vpop.f32.mrf.mxu1 }
 0x263   :  { %7715 = vst [vmem:[#allocation45_spill] sm:$0xff] %v6717_v62  ;;  %v1645_v61 = vadd.f32 %v1644_v30, %v7716_v16  ;;  %4760 = vmatmul.msk.bf16.gmra.mxu0 %vm1006_vm3, %v7717_v7  ;;  %v7723_v62 = vld [vmem:[#allocation23_spill] sm:$0xff] }
 0x264   :  { %7718 = vst [vmem:[#allocation48_spill] sm:$0xff] %v6726_v26 }
 0x265   :  { %v2369_v34 = vadd.f32 %v2269_v31, %v1645_v61  ;;  %4622 = vmatmul.msk.bf16.gmra.mxu1 %vm1006_vm3, %v4944_v58  ;;  %v5038_v31 = vld [vmem:[%s7508_s0 + $0x180] sm:$0xf] }
 0x266   :  { %v2515_v42 = vpop.f32.mrf.mxu3  ;;  %v4656_v46 = vrot.slane %v5038_v31, 9  ;;  %v7722_v31 = vld [vmem:[#allocation53_spill] sm:$0xff] }
 0x267   :  { %v2620_v63 = vadd.f32 %v2515_v42, %v2366_v49  ;;  %v2271_v53 = vpop.f32.mrf.mxu2  ;;  %v5037_v49 = vld [vmem:[%s7508_s0 + $0x188] sm:$0x1] }
 0x268   :  { %v2818_v18 = vpop.f32.mrf.mxu0  ;;  %v1954_v61 = vrot.slane %v5037_v49, 5  ;;  %v4945_v49 = vld [vmem:[%s7508_s0 + $0x174] sm:$0xff] }
 0x269   :  { %v6731_v30 = vadd.f32 %v2813_v29, %v2620_v63  ;;  %v1953_v29 = vrot.slane %v1951_v9, 4 }
 0x26a   :  { %v1646_v33 = vpop.f32.mrf.mxu1 }
 0x26b   :  { %7719 = vst [vmem:[#allocation87_spill] sm:$0xff] %v6731_v30  ;;  %4727 = vmatmul.msk.bf16.gmra.mxu3 %vm1006_vm3, %v4944_v58  ;;  %v1647_v16 = vadd.f32 %v1646_v33, %v7720_v45  ;;  %v1952_v33 = vsel %vm5739_vm7, %v4656_v46, %v1951_v9  ;;  %v1955_v45 = vsel %vm5739_vm7, %v1953_v29, %v1954_v61  ;;  %v5039_v29 = vld [vmem:[%s7508_s0 + $0x190] sm:$0xf] }
 0x26c   :  { %4688 = vmatmul.msk.bf16.gmra.mxu2 %vm1006_vm3, %v6726_v26 }
 0x26d   :  { %v2370_v42 = vadd.f32 %v2271_v53, %v1647_v16  ;;  %v2026_v53 = vunpack.c.l.b16 %v1955_v45  ;;  %v7726_v45 = vld [vmem:[#allocation55_spill] sm:$0xff] }
 0x26e   :  { %v2518_v15 = vpop.f32.mrf.mxu3 }
 0x26f   :  { %v2621_v58 = vadd.f32 %v2518_v15, %v2367_v5  ;;  %v2274_v63 = vpop.f32.mrf.mxu2  ;;  %v2025_v5 = vunpack.c.l.b16 %v1952_v33 }
 0x270   :  { %v2821_v39 = vpop.f32.mrf.mxu0 }
 0x271   :  { %v6747_v26 = vadd.f32 %v2816_v0, %v2621_v58  ;;  %v6756_v0 = vpack.c.b16 %v2026_v53, %v2025_v5  ;;  %v1958_v58 = vrot.slane %v5039_v29, 5 }
 0x272   :  { %v1649_v7 = vpop.f32.mrf.mxu1 }
 0x273   :  { %7721 = vst [vmem:[#allocation50_spill] sm:$0xff] %v6747_v26  ;;  %v1650_v30 = vadd.f32 %v1649_v7, %v7722_v31  ;;  %4761 = vmatmul.msk.bf16.gmra.mxu0 %vm1006_vm3, %v7723_v62  ;;  %v7729_v26 = vld [vmem:[#allocation27_spill] sm:$0xff] }
 0x274   :  { %7724 = vst [vmem:[#allocation53_spill] sm:$0xff] %v6756_v0 }
 0x275   :  { %v2371_v15 = vadd.f32 %v2274_v63, %v1650_v30  ;;  %4623 = vmatmul.msk.bf16.gmra.mxu1 %vm1006_vm3, %v4945_v49  ;;  %v5041_v63 = vld [vmem:[%s7508_s0 + $0x18c] sm:$0xf] }
 0x276   :  { %v2520_v16 = vpop.f32.mrf.mxu3  ;;  %v4657_v5 = vrot.slane %v5041_v63, 9  ;;  %v7728_v63 = vld [vmem:[#allocation58_spill] sm:$0xff] }
 0x277   :  { %v2622_v9 = vadd.f32 %v2520_v16, %v2368_v59  ;;  %v2276_v61 = vpop.f32.mrf.mxu2  ;;  %v5040_v59 = vld [vmem:[%s7508_s0 + $0x194] sm:$0x1] }
 0x278   :  { %v2823_v46 = vpop.f32.mrf.mxu0  ;;  %v1961_v30 = vrot.slane %v5040_v59, 5  ;;  %v4946_v59 = vld [vmem:[%s7508_s0 + $0x180] sm:$0xff] }
 0x279   :  { %v6761_v7 = vadd.f32 %v2818_v18, %v2622_v9  ;;  %v1960_v18 = vrot.slane %v1958_v58, 4 }
 0x27a   :  { %v1651_v33 = vpop.f32.mrf.mxu1 }
 0x27b   :  { %7725 = vst [vmem:[#allocation88_spill] sm:$0xff] %v6761_v7  ;;  %4728 = vmatmul.msk.bf16.gmra.mxu3 %vm1006_vm3, %v4945_v49  ;;  %v1652_v31 = vadd.f32 %v1651_v33, %v7726_v45  ;;  %v1959_v45 = vsel %vm5739_vm7, %v4657_v5, %v1958_v58 }
 0x27c   :  { %4689 = vmatmul.msk.bf16.gmra.mxu2 %vm1006_vm3, %v6756_v0  ;;  %v1962_v0 = vsel %vm5739_vm7, %v1960_v18, %v1961_v30  ;;  %v131_v30 = vld [vmem:[%s7508_s0 + $0x19c] sm:$0xf] }
 0x27d   :  { %v2372_v16 = vadd.f32 %v2276_v61, %v1652_v31  ;;  %v130_v61 = vld [vmem:[%s7508_s0 + $0x198] sm:$0xf] }
 0x27e   :  { %v2523_v53 = vpop.f32.mrf.mxu3 }
 0x27f   :  { %v2623_v49 = vadd.f32 %v2523_v53, %v2369_v34  ;;  %v2279_v9 = vpop.f32.mrf.mxu2  ;;  %v2027_v34 = vunpack.c.l.b16 %v1959_v45  ;;  %v2672_v53 = vshrl.u32 %v130_v61, 16  ;;  %v2675_v45 = vshll.u32 %v130_v61, 16  ;;  %v132_v61 = vld [vmem:[%s7508_s0 + $0x1a0] sm:$0x1] }
 0x280   :  { %v2826_v33 = vpop.f32.mrf.mxu0  ;;  %v2691_v50 = vshll.u32 %v132_v61, 16 }
 0x281   :  { %v6773_v29 = vadd.f32 %v2821_v39, %v2623_v49  ;;  %v2028_v39 = vunpack.c.l.b16 %v1962_v0  ;;  %v2681_v0 = vshll.u32 %v131_v30, 16  ;;  %v2674_v38 = vrot.slane %v2672_v53, 4  ;;  %v4947_v53 = vld [vmem:[%s7508_s0 + $0x18c] sm:$0xff] }
 0x282   :  { %v1654_v62 = vpop.f32.mrf.mxu1 }
 0x283   :  { %7727 = vst [vmem:[#allocation55_spill] sm:$0xff] %v6773_v29  ;;  %v1655_v7 = vadd.f32 %v1654_v62, %v7728_v63  ;;  %4762 = vmatmul.msk.bf16.gmra.mxu0 %vm1006_vm3, %v7729_v26  ;;  %v6792_v62 = vpack.c.b16 %v2028_v39, %v2027_v34  ;;  %v2685_v63 = vshrl.u32 %v131_v30, 16 }
 0x285   :  { %v2373_v31 = vadd.f32 %v2279_v9, %v1655_v7  ;;  %4624 = vmatmul.msk.bf16.gmra.mxu1 %vm1006_vm3, %v4946_v59  ;;  %7730 = vst [vmem:[#allocation58_spill] sm:$0xff] %v6792_v62  ;;  %v7732_v9 = vld [vmem:[#allocation60_spill] sm:$0xff]  ;;  %v2687_v34 = vrot.slane %v2685_v63, 4 }
 0x286   :  { %v2525_v58 = vpop.f32.mrf.mxu3 }
 0x287   :  { %v2624_v5 = vadd.f32 %v2525_v58, %v2370_v42  ;;  %v2281_v18 = vpop.f32.mrf.mxu2  ;;  %v2677_v42 = vrot.slane %v2675_v45, 5  ;;  %v2683_v58 = vrot.slane %v2681_v0, 5  ;;  %v7733_v0 = vld [vmem:[#allocation26_spill] sm:$0xff] }
 0x288   :  { %v2828_v49 = vpop.f32.mrf.mxu0 }
 0x289   :  { %v6794_v26 = vadd.f32 %v2823_v46, %v2624_v5 }
 0x28a   :  { %v1656_v7 = vpop.f32.mrf.mxu1 }
 0x28b   :  { %7731 = vst [vmem:[#allocation89_spill] sm:$0xff] %v6794_v26  ;;  %4729 = vmatmul.msk.bf16.gmra.mxu3 %vm1006_vm3, %v4946_v59  ;;  %v1657_v29 = vadd.f32 %v1656_v7, %v7732_v9  ;;  %v2678_v59 = vor.u32 %v2677_v42, %v2674_v38  ;;  %v2688_v26 = vor.u32 %v2687_v34, %v2683_v58 }
 0x28c   :  { %4690 = vmatmul.msk.bf16.gmra.mxu2 %vm1006_vm3, %v6792_v62 }
 0x28d   :  { %v2374_v57 = vadd.f32 %v2281_v18, %v1657_v29  ;;  %v7734_v29 = vld [vmem:[#allocation30_spill] sm:$0xff]  ;;  %v2679_v18 = vrot.slane %v2678_v59, 4  ;;  %v2689_v9 = vrot.slane %v2688_v26, 4  ;;  %v7735_v26 = vld [vmem:[#allocation28_spill] sm:$0xff] }
 0x28e   :  { %v2528_v39 = vpop.f32.mrf.mxu3 }
 0x28f   :  { %v2625_v46 = vadd.f32 %v2528_v39, %v2371_v15  ;;  %v2284_v30 = vpop.f32.mrf.mxu2  ;;  %v2693_v15 = vrot.slane %v2691_v50, 5  ;;  %v2684_v34 = vsel %vm5175_vm4, %v2679_v18, %v2683_v58 }
 0x290   :  { %v2831_v5 = vpop.f32.mrf.mxu0 }
 0x291   :  { %v6803_v7 = vadd.f32 %v2826_v33, %v2625_v46  ;;  %v2694_v61 = vsel %vm5175_vm4, %v2689_v9, %v2693_v15 }
 0x292   :  { %v1659_v45 = vpop.f32.mrf.mxu1 }
 0x293   :  { %v1660_v63 = vadd.f32 %v1659_v45, %v7733_v0  ;;  %4763 = vmatmul.msk.bf16.gmra.mxu0 %vm1006_vm3, %v7734_v29  ;;  %v2700_v45 = vunpack.c.l.b16 %v2694_v61 }
 0x295   :  { %v2375_v62 = vadd.f32 %v2284_v30, %v1660_v63  ;;  %4625 = vmatmul.msk.bf16.gmra.mxu1 %vm1006_vm3, %v4947_v53  ;;  %v5042_v30 = vld [vmem:[%s7508_s0 + $0x18] sm:$0xff] }
 0x296   :  { %v2530_v39 = vpop.f32.mrf.mxu3 }
 0x297   :  { %v2626_v38 = vadd.f32 %v2530_v39, %v2372_v16  ;;  %v2286_v33 = vpop.f32.mrf.mxu2  ;;  %v2699_v16 = vunpack.c.l.b16 %v2684_v34  ;;  %v7737_v39 = vld [vmem:[#allocation31_spill] sm:$0xff] }
 0x298   :  { %v2833_v42 = vpop.f32.mrf.mxu0 }
 0x299   :  { %v6816_v46 = vadd.f32 %v2828_v49, %v2626_v38  ;;  %v6824_v9 = vpack.c.b16 %v2700_v45, %v2699_v16  ;;  %v7739_v16 = vld [vmem:[#allocation33_spill] sm:$0xff] }
 0x29a   :  { %v1661_v59 = vpop.f32.mrf.mxu1 }
 0x29b   :  { %4730 = vmatmul.msk.bf16.gmra.mxu3 %vm1006_vm3, %v4947_v53  ;;  %v1662_v50 = vadd.f32 %v1661_v59, %v7735_v26  ;;  %7736 = vst [vmem:[#allocation60_spill] sm:$0xff] %v6824_v9 }
 0x29c   :  { %4809 = vmatmul.msk.bf16.vlgmr.msra.gmra.mxu2 %vm1006_vm3, %v5042_v30  ;;  %v7738_v30 = vld [vmem:[#allocation32_spill] sm:$0xff] }
 0x29d   :  { %v2376_v58 = vadd.f32 %v2286_v33, %v1662_v50 }
 0x29e   :  { %v2533_v0 = vpop.f32.mrf.mxu3 }
 0x29f   :  { %v2627_v63 = vadd.f32 %v2533_v0, %v2373_v31  ;;  %v2289_v18 = vpop.f32.mrf.mxu2  ;;  %v4948_v31 = vld [vmem:[%s7508_s0 + $0x198] sm:$0xff]  ;;  %v5043_v0 = vld [vmem:[%s7508_s0 + $0x24] sm:$0xff] }
 0x2a0   :  { %v2836_v49 = vpop.f32.mrf.mxu0 }
 0x2a1   :  { %v6826_v15 = vadd.f32 %v2831_v5, %v2627_v63 }
 0x2a2   :  { %v1664_v53 = vpop.f32.mrf.mxu1 }
 0x2a3   :  { %v1665_v38 = vadd.f32 %v1664_v53, %v7737_v39  ;;  %4764 = vmatmul.msk.bf16.gmra.mxu0 %vm1006_vm3, %v6824_v9 }
 0x2a5   :  { %v2377_v26 = vadd.f32 %v2289_v18, %v1665_v38  ;;  %4768 = vmatmul.msk.bf16.vlgmr.msra.gmra.mxu1 %vm1006_vm3, %v7738_v30 }
 0x2a6   :  { %v2535_v59 = vpop.f32.mrf.mxu3 }
 0x2a7   :  { %v2628_v34 = vadd.f32 %v2535_v59, %v2374_v57  ;;  %v2291_v33 = vpop.f32.mrf.mxu2  ;;  %v7741_v59 = vld [vmem:[#allocation36_spill] sm:$0xff] }
 0x2a8   :  { %v2838_v61 = vpop.f32.mrf.mxu0 }
 0x2a9   :  { %v6836_v5 = vadd.f32 %v2833_v42, %v2628_v34  ;;  %v7742_v34 = vld [vmem:[#allocation35_spill] sm:$0xff] }
 0x2aa   :  { %v1666_v50 = vpop.f32.mrf.mxu1 }
 0x2ab   :  { %4731 = vmatmul.msk.bf16.gmra.mxu3 %vm1006_vm3, %v4948_v31  ;;  %v1667_v45 = vadd.f32 %v1666_v50, %v7739_v16 }
 0x2ac   :  { %4810 = vmatmul.msk.bf16.gmra.mxu2 %vm1006_vm3, %v5043_v0 }
 0x2ad   :  { %v2378_v63 = vadd.f32 %v2291_v33, %v1667_v45  ;;  %v7745_v45 = vld [vmem:[#allocation38_spill] sm:$0xff] }
 0x2ae   :  { %v2538_v57 = vpop.f32.mrf.mxu3 }
 0x2af   :  { %v2629_v18 = vadd.f32 %v2538_v57, %v2375_v62  ;;  %v2294_v53 = vpop.f32.mrf.mxu2  ;;  %v7744_v62 = vld [vmem:[#allocation8_spill] sm:$0xff] }
 0x2b0   :  { %v2841_v39 = vpop.f32.mrf.mxu0 }
 0x2b1   :  { %v6844_v38 = vadd.f32 %v2836_v49, %v2629_v18  ;;  %v5044_v18 = vld [vmem:[%s7508_s0 + $0x30] sm:$0xff] }
 0x2b2   :  { %v1669_v42 = vpop.f32.mrf.mxu1 }
 0x2b3   :  { %7740 = vst [vmem:[#allocation26_spill] sm:$0xff] %v6844_v38  ;;  %v1670_v30 = vadd.f32 %v1669_v42, %v7741_v59  ;;  %4877 = vmatmul.msk.bf16.vlgmr.msra.gmra.mxu0 %vm1006_vm3, %v7742_v34 }
 0x2b5   :  { %v2379_v50 = vadd.f32 %v2294_v53, %v1670_v30  ;;  %4769 = vmatmul.msk.bf16.gmra.mxu1 %vm1006_vm3, %v7742_v34 }
 0x2b6   :  { %v2540_v31 = vpop.f32.mrf.mxu3 }
 0x2b7   :  { %v2630_v16 = vadd.f32 %v2540_v31, %v2376_v58  ;;  %v2296_v0 = vpop.f32.mrf.mxu2  ;;  %v7747_v31 = vld [vmem:[#allocation41_spill] sm:$0xff] }
 0x2b8   :  { %v2843_v9 = vpop.f32.mrf.mxu0 }
 0x2b9   :  { %v6851_v33 = vadd.f32 %v2838_v61, %v2630_v16 }
 0x2ba   :  { %v1671_v49 = vpop.f32.mrf.mxu1 }
 0x2bb   :  { %7743 = vst [vmem:[#allocation30_spill] sm:$0xff] %v6851_v33  ;;  %4842 = vmatmul.msk.bf16.vlgmr.msra.gmra.mxu3 %vm1006_vm3, %v7744_v62  ;;  %v1672_v57 = vadd.f32 %v1671_v49, %v7745_v45  ;;  %v7748_v62 = vld [vmem:[#allocation39_spill] sm:$0xff] }
 0x2bc   :  { %4811 = vmatmul.msk.bf16.gmra.mxu2 %vm1006_vm3, %v5044_v18 }
 0x2bd   :  { %v2380_v42 = vadd.f32 %v2296_v0, %v1672_v57  ;;  %v7751_v57 = vld [vmem:[#allocation44_spill] sm:$0xff] }
 0x2be   :  { %v2543_v53 = vpop.f32.mrf.mxu3 }
 0x2bf   :  { %v2631_v59 = vadd.f32 %v2543_v53, %v2377_v26  ;;  %v2299_v58 = vpop.f32.mrf.mxu2  ;;  %v7750_v26 = vld [vmem:[#allocation11_spill] sm:$0xff] }
 0x2c0   :  { %v2846_v30 = vpop.f32.mrf.mxu0 }
 0x2c1   :  { %v6860_v34 = vadd.f32 %v2841_v39, %v2631_v59  ;;  %v5045_v59 = vld [vmem:[%s7508_s0 + $0x3c] sm:$0xff] }
 0x2c2   :  { %v1674_v61 = vpop.f32.mrf.mxu1 }
 0x2c3   :  { %7746 = vst [vmem:[#allocation28_spill] sm:$0xff] %v6860_v34  ;;  %v1675_v16 = vadd.f32 %v1674_v61, %v7747_v31  ;;  %4878 = vmatmul.msk.bf16.gmra.mxu0 %vm1006_vm3, %v7748_v62 }
 0x2c5   :  { %v2381_v45 = vadd.f32 %v2299_v58, %v1675_v16  ;;  %4770 = vmatmul.msk.bf16.gmra.mxu1 %vm1006_vm3, %v7748_v62 }
 0x2c6   :  { %v2545_v49 = vpop.f32.mrf.mxu3 }
 0x2c7   :  { %v2632_v33 = vadd.f32 %v2545_v49, %v2378_v63  ;;  %v2301_v18 = vpop.f32.mrf.mxu2 }
 0x2c8   :  { %v2848_v38 = vpop.f32.mrf.mxu0 }
 0x2c9   :  { %v6867_v0 = vadd.f32 %v2843_v9, %v2632_v33  ;;  %v7753_v33 = vld [vmem:[#allocation46_spill] sm:$0xff] }
 0x2ca   :  { %v1676_v39 = vpop.f32.mrf.mxu1 }
 0x2cb   :  { %7749 = vst [vmem:[#allocation31_spill] sm:$0xff] %v6867_v0  ;;  %4843 = vmatmul.msk.bf16.gmra.mxu3 %vm1006_vm3, %v7750_v26  ;;  %v1677_v53 = vadd.f32 %v1676_v39, %v7751_v57  ;;  %v7754_v26 = vld [vmem:[#allocation43_spill] sm:$0xff] }
 0x2cc   :  { %4812 = vmatmul.msk.bf16.gmra.mxu2 %vm1006_vm3, %v5045_v59 }
 0x2cd   :  { %v2382_v61 = vadd.f32 %v2301_v18, %v1677_v53  ;;  %v7757_v53 = vld [vmem:[#allocation49_spill] sm:$0xff] }
 0x2ce   :  { %v2548_v58 = vpop.f32.mrf.mxu3 }
 0x2cf   :  { %v2633_v31 = vadd.f32 %v2548_v58, %v2379_v50  ;;  %v2304_v63 = vpop.f32.mrf.mxu2  ;;  %v7756_v50 = vld [vmem:[#allocation14_spill] sm:$0xff] }
 0x2d0   :  { %v2851_v16 = vpop.f32.mrf.mxu0 }
 0x2d1   :  { %v6876_v62 = vadd.f32 %v2846_v30, %v2633_v31  ;;  %v5046_v31 = vld [vmem:[%s7508_s0 + $0x48] sm:$0xff] }
 0x2d2   :  { %v1679_v9 = vpop.f32.mrf.mxu1 }
 0x2d3   :  { %7752 = vst [vmem:[#allocation32_spill] sm:$0xff] %v6876_v62  ;;  %v1680_v49 = vadd.f32 %v1679_v9, %v7753_v33  ;;  %4879 = vmatmul.msk.bf16.gmra.mxu0 %vm1006_vm3, %v7754_v26 }
 0x2d5   :  { %v2383_v57 = vadd.f32 %v2304_v63, %v1680_v49  ;;  %4771 = vmatmul.msk.bf16.gmra.mxu1 %vm1006_vm3, %v7754_v26 }
 0x2d6   :  { %v2550_v39 = vpop.f32.mrf.mxu3 }
 0x2d7   :  { %v2634_v0 = vadd.f32 %v2550_v39, %v2380_v42  ;;  %v2306_v59 = vpop.f32.mrf.mxu2 }
 0x2d8   :  { %v2853_v34 = vpop.f32.mrf.mxu0 }
 0x2d9   :  { %v6883_v18 = vadd.f32 %v2848_v38, %v2634_v0  ;;  %v7759_v0 = vld [vmem:[#allocation51_spill] sm:$0xff] }
 0x2da   :  { %v1681_v30 = vpop.f32.mrf.mxu1 }
 0x2db   :  { %7755 = vst [vmem:[#allocation33_spill] sm:$0xff] %v6883_v18  ;;  %4844 = vmatmul.msk.bf16.gmra.mxu3 %vm1006_vm3, %v7756_v50  ;;  %v1682_v58 = vadd.f32 %v1681_v30, %v7757_v53  ;;  %v7760_v50 = vld [vmem:[#allocation47_spill] sm:$0xff] }
 0x2dc   :  { %4813 = vmatmul.msk.bf16.gmra.mxu2 %vm1006_vm3, %v5046_v31 }
 0x2dd   :  { %v2384_v9 = vadd.f32 %v2306_v59, %v1682_v58  ;;  %v7763_v58 = vld [vmem:[#allocation54_spill] sm:$0xff] }
 0x2de   :  { %v2553_v63 = vpop.f32.mrf.mxu3 }
 0x2df   :  { %v2635_v33 = vadd.f32 %v2553_v63, %v2381_v45  ;;  %v2309_v42 = vpop.f32.mrf.mxu2  ;;  %v7762_v45 = vld [vmem:[#allocation18_spill] sm:$0xff] }
 0x2e0   :  { %v2856_v49 = vpop.f32.mrf.mxu0 }
 0x2e1   :  { %v6892_v26 = vadd.f32 %v2851_v16, %v2635_v33  ;;  %v5047_v33 = vld [vmem:[%s7508_s0 + $0x54] sm:$0xff] }
 0x2e2   :  { %v1684_v38 = vpop.f32.mrf.mxu1 }
 0x2e3   :  { %7758 = vst [vmem:[#allocation36_spill] sm:$0xff] %v6892_v26  ;;  %v1685_v39 = vadd.f32 %v1684_v38, %v7759_v0  ;;  %4880 = vmatmul.msk.bf16.gmra.mxu0 %vm1006_vm3, %v7760_v50 }
 0x2e5   :  { %v2385_v53 = vadd.f32 %v2309_v42, %v1685_v39  ;;  %4772 = vmatmul.msk.bf16.gmra.mxu1 %vm1006_vm3, %v7760_v50 }
 0x2e6   :  { %v2555_v30 = vpop.f32.mrf.mxu3 }
 0x2e7   :  { %v2636_v18 = vadd.f32 %v2555_v30, %v2382_v61  ;;  %v2311_v31 = vpop.f32.mrf.mxu2 }
 0x2e8   :  { %v2858_v62 = vpop.f32.mrf.mxu0 }
 0x2e9   :  { %v6899_v59 = vadd.f32 %v2853_v34, %v2636_v18  ;;  %v7765_v18 = vld [vmem:[#allocation57_spill] sm:$0xff] }
 0x2ea   :  { %v1686_v16 = vpop.f32.mrf.mxu1 }
 0x2eb   :  { %7761 = vst [vmem:[#allocation35_spill] sm:$0xff] %v6899_v59  ;;  %4845 = vmatmul.msk.bf16.gmra.mxu3 %vm1006_vm3, %v7762_v45  ;;  %v1687_v63 = vadd.f32 %v1686_v16, %v7763_v58  ;;  %v7766_v45 = vld [vmem:[#allocation52_spill] sm:$0xff] }
 0x2ec   :  { %4814 = vmatmul.msk.bf16.gmra.mxu2 %vm1006_vm3, %v5047_v33 }
 0x2ed   :  { %v2386_v38 = vadd.f32 %v2311_v31, %v1687_v63  ;;  %v7769_v63 = vld [vmem:[#allocation59_spill] sm:$0xff] }
 0x2ee   :  { %v2558_v42 = vpop.f32.mrf.mxu3 }
 0x2ef   :  { %v2637_v0 = vadd.f32 %v2558_v42, %v2383_v57  ;;  %v2314_v61 = vpop.f32.mrf.mxu2  ;;  %v7768_v57 = vld [vmem:[#allocation22_spill] sm:$0xff] }
 0x2f0   :  { %v2861_v39 = vpop.f32.mrf.mxu0 }
 0x2f1   :  { %v6908_v50 = vadd.f32 %v2856_v49, %v2637_v0  ;;  %v5048_v0 = vld [vmem:[%s7508_s0 + $0x60] sm:$0xff] }
 0x2f2   :  { %v1689_v34 = vpop.f32.mrf.mxu1 }
 0x2f3   :  { %7764 = vst [vmem:[#allocation8_spill] sm:$0xff] %v6908_v50  ;;  %v1690_v30 = vadd.f32 %v1689_v34, %v7765_v18  ;;  %4881 = vmatmul.msk.bf16.gmra.mxu0 %vm1006_vm3, %v7766_v45 }
 0x2f5   :  { %v2387_v58 = vadd.f32 %v2314_v61, %v1690_v30  ;;  %4773 = vmatmul.msk.bf16.gmra.mxu1 %vm1006_vm3, %v7766_v45 }
 0x2f6   :  { %v2560_v16 = vpop.f32.mrf.mxu3 }
 0x2f7   :  { %v2638_v59 = vadd.f32 %v2560_v16, %v2384_v9  ;;  %v2316_v33 = vpop.f32.mrf.mxu2 }
 0x2f8   :  { %v2863_v26 = vpop.f32.mrf.mxu0 }
 0x2f9   :  { %v6915_v31 = vadd.f32 %v2858_v62, %v2638_v59  ;;  %v7771_v59 = vld [vmem:[#allocation62_spill] sm:$0xff] }
 0x2fa   :  { %v1691_v49 = vpop.f32.mrf.mxu1 }
 0x2fb   :  { %7767 = vst [vmem:[#allocation38_spill] sm:$0xff] %v6915_v31  ;;  %4846 = vmatmul.msk.bf16.gmra.mxu3 %vm1006_vm3, %v7768_v57  ;;  %v1692_v42 = vadd.f32 %v1691_v49, %v7769_v63  ;;  %v7772_v57 = vld [vmem:[#allocation56_spill] sm:$0xff] }
 0x2fc   :  { %4815 = vmatmul.msk.bf16.gmra.mxu2 %vm1006_vm3, %v5048_v0 }
 0x2fd   :  { %v2388_v34 = vadd.f32 %v2316_v33, %v1692_v42  ;;  %v7775_v42 = vld [vmem:[#allocation63_spill] sm:$0xff] }
 0x2fe   :  { %v2563_v61 = vpop.f32.mrf.mxu3 }
 0x2ff   :  { %v2639_v18 = vadd.f32 %v2563_v61, %v2385_v53  ;;  %v2319_v9 = vpop.f32.mrf.mxu2  ;;  %v7774_v53 = vld [vmem:[#allocation25_spill] sm:$0xff] }
 0x300   :  { %v2866_v30 = vpop.f32.mrf.mxu0 }
 0x301   :  { %v6924_v45 = vadd.f32 %v2861_v39, %v2639_v18  ;;  %v5049_v18 = vld [vmem:[%s7508_s0 + $0x6c] sm:$0xff] }
 0x302   :  { %v1694_v62 = vpop.f32.mrf.mxu1 }
 0x303   :  { %7770 = vst [vmem:[#allocation41_spill] sm:$0xff] %v6924_v45  ;;  %v1695_v16 = vadd.f32 %v1694_v62, %v7771_v59  ;;  %4882 = vmatmul.msk.bf16.gmra.mxu0 %vm1006_vm3, %v7772_v57 }
 0x305   :  { %v2389_v63 = vadd.f32 %v2319_v9, %v1695_v16  ;;  %4774 = vmatmul.msk.bf16.gmra.mxu1 %vm1006_vm3, %v7772_v57 }
 0x306   :  { %v2565_v49 = vpop.f32.mrf.mxu3 }
 0x307   :  { %v2640_v31 = vadd.f32 %v2565_v49, %v2386_v38  ;;  %v2321_v0 = vpop.f32.mrf.mxu2 }
 0x308   :  { %v2868_v50 = vpop.f32.mrf.mxu0 }
 0x309   :  { %v6931_v33 = vadd.f32 %v2863_v26, %v2640_v31  ;;  %v7776_v31 = vld [vmem:[#allocation65_spill] sm:$0xff] }
 0x30a   :  { %v1696_v39 = vpop.f32.mrf.mxu1 }
 0x30b   :  { %7773 = vst [vmem:[#allocation39_spill] sm:$0xff] %v6931_v33  ;;  %4847 = vmatmul.msk.bf16.gmra.mxu3 %vm1006_vm3, %v7774_v53  ;;  %v1697_v61 = vadd.f32 %v1696_v39, %v7775_v42  ;;  %v7777_v53 = vld [vmem:[#allocation61_spill] sm:$0xff] }
 0x30c   :  { %4816 = vmatmul.msk.bf16.gmra.mxu2 %vm1006_vm3, %v5049_v18 }
 0x30d   :  { %v2390_v62 = vadd.f32 %v2321_v0, %v1697_v61  ;;  %v7780_v61 = vld [vmem:[#allocation66_spill] sm:$0xff] }
 0x30e   :  { %v2568_v9 = vpop.f32.mrf.mxu3 }
 0x30f   :  { %v2641_v59 = vadd.f32 %v2568_v9, %v2387_v58  ;;  %v2324_v38 = vpop.f32.mrf.mxu2  ;;  %v7779_v58 = vld [vmem:[#allocation29_spill] sm:$0xff] }
 0x310   :  { %v2871_v16 = vpop.f32.mrf.mxu0 }
 0x311   :  { %v6940_v57 = vadd.f32 %v2866_v30, %v2641_v59  ;;  %v5050_v59 = vld [vmem:[%s7508_s0 + $0x78] sm:$0xff] }
 0x312   :  { %v1699_v26 = vpop.f32.mrf.mxu1 }
 0x313   :  { %v1700_v49 = vadd.f32 %v1699_v26, %v7776_v31  ;;  %4883 = vmatmul.msk.bf16.gmra.mxu0 %vm1006_vm3, %v7777_v53 }
 0x315   :  { %v2391_v42 = vadd.f32 %v2324_v38, %v1700_v49  ;;  %4775 = vmatmul.msk.bf16.gmra.mxu1 %vm1006_vm3, %v7777_v53 }
 0x316   :  { %v2570_v39 = vpop.f32.mrf.mxu3 }
 0x317   :  { %v2642_v33 = vadd.f32 %v2570_v39, %v2388_v34  ;;  %v2326_v18 = vpop.f32.mrf.mxu2  ;;  %v7781_v39 = vld [vmem:[#allocation64_spill] sm:$0xff] }
 0x318   :  { %v2873_v45 = vpop.f32.mrf.mxu0 }
 0x319   :  { %v6947_v0 = vadd.f32 %v2868_v50, %v2642_v33 }
 0x31a   :  { %v1701_v30 = vpop.f32.mrf.mxu1 }
 0x31b   :  { %7778 = vst [vmem:[#allocation11_spill] sm:$0xff] %v6947_v0  ;;  %4848 = vmatmul.msk.bf16.gmra.mxu3 %vm1006_vm3, %v7779_v58  ;;  %v1702_v9 = vadd.f32 %v1701_v30, %v7780_v61 }
 0x31c   :  { %4817 = vmatmul.msk.bf16.gmra.mxu2 %vm1006_vm3, %v5050_v59 }
 0x31d   :  { %v2392_v26 = vadd.f32 %v2326_v18, %v1702_v9 }
 0x31e   :  { %v2573_v38 = vpop.f32.mrf.mxu3 }
 0x31f   :  { %v2643_v31 = vadd.f32 %v2573_v38, %v2389_v63  ;;  %v3241_v34 = vpop.f32.mrf.mxu2  ;;  %v7782_v63 = vld [vmem:[#allocation5_spill] sm:$0xff] }
 0x320   :  { %v2876_v49 = vpop.f32.mrf.mxu0 }
 0x321   :  { %v6956_v53 = vadd.f32 %v2871_v16, %v2643_v31 }
 0x322   :  { %v2987_v50 = vpop.f32.mrf.mxu1 }
 0x323   :  { %v3147_v33 = vadd.f32 %v2987_v50, %v6160_v6  ;;  %4884 = vmatmul.msk.bf16.gmra.mxu0 %vm1006_vm3, %v7781_v39  ;;  %v5051_v6 = vld [vmem:[%s7508_s0 + $0x84] sm:$0xff] }
 0x325   :  { %v3401_v30 = vadd.f32 %v3241_v34, %v3147_v33  ;;  %4776 = vmatmul.msk.bf16.gmra.mxu1 %vm1006_vm3, %v7781_v39 }
 0x326   :  { %v2575_v58 = vpop.f32.mrf.mxu3 }
 0x327   :  { %v2644_v61 = vadd.f32 %v2575_v58, %v2390_v62  ;;  %v3243_v59 = vpop.f32.mrf.mxu2  ;;  %v7783_v58 = vld [vmem:[#allocation67_spill] sm:$0xff] }
 0x328   :  { %v2878_v0 = vpop.f32.mrf.mxu0 }
 0x329   :  { %v6963_v18 = vadd.f32 %v2873_v45, %v2644_v61 }
 0x32a   :  { %v2989_v16 = vpop.f32.mrf.mxu1 }
 0x32b   :  { %4849 = vmatmul.msk.bf16.gmra.mxu3 %vm1006_vm3, %v7782_v63  ;;  %v3148_v9 = vadd.f32 %v2989_v16, %v6174_v32 }
 0x32c   :  { %4818 = vmatmul.msk.bf16.gmra.mxu2 %vm1006_vm3, %v5051_v6  ;;  %v5052_v6 = vld [vmem:[%s7508_s0 + $0x90] sm:$0xff] }
 0x32d   :  { %v3402_v31 = vadd.f32 %v3243_v59, %v3148_v9 }
 0x32e   :  { %v2578_v38 = vpop.f32.mrf.mxu3 }
 0x32f   :  { %v2645_v34 = vadd.f32 %v2578_v38, %v2391_v42  ;;  %v3246_v62 = vpop.f32.mrf.mxu2  ;;  %v4302_v42 = vld [vmem:[%s7511_s3] sm:$0xff] }
 0x330   :  { %v3805_v50 = vpop.f32.mrf.mxu0  ;;  %4328 = vmatpush.msrb.mxu1 %v4302_v42 }
 0x331   :  { %v6972_v33 = vadd.f32 %v2876_v49, %v2645_v34 }
 0x332   :  { %v2992_v45 = vpop.f32.mrf.mxu1 }
 0x333   :  { %v3149_v39 = vadd.f32 %v2992_v45, %v6190_v40  ;;  %4885 = vmatmul.msk.bf16.gmra.mxu0 %vm1006_vm3, %v7783_v58 }
 0x335   :  { %v3403_v61 = vadd.f32 %v3246_v62, %v3149_v39  ;;  %4777 = vmatmul.msk.bf16.gmra.mxu1 %vm1006_vm3, %v7783_v58  ;;  %v7784_v58 = vld [vmem:[#allocation68_spill] sm:$0xff] }
 0x336   :  { %v2580_v32 = vpop.f32.mrf.mxu3 }
 0x337   :  { %v2646_v63 = vadd.f32 %v2580_v32, %v2392_v26  ;;  %v3248_v16 = vpop.f32.mrf.mxu2 }
 0x338   :  { %v3807_v59 = vpop.f32.mrf.mxu0 }
 0x339   :  { %v6982_v49 = vadd.f32 %v2878_v0, %v2646_v63  ;;  %v6994_v0 = vld [vmem:[%s7510_s2] ss:$0 sm:$0xff] }
 0x33a   :  { %v2994_v40 = vpop.f32.mrf.mxu1 }
 0x33b   :  { %4850 = vmatmul.msk.bf16.gmra.mxu3 %vm1006_vm3, %v5266_v13  ;;  %v3150_v9 = vadd.f32 %v2994_v40, %v6204_v48 }
 0x33c   :  { %4819 = vmatmul.msk.bf16.gmra.mxu2 %vm1006_vm3, %v5052_v6 }
 0x33d   :  { %v3404_v38 = vadd.f32 %v3248_v16, %v3150_v9 }
 0x33e   :  { %v3539_v26 = vpop.f32.mrf.mxu3 }
 0x33f   :  { %v3699_v34 = vadd.f32 %v3539_v26, %v3401_v30  ;;  %v3251_v62 = vpop.f32.mrf.mxu2 }
 0x340   :  { %v3810_v39 = vpop.f32.mrf.mxu0 }
 0x341   :  { %v3965_v45 = vadd.f32 %v3805_v50, %v3699_v34  ;;  %v5053_v34 = vld [vmem:[%s7508_s0 + $0x9c] sm:$0xff] }
 0x342   :  { %v2997_v13 = vpop.f32.mrf.mxu1 }
 0x343   :  { %v3151_v48 = vadd.f32 %v2997_v13, %v6220_v22  ;;  %4886 = vmatmul.msk.bf16.gmra.mxu0 %vm1006_vm3, %v7784_v58  ;;  %v4033_v30 = vadd.f32 %v6994_v0, %v3965_v45 }
 0x345   :  { %v3405_v63 = vadd.f32 %v3251_v62, %v3151_v48  ;;  %4778 = vmatmul.msk.bf16.gmra.mxu1 %vm1006_vm3, %v7784_v58  ;;  %v4097_v9 = vmax.f32 %v4033_v30, 0.0 }
 0x346   :  { %v3541_v32 = vpop.f32.mrf.mxu3 }
 0x347   :  { %v3700_v50 = vadd.f32 %v3541_v32, %v3402_v31  ;;  %v3253_v16 = vpop.f32.mrf.mxu2  ;;  %v4162_v45 = vsel %vm4161_vm8, %v4097_v9, 0.0 }
 0x348   :  { %v3812_v40 = vpop.f32.mrf.mxu0 }
 0x349   :  { %v3966_v42 = vadd.f32 %v3807_v59, %v3700_v50 }
 0x34a   :  { %v2999_v22 = vpop.f32.mrf.mxu1 }
 0x34b   :  { %v4034_v6 = vadd.f32 %v6994_v0, %v3966_v42  ;;  %4851 = vmatmul.msk.bf16.gmra.mxu3 %vm1006_vm3, %v5340_v52  ;;  %v3152_v26 = vadd.f32 %v2999_v22, %v6234_v4  ;;  %v7785_v22 = vld [vmem:[#allocation69_spill] sm:$0xff] }
 0x34c   :  { %4820 = vmatmul.msk.bf16.gmra.mxu2 %vm1006_vm3, %v5053_v34 }
 0x34d   :  { %v4098_v31 = vmax.f32 %v4034_v6, 0.0  ;;  %v3406_v59 = vadd.f32 %v3253_v16, %v3152_v26 }
 0x34e   :  { %v3544_v62 = vpop.f32.mrf.mxu3 }
 0x34f   :  { %v4163_v13 = vsel %vm4161_vm8, %v4098_v31, 0.0  ;;  %v3701_v48 = vadd.f32 %v3544_v62, %v3403_v61  ;;  %v3256_v58 = vpop.f32.mrf.mxu2 }
 0x350   :  { %v4164_v52 = vadd.f32 %v4163_v13, %v4162_v45  ;;  %v3815_v30 = vpop.f32.mrf.mxu0 }
 0x351   :  { %v3967_v32 = vadd.f32 %v3810_v39, %v3701_v48  ;;  %v5054_v48 = vld [vmem:[%s7508_s0 + $0xa8] sm:$0xff] }
 0x352   :  { %v3002_v50 = vpop.f32.mrf.mxu1 }
 0x353   :  { %v4035_v4 = vadd.f32 %v6994_v0, %v3967_v32  ;;  %v3153_v42 = vadd.f32 %v3002_v50, %v6250_v3  ;;  %4887 = vmatmul.msk.bf16.gmra.mxu0 %vm1006_vm3, %v7785_v22 }
 0x355   :  { %v4099_v6 = vmax.f32 %v4035_v4, 0.0  ;;  %v3407_v16 = vadd.f32 %v3256_v58, %v3153_v42  ;;  %4779 = vmatmul.msk.bf16.gmra.mxu1 %vm1006_vm3, %v7785_v22 }
 0x356   :  { %v3546_v34 = vpop.f32.mrf.mxu3 }
 0x357   :  { %v4165_v61 = vsel %vm4161_vm8, %v4099_v6, 0.0  ;;  %v3702_v9 = vadd.f32 %v3546_v34, %v3404_v38  ;;  %v3258_v26 = vpop.f32.mrf.mxu2 }
 0x358   :  { %v4166_v39 = vadd.f32 %v4165_v61, %v4164_v52  ;;  %v3817_v62 = vpop.f32.mrf.mxu0  ;;  %v7787_v61 = vld [vmem:[#allocation70_spill] sm:$0xff] }
 0x359   :  { %v3968_v31 = vadd.f32 %v3812_v40, %v3702_v9 }
 0x35a   :  { %v3004_v3 = vpop.f32.mrf.mxu1 }
 0x35b   :  { %v4036_v45 = vadd.f32 %v6994_v0, %v3968_v31  ;;  %4852 = vmatmul.msk.bf16.gmra.mxu3 %vm1006_vm3, %v5411_v23  ;;  %v3154_v13 = vadd.f32 %v3004_v3, %v6264_v14  ;;  %v7786_v14 = vld [vmem:[#allocation72_spill] sm:$0xff] }
 0x35c   :  { %4821 = vmatmul.msk.bf16.gmra.mxu2 %vm1006_vm3, %v5054_v48 }
 0x35d   :  { %v4100_v58 = vmax.f32 %v4036_v45, 0.0  ;;  %v3408_v32 = vadd.f32 %v3258_v26, %v3154_v13 }
 0x35e   :  { %v3549_v38 = vpop.f32.mrf.mxu3 }
 0x35f   :  { %v4167_v40 = vsel %vm4161_vm8, %v4100_v58, 0.0  ;;  %v3703_v52 = vadd.f32 %v3549_v38, %v3405_v63  ;;  %v3261_v4 = vpop.f32.mrf.mxu2  ;;  %v7788_v58 = vld [vmem:[#allocation15_spill] sm:$0xff] }
 0x360   :  { %v4168_v50 = vadd.f32 %v4167_v40, %v4166_v39  ;;  %v3820_v22 = vpop.f32.mrf.mxu0  ;;  %v7789_v40 = vld [vmem:[#allocation74_spill] sm:$0xff] }
 0x361   :  { %v3969_v42 = vadd.f32 %v3815_v30, %v3703_v52 }
 0x362   :  { %v3007_v6 = vpop.f32.mrf.mxu1 }
 0x363   :  { %v4037_v23 = vadd.f32 %v6994_v0, %v3969_v42  ;;  %v3155_v34 = vadd.f32 %v3007_v6, %v7786_v14  ;;  %4888 = vmatmul.msk.bf16.gmra.mxu0 %vm1006_vm3, %v7787_v61 }
 0x365   :  { %v4101_v9 = vmax.f32 %v4037_v23, 0.0  ;;  %v3409_v45 = vadd.f32 %v3261_v4, %v3155_v34  ;;  %4780 = vmatmul.msk.bf16.gmra.mxu1 %vm1006_vm3, %v7787_v61  ;;  %v5055_v4 = vld [vmem:[%s7508_s0 + $0xb4] sm:$0xff] }
 0x366   :  { %v3551_v31 = vpop.f32.mrf.mxu3 }
 0x367   :  { %v4169_v63 = vsel %vm4161_vm8, %v4101_v9, 0.0  ;;  %v3704_v26 = vadd.f32 %v3551_v31, %v3406_v59  ;;  %v3263_v39 = vpop.f32.mrf.mxu2 }
 0x368   :  { %v4170_v30 = vadd.f32 %v4169_v63, %v4168_v50  ;;  %v3822_v13 = vpop.f32.mrf.mxu0 }
 0x369   :  { %v3970_v3 = vadd.f32 %v3817_v62, %v3704_v26  ;;  %v7790_v26 = vld [vmem:[#allocation71_spill] sm:$0xff] }
 0x36a   :  { %v3009_v38 = vpop.f32.mrf.mxu1 }
 0x36b   :  { %v4038_v48 = vadd.f32 %v6994_v0, %v3970_v3  ;;  %4853 = vmatmul.msk.bf16.gmra.mxu3 %vm1006_vm3, %v7788_v58  ;;  %v3156_v52 = vadd.f32 %v3009_v38, %v7789_v40 }
 0x36c   :  { %4822 = vmatmul.msk.bf16.gmra.mxu2 %vm1006_vm3, %v5055_v4  ;;  %v7791_v4 = vld [vmem:[#allocation19_spill] sm:$0xff] }
 0x36d   :  { %v4102_v42 = vmax.f32 %v4038_v48, 0.0  ;;  %v3410_v23 = vadd.f32 %v3263_v39, %v3156_v52 }
 0x36e   :  { %v3554_v59 = vpop.f32.mrf.mxu3 }
 0x36f   :  { %v4171_v62 = vsel %vm4161_vm8, %v4102_v42, 0.0  ;;  %v3705_v50 = vadd.f32 %v3554_v59, %v3407_v16  ;;  %v3266_v6 = vpop.f32.mrf.mxu2  ;;  %v5056_v59 = vld [vmem:[%s7508_s0 + $0xc0] sm:$0xff] }
 0x370   :  { %v4172_v14 = vadd.f32 %v4171_v62, %v4170_v30  ;;  %v3825_v61 = vpop.f32.mrf.mxu0 }
 0x371   :  { %v3971_v34 = vadd.f32 %v3820_v22, %v3705_v50 }
 0x372   :  { %v3012_v31 = vpop.f32.mrf.mxu1 }
 0x373   :  { %v4039_v9 = vadd.f32 %v6994_v0, %v3971_v34  ;;  %v3157_v63 = vadd.f32 %v3012_v31, %v6319_v37  ;;  %4889 = vmatmul.msk.bf16.gmra.mxu0 %vm1006_vm3, %v7790_v26 }
 0x375   :  { %v4103_v3 = vmax.f32 %v4039_v9, 0.0  ;;  %v3411_v48 = vadd.f32 %v3266_v6, %v3157_v63  ;;  %4781 = vmatmul.msk.bf16.gmra.mxu1 %vm1006_vm3, %v7790_v26 }
 0x376   :  { %v3556_v58 = vpop.f32.mrf.mxu3 }
 0x377   :  { %v4173_v16 = vsel %vm4161_vm8, %v4103_v3, 0.0  ;;  %v3706_v39 = vadd.f32 %v3556_v58, %v3408_v32  ;;  %v3268_v30 = vpop.f32.mrf.mxu2 }
 0x378   :  { %v4174_v22 = vadd.f32 %v4173_v16, %v4172_v14  ;;  %v3827_v40 = vpop.f32.mrf.mxu0  ;;  %v7792_v16 = vld [vmem:[#allocation73_spill] sm:$0xff] }
 0x379   :  { %v3972_v38 = vadd.f32 %v3822_v13, %v3706_v39 }
 0x37a   :  { %v3014_v37 = vpop.f32.mrf.mxu1 }
 0x37b   :  { %v4040_v52 = vadd.f32 %v6994_v0, %v3972_v38  ;;  %4854 = vmatmul.msk.bf16.gmra.mxu3 %vm1006_vm3, %v7791_v4  ;;  %v3158_v42 = vadd.f32 %v3014_v37, %v6336_v1  ;;  %v5057_v1 = vld [vmem:[%s7508_s0 + $0xc4] sm:$0xf] }
 0x37c   :  { %4823 = vmatmul.msk.bf16.gmra.mxu2 %vm1006_vm3, %v5056_v59  ;;  %v2949_v63 = vrot.slane %v5057_v1, 5 }
 0x37d   :  { %v4104_v62 = vmax.f32 %v4040_v52, 0.0  ;;  %v7059_v50 = vadd.f32 %v3268_v30, %v3158_v42 }
 0x37e   :  { %v3559_v32 = vpop.f32.mrf.mxu3  ;;  %v2951_v30 = vrot.slane %v2949_v63, 4 }
 0x37f   :  { %v4175_v13 = vsel %vm4161_vm8, %v4104_v62, 0.0  ;;  %v3707_v6 = vadd.f32 %v3559_v32, %v3409_v45  ;;  %v3271_v14 = vpop.f32.mrf.mxu2  ;;  %v5058_v45 = vld [vmem:[%s7508_s0 + $0xc0] sm:$0xf]  ;;  %v4931_v62 = vld [vmem:[%s7508_s0 + $0xcc] sm:$0xff] }
 0x380   :  { %v4176_v34 = vadd.f32 %v4175_v13, %v4174_v22  ;;  %v3830_v31 = vpop.f32.mrf.mxu0  ;;  %v5059_v22 = vld [vmem:[%s7508_s0 + $0xc8] sm:$0x1] }
 0x381   :  { %v3973_v9 = vadd.f32 %v3825_v61, %v3707_v6  ;;  %v4765_v61 = vrot.slane %v5058_v45, 9  ;;  %v2952_v38 = vrot.slane %v5059_v22, 5 }
 0x382   :  { %v3017_v3 = vpop.f32.mrf.mxu1 }
 0x383   :  { %v4041_v26 = vadd.f32 %v6994_v0, %v3973_v9  ;;  %v3159_v58 = vadd.f32 %v3017_v3, %v6354_v21  ;;  %4890 = vmatmul.msk.bf16.gmra.mxu0 %vm1006_vm3, %v7792_v16  ;;  %v2950_v6 = vsel %vm5739_vm7, %v4765_v61, %v2949_v63  ;;  %v80_v3 = vld [vmem:[%s7508_s0 + $0xd0] sm:$0xf] }
 0x384   :  { %v2963_v1 = vunpack.c.l.b16 %v2950_v6 }
 0x385   :  { %v4105_v39 = vmax.f32 %v4041_v26, 0.0  ;;  %v7075_v4 = vadd.f32 %v3271_v14, %v3159_v58  ;;  %4782 = vmatmul.msk.bf16.gmra.mxu1 %vm1006_vm3, %v7792_v16  ;;  %v2953_v14 = vsel %vm5739_vm7, %v2951_v30, %v2952_v38  ;;  %v3475_v38 = vshll.u32 %v80_v3, 16 }
 0x386   :  { %v3561_v52 = vpop.f32.mrf.mxu3  ;;  %v2964_v26 = vunpack.c.l.b16 %v2953_v14 }
 0x387   :  { %v4177_v21 = vsel %vm4161_vm8, %v4105_v39, 0.0  ;;  %v3708_v37 = vadd.f32 %v3561_v52, %v3410_v23  ;;  %v3273_v42 = vpop.f32.mrf.mxu2  ;;  %v3479_v52 = vshrl.u32 %v80_v3, 16 }
 0x388   :  { %v4178_v59 = vadd.f32 %v4177_v21, %v4176_v34  ;;  %v3832_v13 = vpop.f32.mrf.mxu0  ;;  %v2967_v22 = vpack.c.b16 %v2964_v26, %v2963_v1 }
 0x389   :  { %v3974_v32 = vadd.f32 %v3827_v40, %v3708_v37  ;;  %v79_v40 = vld [vmem:[%s7508_s0 + $0xcc] sm:$0xf] }
 0x38a   :  { %v3019_v23 = vpop.f32.mrf.mxu1  ;;  %v3466_v45 = vshrl.u32 %v79_v40, 16  ;;  %v3469_v61 = vshll.u32 %v79_v40, 16  ;;  %v4874_v1 = vrot.slane %v79_v40, 9 }
 0x38b   :  { %v4042_v9 = vadd.f32 %v6994_v0, %v3974_v32  ;;  %4855 = vmatmul.msk.bf16.gmra.mxu3 %vm1006_vm3, %v5643_v60  ;;  %v3160_v34 = vadd.f32 %v3019_v23, %v6371_v19  ;;  %v3481_v23 = vrot.slane %v3479_v52, 4 }
 0x38c   :  { %4824 = vmatmul.msk.bf16.gmra.mxu2 %vm1006_vm3, %v4931_v62  ;;  %v3767_v62 = vrot.slane %v80_v3, 5  ;;  %v3468_v14 = vrot.slane %v3466_v45, 4 }
 0x38d   :  { %v4106_v63 = vmax.f32 %v4042_v9, 0.0  ;;  %v7098_v16 = vadd.f32 %v3273_v42, %v3160_v34  ;;  %v3471_v9 = vrot.slane %v3469_v61, 5 }
 0x38e   :  { %v3564_v58 = vpop.f32.mrf.mxu3  ;;  %v3768_v40 = vsel %vm5739_vm7, %v4874_v1, %v3767_v62 }
 0x38f   :  { %v4179_v60 = vsel %vm4161_vm8, %v4106_v63, 0.0  ;;  %v3709_v39 = vadd.f32 %v3564_v58, %v3411_v48  ;;  %v3276_v19 = vpop.f32.mrf.mxu2  ;;  %v81_v48 = vld [vmem:[%s7508_s0 + $0xd4] sm:$0x1] }
 0x390   :  { %v4180_v30 = vadd.f32 %v4179_v60, %v4178_v59  ;;  %v3835_v37 = vpop.f32.mrf.mxu0  ;;  %v3477_v59 = vrot.slane %v3475_v38, 5  ;;  %v3770_v26 = vrot.slane %v81_v48, 5  ;;  %v3485_v45 = vshll.u32 %v81_v48, 16 }
 0x391   :  { %v3975_v21 = vadd.f32 %v3830_v31, %v3709_v39  ;;  %v3769_v31 = vrot.slane %v3767_v62, 4  ;;  %v3472_v39 = vor.u32 %v3471_v9, %v3468_v14  ;;  %v3781_v62 = vunpack.c.l.b16 %v3768_v40 }
 0x392   :  { %v3022_v6 = vpop.f32.mrf.mxu1 }
 0x393   :  { %v4043_v32 = vadd.f32 %v6994_v0, %v3975_v21  ;;  %v3161_v42 = vadd.f32 %v3022_v6, %v6387_v11  ;;  %4891 = vmatmul.msk.bf16.gmra.mxu0 %vm1006_vm3, %v2967_v22  ;;  %v3482_v21 = vor.u32 %v3481_v23, %v3477_v59  ;;  %v3487_v6 = vrot.slane %v3485_v45, 5 }
 0x395   :  { %v4107_v34 = vmax.f32 %v4043_v32, 0.0  ;;  %v7107_v3 = vadd.f32 %v3276_v19, %v3161_v42  ;;  %4783 = vmatmul.msk.bf16.gmra.mxu1 %vm1006_vm3, %v2967_v22  ;;  %v3771_v19 = vsel %vm5739_vm7, %v3769_v31, %v3770_v26 }
 0x396   :  { %v3566_v63 = vpop.f32.mrf.mxu3  ;;  %v3782_v9 = vunpack.c.l.b16 %v3771_v19 }
 0x397   :  { %v4181_v58 = vsel %vm4161_vm8, %v4107_v34, 0.0  ;;  %v3710_v11 = vadd.f32 %v3566_v63, %v7059_v50  ;;  %v3278_v60 = vpop.f32.mrf.mxu2  ;;  %v3473_v50 = vrot.slane %v3472_v39, 4 }
 0x398   :  { %v4182_v61 = vadd.f32 %v4181_v58, %v4180_v30  ;;  %v3837_v52 = vpop.f32.mrf.mxu0  ;;  %v3483_v30 = vrot.slane %v3482_v21, 4  ;;  %v3785_v63 = vpack.c.b16 %v3782_v9, %v3781_v62 }
 0x399   :  { %v3976_v38 = vadd.f32 %v3832_v13, %v3710_v11  ;;  %v5060_v13 = vld [vmem:[%s7508_s0 + $0xf0] sm:$0xff] }
 0x39a   :  { %v3024_v22 = vpop.f32.mrf.mxu1  ;;  %v3488_v26 = vsel %vm5175_vm4, %v3483_v30, %v3487_v6 }
 0x39b   :  { %v4044_v32 = vadd.f32 %v6994_v0, %v3976_v38  ;;  %4856 = vmatmul.msk.bf16.gmra.mxu3 %vm1006_vm3, %v6348_v55  ;;  %v3162_v14 = vadd.f32 %v3024_v22, %v6401_v54  ;;  %v3478_v54 = vsel %vm5175_vm4, %v3473_v50, %v3477_v59 }
 0x39c   :  { %4825 = vmatmul.msk.bf16.gmra.mxu2 %vm1006_vm3, %v5060_v13  ;;  %v3515_v21 = vunpack.c.l.b16 %v3478_v54 }
 0x39d   :  { %v4108_v42 = vmax.f32 %v4044_v32, 0.0  ;;  %v3416_v23 = vadd.f32 %v3278_v60, %v3162_v14  ;;  %v3516_v60 = vunpack.c.l.b16 %v3488_v26 }
 0x39e   :  { %v3569_v48 = vpop.f32.mrf.mxu3 }
 0x39f   :  { %v4183_v34 = vsel %vm4161_vm8, %v4108_v42, 0.0  ;;  %v3711_v55 = vadd.f32 %v3569_v48, %v7075_v4  ;;  %v3281_v1 = vpop.f32.mrf.mxu2  ;;  %v3519_v19 = vpack.c.b16 %v3516_v60, %v3515_v21 }
 0x3a0   :  { %v4184_v31 = vadd.f32 %v4183_v34, %v4182_v61  ;;  %v3840_v11 = vpop.f32.mrf.mxu0 }
 0x3a1   :  { %v3977_v58 = vadd.f32 %v3835_v37, %v3711_v55 }
 0x3a2   :  { %v3027_v45 = vpop.f32.mrf.mxu1 }
 0x3a3   :  { %v4045_v39 = vadd.f32 %v6994_v0, %v3977_v58  ;;  %v3163_v38 = vadd.f32 %v3027_v45, %v6417_v36  ;;  %4892 = vmatmul.msk.bf16.gmra.mxu0 %vm1006_vm3, %v3785_v63 }
 0x3a5   :  { %v4109_v4 = vmax.f32 %v4045_v39, 0.0  ;;  %v3417_v40 = vadd.f32 %v3281_v1, %v3163_v38  ;;  %4784 = vmatmul.msk.bf16.gmra.mxu1 %vm1006_vm3, %v6366_v44  ;;  %v5061_v44 = vld [vmem:[%s7508_s0 + $0xfc] sm:$0xff] }
 0x3a6   :  { %v3571_v61 = vpop.f32.mrf.mxu3 }
 0x3a7   :  { %v4185_v59 = vsel %vm4161_vm8, %v4109_v4, 0.0  ;;  %v3712_v37 = vadd.f32 %v3571_v61, %v7098_v16  ;;  %v3283_v32 = vpop.f32.mrf.mxu2  ;;  %v5062_v4 = vld [vmem:[%s7508_s0 + $0x108] sm:$0xff] }
 0x3a8   :  { %v4186_v22 = vadd.f32 %v4185_v59, %v4184_v31  ;;  %v3842_v6 = vpop.f32.mrf.mxu0 }
 0x3a9   :  { %v3978_v50 = vadd.f32 %v3837_v52, %v3712_v37 }
 0x3aa   :  { %v3029_v36 = vpop.f32.mrf.mxu1 }
 0x3ab   :  { %v4046_v14 = vadd.f32 %v6994_v0, %v3978_v50  ;;  %4857 = vmatmul.msk.bf16.gmra.mxu3 %vm1006_vm3, %v3519_v19  ;;  %v3164_v13 = vadd.f32 %v3029_v36, %v6431_v17 }
 0x3ac   :  { %4826 = vmatmul.msk.bf16.gmra.mxu2 %vm1006_vm3, %v5061_v44 }
 0x3ad   :  { %v4110_v30 = vmax.f32 %v4046_v14, 0.0  ;;  %v3418_v62 = vadd.f32 %v3283_v32, %v3164_v13 }
 0x3ae   :  { %v3574_v16 = vpop.f32.mrf.mxu3 }
 0x3af   :  { %v4187_v9 = vsel %vm4161_vm8, %v4110_v30, 0.0  ;;  %v3713_v52 = vadd.f32 %v3574_v16, %v7107_v3  ;;  %v3286_v42 = vpop.f32.mrf.mxu2 }
 0x3b0   :  { %v4188_v48 = vadd.f32 %v4187_v9, %v4186_v22  ;;  %v3845_v55 = vpop.f32.mrf.mxu0 }
 0x3b1   :  { %v3979_v34 = vadd.f32 %v3840_v11, %v3713_v52 }
 0x3b2   :  { %v3032_v17 = vpop.f32.mrf.mxu1 }
 0x3b3   :  { %v4047_v1 = vadd.f32 %v6994_v0, %v3979_v34  ;;  %v3165_v31 = vadd.f32 %v3032_v17, %v6447_v2  ;;  %4893 = vmatmul.msk.bf16.gmra.mxu0 %vm1006_vm3, %v6396_v47  ;;  %v5063_v34 = vld [vmem:[%s7508_s0 + $0x114] sm:$0xff] }
 0x3b5   :  { %v4111_v54 = vmax.f32 %v4047_v1, 0.0  ;;  %v3419_v63 = vadd.f32 %v3286_v42, %v3165_v31  ;;  %4785 = vmatmul.msk.bf16.gmra.mxu1 %vm1006_vm3, %v6396_v47 }
 0x3b6   :  { %v3576_v26 = vpop.f32.mrf.mxu3 }
 0x3b7   :  { %v4189_v3 = vsel %vm4161_vm8, %v4111_v54, 0.0  ;;  %v3714_v58 = vadd.f32 %v3576_v26, %v3416_v23  ;;  %v3288_v39 = vpop.f32.mrf.mxu2 }
 0x3b8   :  { %v4190_v11 = vadd.f32 %v4189_v3, %v4188_v48  ;;  %v3847_v21 = vpop.f32.mrf.mxu0 }
 0x3b9   :  { %v3980_v45 = vadd.f32 %v3842_v6, %v3714_v58 }
 0x3ba   :  { %v3034_v2 = vpop.f32.mrf.mxu1 }
 0x3bb   :  { %v4048_v60 = vadd.f32 %v6994_v0, %v3980_v45  ;;  %4858 = vmatmul.msk.bf16.gmra.mxu3 %vm1006_vm3, %v7682_v27  ;;  %v3166_v38 = vadd.f32 %v3034_v2, %v6461_v41 }
 0x3bc   :  { %4827 = vmatmul.msk.bf16.gmra.mxu2 %vm1006_vm3, %v5062_v4 }
 0x3bd   :  { %v4112_v47 = vmax.f32 %v4048_v60, 0.0  ;;  %v3420_v61 = vadd.f32 %v3288_v39, %v3166_v38  ;;  %v7793_v39 = vld [vmem:[#allocation10_spill] sm:$0xff] }
 0x3be   :  { %v3579_v23 = vpop.f32.mrf.mxu3 }
 0x3bf   :  { %v4191_v59 = vsel %vm4161_vm8, %v4112_v47, 0.0  ;;  %v3715_v37 = vadd.f32 %v3579_v23, %v3417_v40  ;;  %v3291_v19 = vpop.f32.mrf.mxu2 }
 0x3c0   :  { %v4192_v32 = vadd.f32 %v4191_v59, %v4190_v11  ;;  %v3850_v50 = vpop.f32.mrf.mxu0  ;;  %v7794_v59 = vld [vmem:[#allocation17_spill] sm:$0xff] }
 0x3c1   :  { %v3981_v22 = vadd.f32 %v3845_v55, %v3715_v37 }
 0x3c2   :  { %v3037_v6 = vpop.f32.mrf.mxu1 }
 0x3c3   :  { %v4049_v27 = vadd.f32 %v6994_v0, %v3981_v22  ;;  %v3167_v41 = vadd.f32 %v3037_v6, %v6477_v20  ;;  %4894 = vmatmul.msk.bf16.gmra.mxu0 %vm1006_vm3, %v6426_v28 }
 0x3c5   :  { %v4113_v14 = vmax.f32 %v4049_v27, 0.0  ;;  %v3421_v13 = vadd.f32 %v3291_v19, %v3167_v41  ;;  %4786 = vmatmul.msk.bf16.gmra.mxu1 %vm1006_vm3, %v6426_v28  ;;  %v5064_v19 = vld [vmem:[%s7508_s0 + $0x120] sm:$0xff] }
 0x3c6   :  { %v3581_v36 = vpop.f32.mrf.mxu3 }
 0x3c7   :  { %v4193_v40 = vsel %vm4161_vm8, %v4113_v14, 0.0  ;;  %v3716_v44 = vadd.f32 %v3581_v36, %v3418_v62  ;;  %v3293_v30 = vpop.f32.mrf.mxu2 }
 0x3c8   :  { %v4194_v16 = vadd.f32 %v4193_v40, %v4192_v32  ;;  %v3852_v52 = vpop.f32.mrf.mxu0 }
 0x3c9   :  { %v3982_v9 = vadd.f32 %v3847_v21, %v3716_v44 }
 0x3ca   :  { %v3039_v20 = vpop.f32.mrf.mxu1 }
 0x3cb   :  { %v4050_v42 = vadd.f32 %v6994_v0, %v3982_v9  ;;  %4859 = vmatmul.msk.bf16.gmra.mxu3 %vm1006_vm3, %v7683_v10  ;;  %v3168_v48 = vadd.f32 %v3039_v20, %v6491_v35 }
 0x3cc   :  { %4828 = vmatmul.msk.bf16.gmra.mxu2 %vm1006_vm3, %v5063_v34 }
 0x3cd   :  { %v4114_v28 = vmax.f32 %v4050_v42, 0.0  ;;  %v3422_v55 = vadd.f32 %v3293_v30, %v3168_v48  ;;  %v7795_v30 = vld [vmem:[#allocation13_spill] sm:$0xff] }
 0x3ce   :  { %v3584_v62 = vpop.f32.mrf.mxu3 }
 0x3cf   :  { %v4195_v1 = vsel %vm4161_vm8, %v4114_v28, 0.0  ;;  %v3717_v17 = vadd.f32 %v3584_v62, %v3419_v63  ;;  %v3296_v31 = vpop.f32.mrf.mxu2 }
 0x3d0   :  { %v4196_v54 = vadd.f32 %v4195_v1, %v4194_v16  ;;  %v3855_v3 = vpop.f32.mrf.mxu0  ;;  %v7796_v1 = vld [vmem:[#allocation21_spill] sm:$0xff] }
 0x3d1   :  { %v3983_v26 = vadd.f32 %v3850_v50, %v3717_v17 }
 0x3d2   :  { %v3042_v58 = vpop.f32.mrf.mxu1 }
 0x3d3   :  { %v4051_v10 = vadd.f32 %v6994_v0, %v3983_v26  ;;  %v3169_v35 = vadd.f32 %v3042_v58, %v6507_v25  ;;  %4895 = vmatmul.msk.bf16.gmra.mxu0 %vm1006_vm3, %v7793_v39 }
 0x3d5   :  { %v4115_v11 = vmax.f32 %v4051_v10, 0.0  ;;  %v3423_v21 = vadd.f32 %v3296_v31, %v3169_v35  ;;  %4787 = vmatmul.msk.bf16.gmra.mxu1 %vm1006_vm3, %v7793_v39  ;;  %v5065_v31 = vld [vmem:[%s7508_s0 + $0x12c] sm:$0xff] }
 0x3d6   :  { %v3586_v45 = vpop.f32.mrf.mxu3 }
 0x3d7   :  { %v4197_v63 = vsel %vm4161_vm8, %v4115_v11, 0.0  ;;  %v3718_v60 = vadd.f32 %v3586_v45, %v3420_v61  ;;  %v3298_v2 = vpop.f32.mrf.mxu2 }
 0x3d8   :  { %v4198_v38 = vadd.f32 %v4197_v63, %v4196_v54  ;;  %v3857_v47 = vpop.f32.mrf.mxu0 }
 0x3d9   :  { %v3984_v4 = vadd.f32 %v3852_v52, %v3718_v60  ;;  %v7797_v60 = vld [vmem:[#allocation75_spill] sm:$0xff] }
 0x3da   :  { %v3044_v25 = vpop.f32.mrf.mxu1 }
 0x3db   :  { %v4052_v23 = vadd.f32 %v6994_v0, %v3984_v4  ;;  %4860 = vmatmul.msk.bf16.gmra.mxu3 %vm1006_vm3, %v7794_v59  ;;  %v3170_v37 = vadd.f32 %v3044_v25, %v6521_v56 }
 0x3dc   :  { %4829 = vmatmul.msk.bf16.gmra.mxu2 %vm1006_vm3, %v5064_v19 }
 0x3dd   :  { %v4116_v32 = vmax.f32 %v4052_v23, 0.0  ;;  %v3424_v22 = vadd.f32 %v3298_v2, %v3170_v37 }
 0x3de   :  { %v3589_v61 = vpop.f32.mrf.mxu3 }
 0x3df   :  { %v4199_v50 = vsel %vm4161_vm8, %v4116_v32, 0.0  ;;  %v3719_v27 = vadd.f32 %v3589_v61, %v3421_v13  ;;  %v3301_v6 = vpop.f32.mrf.mxu2  ;;  %v7798_v32 = vld [vmem:[#allocation24_spill] sm:$0xff]  ;;  %v7799_v61 = vld [vmem:[#allocation78_spill] sm:$0xff] }
 0x3e0   :  { %v4200_v41 = vadd.f32 %v4199_v50, %v4198_v38  ;;  %v3860_v36 = vpop.f32.mrf.mxu0 }
 0x3e1   :  { %v3985_v14 = vadd.f32 %v3855_v3, %v3719_v27  ;;  %v5066_v27 = vld [vmem:[%s7508_s0 + $0x138] sm:$0xff] }
 0x3e2   :  { %v3047_v44 = vpop.f32.mrf.mxu1 }
 0x3e3   :  { %v4053_v40 = vadd.f32 %v6994_v0, %v3985_v14  ;;  %v3171_v56 = vadd.f32 %v3047_v44, %v6537_v43  ;;  %4896 = vmatmul.msk.bf16.gmra.mxu0 %vm1006_vm3, %v7795_v30 }
 0x3e5   :  { %v4117_v16 = vmax.f32 %v4053_v40, 0.0  ;;  %v3425_v52 = vadd.f32 %v3301_v6, %v3171_v56  ;;  %4788 = vmatmul.msk.bf16.gmra.mxu1 %vm1006_vm3, %v7795_v30 }
 0x3e6   :  { %v3591_v9 = vpop.f32.mrf.mxu3 }
 0x3e7   :  { %v4201_v13 = vsel %vm4161_vm8, %v4117_v16, 0.0  ;;  %v3720_v42 = vadd.f32 %v3591_v9, %v3422_v55  ;;  %v3303_v20 = vpop.f32.mrf.mxu2 }
 0x3e8   :  { %v4202_v48 = vadd.f32 %v4201_v13, %v4200_v41  ;;  %v3862_v28 = vpop.f32.mrf.mxu0  ;;  %v7800_v13 = vld [vmem:[#allocation79_spill] sm:$0xff] }
 0x3e9   :  { %v3986_v34 = vadd.f32 %v3857_v47, %v3720_v42 }
 0x3ea   :  { %v3049_v43 = vpop.f32.mrf.mxu1 }
 0x3eb   :  { %v4054_v62 = vadd.f32 %v6994_v0, %v3986_v34  ;;  %4861 = vmatmul.msk.bf16.gmra.mxu3 %vm1006_vm3, %v7796_v1  ;;  %v3172_v17 = vadd.f32 %v3049_v43, %v6551_v51 }
 0x3ec   :  { %4830 = vmatmul.msk.bf16.gmra.mxu2 %vm1006_vm3, %v5065_v31 }
 0x3ed   :  { %v4118_v54 = vmax.f32 %v4054_v62, 0.0  ;;  %v3426_v26 = vadd.f32 %v3303_v20, %v3172_v17  ;;  %v7801_v20 = vld [vmem:[#allocation76_spill] sm:$0xff] }
 0x3ee   :  { %v3594_v55 = vpop.f32.mrf.mxu3 }
 0x3ef   :  { %v4203_v3 = vsel %vm4161_vm8, %v4118_v54, 0.0  ;;  %v3721_v10 = vadd.f32 %v3594_v55, %v3423_v21  ;;  %v3306_v58 = vpop.f32.mrf.mxu2  ;;  %v7802_v55 = vld [vmem:[#allocation6_spill] sm:$0xff] }
 0x3f0   :  { %v4204_v35 = vadd.f32 %v4203_v3, %v4202_v48  ;;  %v3865_v11 = vpop.f32.mrf.mxu0 }
 0x3f1   :  { %v3987_v39 = vadd.f32 %v3860_v36, %v3721_v10  ;;  %v7803_v10 = vld [vmem:[#allocation81_spill] sm:$0xff] }
 0x3f2   :  { %v3052_v63 = vpop.f32.mrf.mxu1 }
 0x3f3   :  { %v4055_v45 = vadd.f32 %v6994_v0, %v3987_v39  ;;  %v3173_v51 = vadd.f32 %v3052_v63, %v6567_v8  ;;  %4897 = vmatmul.msk.bf16.gmra.mxu0 %vm1006_vm3, %v7797_v60 }
 0x3f5   :  { %v4119_v2 = vmax.f32 %v4055_v45, 0.0  ;;  %v3427_v4 = vadd.f32 %v3306_v58, %v3173_v51  ;;  %4789 = vmatmul.msk.bf16.gmra.mxu1 %vm1006_vm3, %v7797_v60 }
 0x3f6   :  { %v3596_v38 = vpop.f32.mrf.mxu3 }
 0x3f7   :  { %v4205_v21 = vsel %vm4161_vm8, %v4119_v2, 0.0  ;;  %v3722_v47 = vadd.f32 %v3596_v38, %v3424_v22  ;;  %v3308_v23 = vpop.f32.mrf.mxu2 }
 0x3f8   :  { %v4206_v59 = vadd.f32 %v4205_v21, %v4204_v35  ;;  %v3867_v37 = vpop.f32.mrf.mxu0  ;;  %v5067_v35 = vld [vmem:[%s7508_s0 + $0x144] sm:$0xff] }
 0x3f9   :  { %v3988_v25 = vadd.f32 %v3862_v28, %v3722_v47 }
 0x3fa   :  { %v3054_v8 = vpop.f32.mrf.mxu1 }
 0x3fb   :  { %v4056_v19 = vadd.f32 %v6994_v0, %v3988_v25  ;;  %4862 = vmatmul.msk.bf16.gmra.mxu3 %vm1006_vm3, %v7798_v32  ;;  %v3174_v50 = vadd.f32 %v3054_v8, %v7799_v61  ;;  %v7805_v25 = vld [vmem:[#allocation77_spill] sm:$0xff] }
 0x3fc   :  { %4831 = vmatmul.msk.bf16.gmra.mxu2 %vm1006_vm3, %v5066_v27 }
 0x3fd   :  { %v4120_v6 = vmax.f32 %v4056_v19, 0.0  ;;  %v3428_v41 = vadd.f32 %v3308_v23, %v3174_v50  ;;  %v7804_v23 = vld [vmem:[#allocation82_spill] sm:$0xff] }
 0x3fe   :  { %v3599_v22 = vpop.f32.mrf.mxu3 }
 0x3ff   :  { %v4207_v14 = vsel %vm4161_vm8, %v4120_v6, 0.0  ;;  %v3723_v36 = vadd.f32 %v3599_v22, %v3425_v52  ;;  %v3311_v40 = vpop.f32.mrf.mxu2 }
 0x400   :  { %v4208_v44 = vadd.f32 %v4207_v14, %v4206_v59  ;;  %v3870_v30 = vpop.f32.mrf.mxu0  ;;  %v7806_v14 = vld [vmem:[#allocation7_spill] sm:$0xff] }
 0x401   :  { %v3989_v56 = vadd.f32 %v3865_v11, %v3723_v36 }
 0x402   :  { %v3057_v9 = vpop.f32.mrf.mxu1 }
 0x403   :  { %v4057_v16 = vadd.f32 %v6994_v0, %v3989_v56  ;;  %v3175_v42 = vadd.f32 %v3057_v9, %v7800_v13  ;;  %4898 = vmatmul.msk.bf16.gmra.mxu0 %vm1006_vm3, %v7801_v20  ;;  %v5068_v56 = vld [vmem:[%s7508_s0 + $0x150] sm:$0xff] }
 0x405   :  { %v4121_v48 = vmax.f32 %v4057_v16, 0.0  ;;  %v3429_v28 = vadd.f32 %v3311_v40, %v3175_v42  ;;  %4790 = vmatmul.msk.bf16.gmra.mxu1 %vm1006_vm3, %v7801_v20  ;;  %v7807_v40 = vld [vmem:[#allocation84_spill] sm:$0xff] }
 0x406   :  { %v3601_v34 = vpop.f32.mrf.mxu3 }
 0x407   :  { %v4209_v52 = vsel %vm4161_vm8, %v4121_v48, 0.0  ;;  %v3724_v62 = vadd.f32 %v3601_v34, %v3426_v26  ;;  %v3313_v1 = vpop.f32.mrf.mxu2 }
 0x408   :  { %v4210_v43 = vadd.f32 %v4209_v52, %v4208_v44  ;;  %v3872_v31 = vpop.f32.mrf.mxu0 }
 0x409   :  { %v3990_v17 = vadd.f32 %v3867_v37, %v3724_v62 }
 0x40a   :  { %v3059_v3 = vpop.f32.mrf.mxu1 }
 0x40b   :  { %v4058_v54 = vadd.f32 %v6994_v0, %v3990_v17  ;;  %4863 = vmatmul.msk.bf16.gmra.mxu3 %vm1006_vm3, %v7802_v55  ;;  %v3176_v58 = vadd.f32 %v3059_v3, %v7803_v10  ;;  %v7809_v17 = vld [vmem:[#allocation80_spill] sm:$0xff] }
 0x40c   :  { %4832 = vmatmul.msk.bf16.gmra.mxu2 %vm1006_vm3, %v5067_v35 }
 0x40d   :  { %v4122_v39 = vmax.f32 %v4058_v54, 0.0  ;;  %v3430_v11 = vadd.f32 %v3313_v1, %v3176_v58  ;;  %v7808_v1 = vld [vmem:[#allocation34_spill] sm:$0xff] }
 0x40e   :  { %v3604_v26 = vpop.f32.mrf.mxu3 }
 0x40f   :  { %v4211_v45 = vsel %vm4161_vm8, %v4122_v39, 0.0  ;;  %v3725_v63 = vadd.f32 %v3604_v26, %v3427_v4  ;;  %v3316_v51 = vpop.f32.mrf.mxu2 }
 0x410   :  { %v4212_v60 = vadd.f32 %v4211_v45, %v4210_v43  ;;  %v3875_v38 = vpop.f32.mrf.mxu0  ;;  %v7810_v45 = vld [vmem:[#allocation9_spill] sm:$0xff] }
 0x411   :  { %v3991_v2 = vadd.f32 %v3870_v30, %v3725_v63 }
 0x412   :  { %v3062_v47 = vpop.f32.mrf.mxu1 }
 0x413   :  { %v4059_v21 = vadd.f32 %v6994_v0, %v3991_v2  ;;  %v3177_v59 = vadd.f32 %v3062_v47, %v7804_v23  ;;  %4899 = vmatmul.msk.bf16.gmra.mxu0 %vm1006_vm3, %v7805_v25  ;;  %v5069_v2 = vld [vmem:[%s7508_s0 + $0x15c] sm:$0xff] }
 0x415   :  { %v4123_v37 = vmax.f32 %v4059_v21, 0.0  ;;  %v3431_v32 = vadd.f32 %v3316_v51, %v3177_v59  ;;  %4791 = vmatmul.msk.bf16.gmra.mxu1 %vm1006_vm3, %v7805_v25  ;;  %v7811_v51 = vld [vmem:[#allocation85_spill] sm:$0xff] }
 0x416   :  { %v3606_v19 = vpop.f32.mrf.mxu3 }
 0x417   :  { %v4213_v4 = vsel %vm4161_vm8, %v4123_v37, 0.0  ;;  %v3726_v8 = vadd.f32 %v3606_v19, %v3428_v41  ;;  %v3318_v61 = vpop.f32.mrf.mxu2 }
 0x418   :  { %v4214_v50 = vadd.f32 %v4213_v4, %v4212_v60  ;;  %v3877_v6 = vpop.f32.mrf.mxu0 }
 0x419   :  { %v3992_v27 = vadd.f32 %v3872_v31, %v3726_v8 }
 0x41a   :  { %v3064_v36 = vpop.f32.mrf.mxu1 }
 0x41b   :  { %v4060_v22 = vadd.f32 %v6994_v0, %v3992_v27  ;;  %4864 = vmatmul.msk.bf16.gmra.mxu3 %vm1006_vm3, %v7806_v14  ;;  %v3178_v44 = vadd.f32 %v3064_v36, %v7807_v40  ;;  %v7813_v27 = vld [vmem:[#allocation83_spill] sm:$0xff] }
 0x41c   :  { %4833 = vmatmul.msk.bf16.gmra.mxu2 %vm1006_vm3, %v5068_v56 }
 0x41d   :  { %v4124_v30 = vmax.f32 %v4060_v22, 0.0  ;;  %v3432_v16 = vadd.f32 %v3318_v61, %v3178_v44  ;;  %v7812_v61 = vld [vmem:[#allocation40_spill] sm:$0xff] }
 0x41e   :  { %v3609_v41 = vpop.f32.mrf.mxu3 }
 0x41f   :  { %v4215_v9 = vsel %vm4161_vm8, %v4124_v30, 0.0  ;;  %v3727_v13 = vadd.f32 %v3609_v41, %v3429_v28  ;;  %v3321_v42 = vpop.f32.mrf.mxu2 }
 0x420   :  { %v4216_v20 = vadd.f32 %v4215_v9, %v4214_v50  ;;  %v3880_v34 = vpop.f32.mrf.mxu0  ;;  %v7814_v9 = vld [vmem:[#allocation12_spill] sm:$0xff] }
 0x421   :  { %v3993_v48 = vadd.f32 %v3875_v38, %v3727_v13 }
 0x422   :  { %v3067_v62 = vpop.f32.mrf.mxu1 }
 0x423   :  { %v4061_v52 = vadd.f32 %v6994_v0, %v3993_v48  ;;  %v3179_v43 = vadd.f32 %v3067_v62, %v7808_v1  ;;  %4900 = vmatmul.msk.bf16.gmra.mxu0 %vm1006_vm3, %v7809_v17  ;;  %v5070_v48 = vld [vmem:[%s7508_s0 + $0x168] sm:$0xff] }
 0x425   :  { %v4125_v31 = vmax.f32 %v4061_v52, 0.0  ;;  %v3433_v55 = vadd.f32 %v3321_v42, %v3179_v43  ;;  %4792 = vmatmul.msk.bf16.gmra.mxu1 %vm1006_vm3, %v7809_v17  ;;  %v7815_v42 = vld [vmem:[#allocation86_spill] sm:$0xff] }
 0x426   :  { %v3611_v54 = vpop.f32.mrf.mxu3 }
 0x427   :  { %v4217_v28 = vsel %vm4161_vm8, %v4125_v31, 0.0  ;;  %v3728_v3 = vadd.f32 %v3611_v54, %v3430_v11  ;;  %v3323_v10 = vpop.f32.mrf.mxu2 }
 0x428   :  { %v4218_v58 = vadd.f32 %v4217_v28, %v4216_v20  ;;  %v3882_v39 = vpop.f32.mrf.mxu0 }
 0x429   :  { %v3994_v35 = vadd.f32 %v3877_v6, %v3728_v3  ;;  %v7816_v3 = vld [vmem:[#allocation45_spill] sm:$0xff] }
 0x42a   :  { %v3069_v63 = vpop.f32.mrf.mxu1 }
 0x42b   :  { %v4062_v26 = vadd.f32 %v6994_v0, %v3994_v35  ;;  %4865 = vmatmul.msk.bf16.gmra.mxu3 %vm1006_vm3, %v7810_v45  ;;  %v3180_v60 = vadd.f32 %v3069_v63, %v7811_v51  ;;  %v4353_v63 = vld [vmem:[%s7513_s5 + $0x18] sm:$0xff] }
 0x42c   :  { %4834 = vmatmul.msk.bf16.gmra.mxu2 %vm1006_vm3, %v5069_v2 }
 0x42d   :  { %v4126_v38 = vmax.f32 %v4062_v26, 0.0  ;;  %v3434_v21 = vadd.f32 %v3323_v10, %v3180_v60  ;;  %4370 = vmatpush.msrb.mxu2 %v4353_v63 }
 0x42e   :  { %v3614_v11 = vpop.f32.mrf.mxu3 }
 0x42f   :  { %v4219_v47 = vsel %vm4161_vm8, %v4126_v38, 0.0  ;;  %v3729_v23 = vadd.f32 %v3614_v11, %v3431_v32  ;;  %v3326_v59 = vpop.f32.mrf.mxu2  ;;  %v7818_v11 = vld [vmem:[#allocation16_spill] sm:$0xff] }
 0x430   :  { %v4220_v25 = vadd.f32 %v4219_v47, %v4218_v58  ;;  %v3885_v19 = vpop.f32.mrf.mxu0  ;;  %v7817_v58 = vld [vmem:[#allocation37_spill] sm:$0xff] }
 0x431   :  { %v3995_v37 = vadd.f32 %v3880_v34, %v3729_v23  ;;  %v7819_v23 = vld [vmem:[#allocation87_spill] sm:$0xff] }
 0x432   :  { %v3072_v8 = vpop.f32.mrf.mxu1 }
 0x433   :  { %v4063_v4 = vadd.f32 %v6994_v0, %v3995_v37  ;;  %v3181_v50 = vadd.f32 %v3072_v8, %v7812_v61  ;;  %4901 = vmatmul.msk.bf16.gmra.mxu0 %vm1006_vm3, %v7813_v27 }
 0x435   :  { %v4127_v6 = vmax.f32 %v4063_v4, 0.0  ;;  %v3435_v14 = vadd.f32 %v3326_v59, %v3181_v50  ;;  %4793 = vmatmul.msk.bf16.gmra.mxu1 %vm1006_vm3, %v7813_v27 }
 0x436   :  { %v3616_v22 = vpop.f32.mrf.mxu3 }
 0x437   :  { %v4221_v32 = vsel %vm4161_vm8, %v4127_v6, 0.0  ;;  %v3730_v36 = vadd.f32 %v3616_v22, %v3432_v16  ;;  %v3328_v40 = vpop.f32.mrf.mxu2  ;;  %v7314_v22 = vld [vmem:[%s7510_s2] ss:$0 sm:$0xff] }
 0x438   :  { %v4222_v44 = vadd.f32 %v4221_v32, %v4220_v25  ;;  %v3887_v30 = vpop.f32.mrf.mxu0 }
 0x439   :  { %v3996_v56 = vadd.f32 %v3882_v39, %v3730_v36 }
 0x43a   :  { %v3074_v13 = vpop.f32.mrf.mxu1 }
 0x43b   :  { %v4064_v41 = vadd.f32 %v6994_v0, %v3996_v56  ;;  %4866 = vmatmul.msk.bf16.gmra.mxu3 %vm1006_vm3, %v7814_v9  ;;  %v3182_v20 = vadd.f32 %v3074_v13, %v7815_v42  ;;  %v7821_v56 = vld [vmem:[#allocation42_spill] sm:$0xff] }
 0x43c   :  { %4835 = vmatmul.msk.bf16.gmra.mxu2 %vm1006_vm3, %v5070_v48 }
 0x43d   :  { %v4128_v34 = vmax.f32 %v4064_v41, 0.0  ;;  %v3436_v52 = vadd.f32 %v3328_v40, %v3182_v20  ;;  %v7820_v40 = vld [vmem:[#allocation50_spill] sm:$0xff] }
 0x43e   :  { %v3619_v16 = vpop.f32.mrf.mxu3 }
 0x43f   :  { %v4223_v62 = vsel %vm4161_vm8, %v4128_v34, 0.0  ;;  %v3731_v1 = vadd.f32 %v3619_v16, %v3433_v55  ;;  %v3331_v43 = vpop.f32.mrf.mxu2 }
 0x440   :  { %v7290_v17 = vadd.f32 %v4223_v62, %v4222_v44  ;;  %v3890_v54 = vpop.f32.mrf.mxu0  ;;  %v7822_v62 = vld [vmem:[#allocation20_spill] sm:$0xff] }
 0x441   :  { %v3997_v31 = vadd.f32 %v3885_v19, %v3731_v1 }
 0x442   :  { %v3077_v28 = vpop.f32.mrf.mxu1 }
 0x443   :  { %v3183_v10 = vadd.f32 %v3077_v28, %v7816_v3  ;;  %4902 = vmatmul.msk.bf16.gmra.mxu0 %vm1006_vm3, %v7817_v58  ;;  %v4065_v26 = vadd.f32 %v6994_v0, %v3997_v31 }
 0x445   :  { %v3437_v39 = vadd.f32 %v3331_v43, %v3183_v10  ;;  %4794 = vmatmul.msk.bf16.gmra.mxu1 %vm1006_vm3, %v7817_v58  ;;  %v4129_v2 = vmax.f32 %v4065_v26, 0.0  ;;  %v7823_v43 = vld [vmem:[#allocation88_spill] sm:$0xff] }
 0x446   :  { %v3621_v35 = vpop.f32.mrf.mxu3 }
 0x447   :  { %v3732_v45 = vadd.f32 %v3621_v35, %v3434_v21  ;;  %v3333_v55 = vpop.f32.mrf.mxu2  ;;  %v5071_v21 = vld [vmem:[%s7508_s0 + $0x174] sm:$0xff]  ;;  %v4231_v4 = vsel %vm4161_vm8, %v4129_v2, 0.0 }
 0x448   :  { %v3892_v60 = vpop.f32.mrf.mxu0 }
 0x449   :  { %v3998_v51 = vadd.f32 %v3887_v30, %v3732_v45 }
 0x44a   :  { %v3079_v47 = vpop.f32.mrf.mxu1 }
 0x44b   :  { %v4066_v38 = vadd.f32 %v6994_v0, %v3998_v51  ;;  %4867 = vmatmul.msk.bf16.gmra.mxu3 %vm1006_vm3, %v7818_v11  ;;  %v3184_v59 = vadd.f32 %v3079_v47, %v7819_v23 }
 0x44c   :  { %4836 = vmatmul.msk.bf16.gmra.mxu2 %vm1006_vm3, %v5071_v21 }
 0x44d   :  { %v4130_v25 = vmax.f32 %v4066_v38, 0.0  ;;  %v3438_v19 = vadd.f32 %v3333_v55, %v3184_v59 }
 0x44e   :  { %v3624_v37 = vpop.f32.mrf.mxu3 }
 0x44f   :  { %v4232_v8 = vsel %vm4161_vm8, %v4130_v25, 0.0  ;;  %v3733_v0 = vadd.f32 %v3624_v37, %v3435_v14  ;;  %v3336_v61 = vpop.f32.mrf.mxu2  ;;  %v7825_v37 = vld [vmem:[#allocation23_spill] sm:$0xff] }
 0x450   :  { %v4233_v50 = vadd.f32 %v4232_v8, %v4231_v4  ;;  %v3895_v6 = vpop.f32.mrf.mxu0  ;;  %v7826_v8 = vld [vmem:[#allocation89_spill] sm:$0xff] }
 0x451   :  { %v3999_v27 = vadd.f32 %v3890_v54, %v3733_v0  ;;  %v5073_v54 = vld [vmem:[%s7508_s0 + $0x180] sm:$0xff] }
 0x452   :  { %v3082_v36 = vpop.f32.mrf.mxu1 }
 0x453   :  { %v4067_v32 = vadd.f32 %v7314_v22, %v3999_v27  ;;  %v3185_v44 = vadd.f32 %v3082_v36, %v7820_v40  ;;  %4903 = vmatmul.msk.bf16.gmra.mxu0 %vm1006_vm3, %v7821_v56 }
 0x455   :  { %v4131_v30 = vmax.f32 %v4067_v32, 0.0  ;;  %v3439_v14 = vadd.f32 %v3336_v61, %v3185_v44  ;;  %4795 = vmatmul.msk.bf16.gmra.mxu1 %vm1006_vm3, %v7821_v56  ;;  %v5074_v61 = vld [vmem:[%s7508_s0 + $0x18c] sm:$0xff] }
 0x456   :  { %v3626_v41 = vpop.f32.mrf.mxu3 }
 0x457   :  { %v4234_v9 = vsel %vm4161_vm8, %v4131_v30, 0.0  ;;  %v3734_v13 = vadd.f32 %v3626_v41, %v3436_v52  ;;  %v3338_v42 = vpop.f32.mrf.mxu2 }
 0x458   :  { %v4235_v20 = vadd.f32 %v4234_v9, %v4233_v50  ;;  %v3897_v34 = vpop.f32.mrf.mxu0 }
 0x459   :  { %v4000_v48 = vadd.f32 %v3892_v60, %v3734_v13  ;;  %v7824_v60 = vld [vmem:[#allocation48_spill] sm:$0xff]  ;;  %v7827_v13 = vld [vmem:[#allocation53_spill] sm:$0xff] }
 0x45a   :  { %v3084_v1 = vpop.f32.mrf.mxu1 }
 0x45b   :  { %v4068_v16 = vadd.f32 %v7314_v22, %v4000_v48  ;;  %4868 = vmatmul.msk.bf16.gmra.mxu3 %vm1006_vm3, %v7822_v62  ;;  %v3186_v31 = vadd.f32 %v3084_v1, %v7823_v43  ;;  %v7828_v1 = vld [vmem:[#allocation55_spill] sm:$0xff] }
 0x45c   :  { %4837 = vmatmul.msk.bf16.gmra.mxu2 %vm1006_vm3, %v5073_v54 }
 0x45d   :  { %v4132_v28 = vmax.f32 %v4068_v16, 0.0  ;;  %v3440_v3 = vadd.f32 %v3338_v42, %v3186_v31 }
 0x45e   :  { %v3629_v52 = vpop.f32.mrf.mxu3 }
 0x45f   :  { %v4236_v10 = vsel %vm4161_vm8, %v4132_v28, 0.0  ;;  %v3735_v58 = vadd.f32 %v3629_v52, %v3437_v39  ;;  %v3341_v35 = vpop.f32.mrf.mxu2  ;;  %v7829_v28 = vld [vmem:[#allocation27_spill] sm:$0xff] }
 0x460   :  { %v4237_v26 = vadd.f32 %v4236_v10, %v4235_v20  ;;  %v3900_v55 = vpop.f32.mrf.mxu0 }
 0x461   :  { %v4001_v45 = vadd.f32 %v3895_v6, %v3735_v58  ;;  %v5075_v58 = vld [vmem:[%s7508_s0 + $0x198] sm:$0xff] }
 0x462   :  { %v3087_v51 = vpop.f32.mrf.mxu1 }
 0x463   :  { %v4069_v63 = vadd.f32 %v7314_v22, %v4001_v45  ;;  %4904 = vmatmul.msk.bf16.gmra.mxu0 %vm1006_vm3, %v7824_v60  ;;  %v3187_v43 = vadd.f32 %v3087_v51, %v7828_v1 }
 0x465   :  { %v4133_v2 = vmax.f32 %v4069_v63, 0.0  ;;  %4796 = vmatmul.msk.bf16.gmra.mxu1 %vm1006_vm3, %v7824_v60 }
 0x466   :  { %v3631_v38 = vpop.f32.mrf.mxu3 }
 0x467   :  { %v4238_v11 = vsel %vm4161_vm8, %v4133_v2, 0.0  ;;  %v3736_v47 = vadd.f32 %v3631_v38, %v3438_v19  ;;  %v3343_v23 = vpop.f32.mrf.mxu2 }
 0x468   :  { %v4239_v39 = vadd.f32 %v4238_v11, %v4237_v26  ;;  %v3902_v21 = vpop.f32.mrf.mxu0 }
 0x469   :  { %v4002_v59 = vadd.f32 %v3897_v34, %v3736_v47 }
 0x46a   :  { %v3089_v4 = vpop.f32.mrf.mxu1 }
 0x46b   :  { %v4070_v25 = vadd.f32 %v7314_v22, %v4002_v59  ;;  %4869 = vmatmul.msk.bf16.gmra.mxu3 %vm1006_vm3, %v7825_v37  ;;  %v3188_v0 = vadd.f32 %v3089_v4, %v7826_v8  ;;  %v7830_v59 = vld [vmem:[#allocation58_spill] sm:$0xff]  ;;  %v5078_v8 = vld [vmem:[%s7508_s0 + $0x1a0] sm:$0x1] }
 0x46c   :  { %4838 = vmatmul.msk.bf16.gmra.mxu2 %vm1006_vm3, %v5074_v61 }
 0x46d   :  { %v4134_v50 = vmax.f32 %v4070_v25, 0.0  ;;  %v3442_v27 = vadd.f32 %v3343_v23, %v3188_v0  ;;  %v5077_v25 = vld [vmem:[%s7508_s0 + $0x198] sm:$0xf]  ;;  %v2959_v0 = vrot.slane %v5078_v8, 5 }
 0x46e   :  { %v3634_v19 = vpop.f32.mrf.mxu3  ;;  %v4766_v37 = vrot.slane %v5077_v25, 9 }
 0x46f   :  { %v4240_v6 = vsel %vm4161_vm8, %v4134_v50, 0.0  ;;  %v3737_v32 = vadd.f32 %v3634_v19, %v3439_v14  ;;  %v3346_v36 = vpop.f32.mrf.mxu2 }
 0x470   :  { %v4241_v40 = vadd.f32 %v4240_v6, %v4239_v39  ;;  %v3905_v56 = vpop.f32.mrf.mxu0 }
 0x471   :  { %v4003_v44 = vadd.f32 %v3900_v55, %v3737_v32 }
 0x472   :  { %v3092_v41 = vpop.f32.mrf.mxu1 }
 0x473   :  { %v4071_v30 = vadd.f32 %v7314_v22, %v4003_v44  ;;  %v3189_v9 = vadd.f32 %v3092_v41, %v6803_v7  ;;  %4905 = vmatmul.msk.bf16.gmra.mxu0 %vm1006_vm3, %v7827_v13 }
 0x475   :  { %v4135_v42 = vmax.f32 %v4071_v30, 0.0  ;;  %v3443_v48 = vadd.f32 %v3346_v36, %v3189_v9  ;;  %4797 = vmatmul.msk.bf16.gmra.mxu1 %vm1006_vm3, %v7827_v13  ;;  %v4949_v36 = vld [vmem:[%s7508_s0 + $0x1a4] sm:$0xff] }
 0x476   :  { %v3636_v20 = vpop.f32.mrf.mxu3 }
 0x477   :  { %v4242_v14 = vsel %vm4161_vm8, %v4135_v42, 0.0  ;;  %v3738_v34 = vadd.f32 %v3636_v20, %v3440_v3  ;;  %v3348_v16 = vpop.f32.mrf.mxu2  ;;  %v3441_v3 = vadd.f32 %v3341_v35, %v3187_v43  ;;  %v133_v20 = vld [vmem:[%s7508_s0 + $0x1a4] sm:$0xf] }
 0x478   :  { %v4243_v62 = vadd.f32 %v4242_v14, %v4241_v40  ;;  %v3907_v54 = vpop.f32.mrf.mxu0  ;;  %v3490_v43 = vshrl.u32 %v133_v20, 16 }
 0x479   :  { %v4004_v31 = vadd.f32 %v3902_v21, %v3738_v34  ;;  %v134_v34 = vld [vmem:[%s7508_s0 + $0x1a8] sm:$0xf] }
 0x47a   :  { %v3094_v52 = vpop.f32.mrf.mxu1 }
 0x47b   :  { %v4072_v7 = vadd.f32 %v7314_v22, %v4004_v31  ;;  %4870 = vmatmul.msk.bf16.gmra.mxu3 %vm1006_vm3, %v7829_v28  ;;  %v3190_v10 = vadd.f32 %v3094_v52, %v6816_v46  ;;  %v5076_v46 = vld [vmem:[%s7508_s0 + $0x19c] sm:$0xf]  ;;  %v3493_v31 = vshll.u32 %v133_v20, 16  ;;  %v3499_v28 = vshll.u32 %v134_v34, 16 }
 0x47c   :  { %4839 = vmatmul.msk.bf16.gmra.mxu2 %vm1006_vm3, %v5075_v58  ;;  %v2956_v47 = vrot.slane %v5076_v46, 5  ;;  %v3503_v52 = vshrl.u32 %v134_v34, 16 }
 0x47d   :  { %v4136_v26 = vmax.f32 %v4072_v7, 0.0  ;;  %v7363_v55 = vadd.f32 %v3348_v16, %v3190_v10 }
 0x47e   :  { %v3639_v45 = vpop.f32.mrf.mxu3  ;;  %v2958_v4 = vrot.slane %v2956_v47, 4  ;;  %v3505_v46 = vrot.slane %v3503_v52, 4 }
 0x47f   :  { %v4244_v63 = vsel %vm4161_vm8, %v4136_v26, 0.0  ;;  %v3739_v51 = vadd.f32 %v3639_v45, %v3441_v3  ;;  %v3351_v60 = vpop.f32.mrf.mxu2  ;;  %v3774_v3 = vrot.slane %v134_v34, 5 }
 0x480   :  { %v4245_v2 = vadd.f32 %v4244_v63, %v4243_v62  ;;  %v3910_v11 = vpop.f32.mrf.mxu0  ;;  %v2960_v30 = vsel %vm5739_vm7, %v2958_v4, %v2959_v0  ;;  %v3492_v63 = vrot.slane %v3490_v43, 4 }
 0x481   :  { %v4005_v38 = vadd.f32 %v3905_v56, %v3739_v51  ;;  %v2957_v56 = vsel %vm5739_vm7, %v4766_v37, %v2956_v47  ;;  %v2966_v42 = vunpack.c.l.b16 %v2960_v30  ;;  %v3495_v51 = vrot.slane %v3493_v31, 5 }
 0x482   :  { %v3097_v39 = vpop.f32.mrf.mxu1  ;;  %v2965_v13 = vunpack.c.l.b16 %v2957_v56 }
 0x483   :  { %v4073_v23 = vadd.f32 %v7314_v22, %v4005_v38  ;;  %v3191_v35 = vadd.f32 %v3097_v39, %v6826_v15  ;;  %4906 = vmatmul.msk.bf16.gmra.mxu0 %vm1006_vm3, %v7830_v59  ;;  %v3501_v38 = vrot.slane %v3499_v28, 5  ;;  %v3496_v4 = vor.u32 %v3495_v51, %v3492_v63 }
 0x484   :  { %v2968_v7 = vpack.c.b16 %v2966_v42, %v2965_v13 }
 0x485   :  { %v4137_v21 = vmax.f32 %v4073_v23, 0.0  ;;  %v7379_v50 = vadd.f32 %v3351_v60, %v3191_v35  ;;  %4798 = vmatmul.msk.bf16.gmra.mxu1 %vm1006_vm3, %v7830_v59  ;;  %v7831_v60 = vld [vmem:[#allocation26_spill] sm:$0xff]  ;;  %v4875_v23 = vrot.slane %v133_v20, 9 }
 0x486   :  { %v3641_v61 = vpop.f32.mrf.mxu3 }
 0x487   :  { %v4246_v15 = vsel %vm4161_vm8, %v4137_v21, 0.0  ;;  %v3740_v19 = vadd.f32 %v3641_v61, %v3442_v27  ;;  %v3353_v6 = vpop.f32.mrf.mxu2  ;;  %v3506_v61 = vor.u32 %v3505_v46, %v3501_v38 }
 0x488   :  { %v4247_v32 = vadd.f32 %v4246_v15, %v4245_v2  ;;  %v3912_v44 = vpop.f32.mrf.mxu0 }
 0x489   :  { %v4006_v40 = vadd.f32 %v3907_v54, %v3740_v19 }
 0x48a   :  { %v3099_v27 = vpop.f32.mrf.mxu1 }
 0x48b   :  { %v4074_v41 = vadd.f32 %v7314_v22, %v4006_v40  ;;  %4871 = vmatmul.msk.bf16.gmra.mxu3 %vm1006_vm3, %v7734_v29  ;;  %v3192_v9 = vadd.f32 %v3099_v27, %v6836_v5  ;;  %v7832_v40 = vld [vmem:[#allocation60_spill] sm:$0xff] }
 0x48c   :  { %4840 = vmatmul.msk.bf16.gmra.mxu2 %vm1006_vm3, %v4949_v36 }
 0x48d   :  { %v4138_v14 = vmax.f32 %v4074_v41, 0.0  ;;  %v7402_v62 = vadd.f32 %v3353_v6, %v3192_v9  ;;  %v3775_v6 = vsel %vm5739_vm7, %v4875_v23, %v3774_v3  ;;  %v7833_v41 = vld [vmem:[#allocation30_spill] sm:$0xff]  ;;  %v3507_v9 = vrot.slane %v3506_v61, 4  ;;  %v7835_v23 = vld [vmem:[#allocation31_spill] sm:$0xff] }
 0x48e   :  { %v3644_v16 = vpop.f32.mrf.mxu3  ;;  %v3783_v13 = vunpack.c.l.b16 %v3775_v6 }
 0x48f   :  { %v4248_v29 = vsel %vm4161_vm8, %v4138_v14, 0.0  ;;  %v3741_v1 = vadd.f32 %v3644_v16, %v3443_v48  ;;  %v3356_v5 = vpop.f32.mrf.mxu2  ;;  %v135_v48 = vld [vmem:[%s7508_s0 + $0x1ac] sm:$0x1] }
 0x490   :  { %v4249_v54 = vadd.f32 %v4248_v29, %v4247_v32  ;;  %v3915_v58 = vpop.f32.mrf.mxu0  ;;  %v3777_v39 = vrot.slane %v135_v48, 5  ;;  %v3509_v8 = vshll.u32 %v135_v48, 16 }
 0x491   :  { %v4007_v10 = vadd.f32 %v3910_v11, %v3741_v1  ;;  %v3776_v11 = vrot.slane %v3774_v3, 4  ;;  %v7834_v3 = vld [vmem:[#allocation28_spill] sm:$0xff] }
 0x492   :  { %v3102_v45 = vpop.f32.mrf.mxu1  ;;  %v3511_v30 = vrot.slane %v3509_v8, 5 }
 0x493   :  { %v4075_v26 = vadd.f32 %v7314_v22, %v4007_v10  ;;  %v3193_v2 = vadd.f32 %v3102_v45, %v7831_v60  ;;  %4907 = vmatmul.msk.bf16.gmra.mxu0 %vm1006_vm3, %v2968_v7  ;;  %v3778_v32 = vsel %vm5739_vm7, %v3776_v11, %v3777_v39 }
 0x495   :  { %v4139_v47 = vmax.f32 %v4075_v26, 0.0  ;;  %v3447_v59 = vadd.f32 %v3356_v5, %v3193_v2  ;;  %4799 = vmatmul.msk.bf16.gmra.mxu1 %vm1006_vm3, %v2968_v7  ;;  %v3512_v5 = vsel %vm5175_vm4, %v3507_v9, %v3511_v30 }
 0x496   :  { %v3646_v35 = vpop.f32.mrf.mxu3  ;;  %v3518_v10 = vunpack.c.l.b16 %v3512_v5 }
 0x497   :  { %v4250_v21 = vsel %vm4161_vm8, %v4139_v47, 0.0  ;;  %v3742_v25 = vadd.f32 %v3646_v35, %v7363_v55  ;;  %v3358_v37 = vpop.f32.mrf.mxu2  ;;  %v3497_v55 = vrot.slane %v3496_v4, 4 }
 0x498   :  { %v4251_v0 = vadd.f32 %v4250_v21, %v4249_v54  ;;  %v3917_v19 = vpop.f32.mrf.mxu0 }
 0x499   :  { %v4008_v15 = vadd.f32 %v3912_v44, %v3742_v25  ;;  %v3784_v44 = vunpack.c.l.b16 %v3778_v32  ;;  %v3502_v1 = vsel %vm5175_vm4, %v3497_v55, %v3501_v38 }
 0x49a   :  { %v3104_v56 = vpop.f32.mrf.mxu1  ;;  %v3517_v52 = vunpack.c.l.b16 %v3502_v1 }
 0x49b   :  { %v4076_v36 = vadd.f32 %v7314_v22, %v4008_v15  ;;  %4872 = vmatmul.msk.bf16.gmra.mxu3 %vm1006_vm3, %v7832_v40  ;;  %v3194_v27 = vadd.f32 %v3104_v56, %v7833_v41  ;;  %v3786_v43 = vpack.c.b16 %v3784_v44, %v3783_v13  ;;  %v7837_v44 = vld [vmem:[#allocation33_spill] sm:$0xff] }
 0x49c   :  { %v3520_v60 = vpack.c.b16 %v3518_v10, %v3517_v52 }
 0x49d   :  { %v4140_v42 = vmax.f32 %v4076_v36, 0.0  ;;  %v3448_v14 = vadd.f32 %v3358_v37, %v3194_v27 }
 0x49e   :  { %v3649_v20 = vpop.f32.mrf.mxu3 }
 0x49f   :  { %v4252_v34 = vsel %vm4161_vm8, %v4140_v42, 0.0  ;;  %v3743_v12 = vadd.f32 %v3649_v20, %v7379_v50  ;;  %v3361_v16 = vpop.f32.mrf.mxu2 }
 0x4a0   :  { %v4253_v29 = vadd.f32 %v4252_v34, %v4251_v0  ;;  %v3920_v54 = vpop.f32.mrf.mxu0 }
 0x4a1   :  { %v4009_v31 = vadd.f32 %v3915_v58, %v3743_v12 }
 0x4a2   :  { %v3107_v28 = vpop.f32.mrf.mxu1 }
 0x4a3   :  { %v4077_v7 = vadd.f32 %v7314_v22, %v4009_v31  ;;  %v3195_v26 = vadd.f32 %v3107_v28, %v7834_v3  ;;  %4908 = vmatmul.msk.bf16.gmra.mxu0 %vm1006_vm3, %v3786_v43 }
 0x4a5   :  { %v4141_v50 = vmax.f32 %v4077_v7, 0.0  ;;  %v3449_v63 = vadd.f32 %v3361_v16, %v3195_v26  ;;  %v7838_v7 = vld [vmem:[#allocation36_spill] sm:$0xff] }
 0x4a6   :  { %v3651_v45 = vpop.f32.mrf.mxu3 }
 0x4a7   :  { %v4254_v51 = vsel %vm4161_vm8, %v4141_v50, 0.0  ;;  %v3744_v24 = vadd.f32 %v3651_v45, %v7402_v62  ;;  %v3363_v2 = vpop.f32.mrf.mxu2 }
 0x4a8   :  { %v4255_v58 = vadd.f32 %v4254_v51, %v4253_v29  ;;  %v3922_v38 = vpop.f32.mrf.mxu0 }
 0x4a9   :  { %v4010_v48 = vadd.f32 %v3917_v19, %v3744_v24  ;;  %v7836_v19 = vld [vmem:[#allocation32_spill] sm:$0xff] }
 0x4aa   :  { %v3109_v47 = vpop.f32.mrf.mxu1 }
 0x4ab   :  { %v4078_v46 = vadd.f32 %v7314_v22, %v4010_v48  ;;  %4873 = vmatmul.msk.bf16.gmra.mxu3 %vm1006_vm3, %v3520_v60  ;;  %v3196_v11 = vadd.f32 %v3109_v47, %v7835_v23  ;;  %vm4415_vm3 = vcmask 74752  }
 0x4ad   :  { %v4142_v39 = vmax.f32 %v4078_v46, 0.0  ;;  %v3450_v21 = vadd.f32 %v3363_v2, %v3196_v11 }
 0x4ae   :  { %v3654_v35 = vpop.f32.mrf.mxu3 }
 0x4af   :  { %v4256_v25 = vsel %vm4161_vm8, %v4142_v39, 0.0  ;;  %v3745_v37 = vadd.f32 %v3654_v35, %v3447_v59  ;;  %v3366_v4 = vpop.f32.mrf.mxu2 }
 0x4b0   :  { %v4257_v62 = vadd.f32 %v4256_v25, %v4255_v58  ;;  %v3925_v0 = vpop.f32.mrf.mxu0 }
 0x4b1   :  { %v4011_v8 = vadd.f32 %v3920_v54, %v3745_v37 }
 0x4b2   :  { %v3112_v15 = vpop.f32.mrf.mxu1 }
 0x4b3   :  { %v4079_v61 = vadd.f32 %v7314_v22, %v4011_v8  ;;  %v3197_v6 = vadd.f32 %v3112_v15, %v7836_v19 }
 0x4b5   :  { %v4143_v32 = vmax.f32 %v4079_v61, 0.0  ;;  %v3451_v40 = vadd.f32 %v3366_v4, %v3197_v6 }
 0x4b6   :  { %v3656_v36 = vpop.f32.mrf.mxu3 }
 0x4b7   :  { %v4258_v56 = vsel %vm4161_vm8, %v4143_v32, 0.0  ;;  %v3746_v55 = vadd.f32 %v3656_v36, %v3448_v14  ;;  %v3368_v9 = vpop.f32.mrf.mxu2 }
 0x4b8   :  { %v4259_v30 = vadd.f32 %v4258_v56, %v4257_v62  ;;  %v3927_v27 = vpop.f32.mrf.mxu0 }
 0x4b9   :  { %v4012_v41 = vadd.f32 %v3922_v38, %v3746_v55 }
 0x4ba   :  { %v3114_v13 = vpop.f32.mrf.mxu1 }
 0x4bb   :  { %v4080_v59 = vadd.f32 %v7314_v22, %v4012_v41  ;;  %v3198_v42 = vadd.f32 %v3114_v13, %v7837_v44 }
 0x4bd   :  { %v4144_v20 = vmax.f32 %v4080_v59, 0.0  ;;  %v3452_v12 = vadd.f32 %v3368_v9, %v3198_v42 }
 0x4be   :  { %v3659_v34 = vpop.f32.mrf.mxu3 }
 0x4bf   :  { %v4260_v16 = vsel %vm4161_vm8, %v4144_v20, 0.0  ;;  %v3747_v29 = vadd.f32 %v3659_v34, %v3449_v63  ;;  %v3371_v54 = vpop.f32.mrf.mxu2  ;;  %v4352_v63 = vld [vmem:[%s7513_s5 + $0x10] sm:$0xff] }
 0x4c0   :  { %v4261_v1 = vadd.f32 %v4260_v16, %v4259_v30  ;;  %v3930_v43 = vpop.f32.mrf.mxu0  ;;  %4371 = vmatpush.msrb.mxu2 %v4352_v63  ;;  %v7839_v30 = vld [vmem:[#allocation35_spill] sm:$0xff] }
 0x4c1   :  { %v4013_v5 = vadd.f32 %v3925_v0, %v3747_v29 }
 0x4c2   :  { %v3117_v31 = vpop.f32.mrf.mxu1 }
 0x4c3   :  { %v4081_v14 = vadd.f32 %v7314_v22, %v4013_v5  ;;  %v3199_v28 = vadd.f32 %v3117_v31, %v7838_v7 }
 0x4c5   :  { %v4145_v52 = vmax.f32 %v4081_v14, 0.0  ;;  %v3453_v3 = vadd.f32 %v3371_v54, %v3199_v28 }
 0x4c6   :  { %v3661_v10 = vpop.f32.mrf.mxu3 }
 0x4c7   :  { %v4262_v26 = vsel %vm4161_vm8, %v4145_v52, 0.0  ;;  %v3748_v50 = vadd.f32 %v3661_v10, %v3450_v21  ;;  %v3373_v38 = vpop.f32.mrf.mxu2 }
 0x4c8   :  { %v4263_v45 = vadd.f32 %v4262_v26, %v4261_v1  ;;  %v3932_v24 = vpop.f32.mrf.mxu0  ;;  %v7840_v1 = vld [vmem:[#allocation8_spill] sm:$0xff] }
 0x4c9   :  { %v4014_v51 = vadd.f32 %v3927_v27, %v3748_v50  ;;  %v7841_v50 = vld [vmem:[#allocation38_spill] sm:$0xff] }
 0x4ca   :  { %v3119_v2 = vpop.f32.mrf.mxu1 }
 0x4cb   :  { %v4082_v60 = vadd.f32 %v7314_v22, %v4014_v51  ;;  %v3200_v41 = vadd.f32 %v3119_v2, %v7839_v30 }
 0x4cd   :  { %v4146_v58 = vmax.f32 %v4082_v60, 0.0  ;;  %v3454_v44 = vadd.f32 %v3373_v38, %v3200_v41 }
 0x4ce   :  { %v3664_v48 = vpop.f32.mrf.mxu3 }
 0x4cf   :  { %v4264_v46 = vsel %vm4161_vm8, %v4146_v58, 0.0  ;;  %v3749_v47 = vadd.f32 %v3664_v48, %v3451_v40  ;;  %v3376_v0 = vpop.f32.mrf.mxu2 }
 0x4d0   :  { %v4265_v23 = vadd.f32 %v4264_v46, %v4263_v45  ;;  %v3935_v39 = vpop.f32.mrf.mxu0 }
 0x4d1   :  { %v4015_v11 = vadd.f32 %v3930_v43, %v3749_v47 }
 0x4d2   :  { %v3122_v21 = vpop.f32.mrf.mxu1 }
 0x4d3   :  { %v4083_v35 = vadd.f32 %v7314_v22, %v4015_v11  ;;  %v3201_v5 = vadd.f32 %v3122_v21, %v7840_v1  ;;  %v7842_v11 = vld [vmem:[#allocation41_spill] sm:$0xff] }
 0x4d5   :  { %v4147_v25 = vmax.f32 %v4083_v35, 0.0  ;;  %v3455_v7 = vadd.f32 %v3376_v0, %v3201_v5 }
 0x4d6   :  { %v3666_v37 = vpop.f32.mrf.mxu3 }
 0x4d7   :  { %v4266_v4 = vsel %vm4161_vm8, %v4147_v25, 0.0  ;;  %v3750_v62 = vadd.f32 %v3666_v37, %v3452_v12  ;;  %v3378_v59 = vpop.f32.mrf.mxu2 }
 0x4d8   :  { %v4267_v8 = vadd.f32 %v4266_v4, %v4265_v23  ;;  %v3937_v15 = vpop.f32.mrf.mxu0 }
 0x4d9   :  { %v4016_v61 = vadd.f32 %v3932_v24, %v3750_v62 }
 0x4da   :  { %v3124_v32 = vpop.f32.mrf.mxu1 }
 0x4db   :  { %v4084_v19 = vadd.f32 %v7314_v22, %v4016_v61  ;;  %v3202_v45 = vadd.f32 %v3124_v32, %v7841_v50 }
 0x4dd   :  { %v4148_v6 = vmax.f32 %v4084_v19, 0.0  ;;  %v3456_v2 = vadd.f32 %v3378_v59, %v3202_v45 }
 0x4de   :  { %v3669_v36 = vpop.f32.mrf.mxu3 }
 0x4df   :  { %v4268_v40 = vsel %vm4161_vm8, %v4148_v6, 0.0  ;;  %v3751_v56 = vadd.f32 %v3669_v36, %v3453_v3  ;;  %v3381_v54 = vpop.f32.mrf.mxu2  ;;  %v7843_v6 = vld [vmem:[#allocation39_spill] sm:$0xff] }
 0x4e0   :  { %v4269_v55 = vadd.f32 %v4268_v40, %v4267_v8  ;;  %v3940_v9 = vpop.f32.mrf.mxu0 }
 0x4e1   :  { %v4017_v27 = vadd.f32 %v3935_v39, %v3751_v56 }
 0x4e2   :  { %v3127_v16 = vpop.f32.mrf.mxu1 }
 0x4e3   :  { %v4085_v13 = vadd.f32 %v7314_v22, %v4017_v27  ;;  %v3203_v39 = vadd.f32 %v3127_v16, %v7842_v11 }
 0x4e5   :  { %v4149_v42 = vmax.f32 %v4085_v13, 0.0  ;;  %v3457_v4 = vadd.f32 %v3381_v54, %v3203_v39  ;;  %v7844_v54 = vld [vmem:[#allocation11_spill] sm:$0xff] }
 0x4e6   :  { %v3671_v20 = vpop.f32.mrf.mxu3 }
 0x4e7   :  { %v4270_v34 = vsel %vm4161_vm8, %v4149_v42, 0.0  ;;  %v3752_v12 = vadd.f32 %v3671_v20, %v3454_v44  ;;  %v3383_v48 = vpop.f32.mrf.mxu2 }
 0x4e8   :  { %v4271_v29 = vadd.f32 %v4270_v34, %v4269_v55  ;;  %v3942_v14 = vpop.f32.mrf.mxu0 }
 0x4e9   :  { %v4018_v43 = vadd.f32 %v3937_v15, %v3752_v12 }
 0x4ea   :  { %v3129_v51 = vpop.f32.mrf.mxu1 }
 0x4eb   :  { %v4086_v31 = vadd.f32 %v7314_v22, %v4018_v43  ;;  %v3204_v32 = vadd.f32 %v3129_v51, %v7843_v6 }
 0x4ed   :  { %v4150_v28 = vmax.f32 %v4086_v31, 0.0  ;;  %v3458_v56 = vadd.f32 %v3383_v48, %v3204_v32 }
 0x4ee   :  { %v3674_v52 = vpop.f32.mrf.mxu3 }
 0x4ef   :  { %v4272_v10 = vsel %vm4161_vm8, %v4150_v28, 0.0  ;;  %v3753_v3 = vadd.f32 %v3674_v52, %v3455_v7  ;;  %v3386_v19 = vpop.f32.mrf.mxu2 }
 0x4f0   :  { %v4273_v26 = vadd.f32 %v4272_v10, %v4271_v29  ;;  %v3945_v24 = vpop.f32.mrf.mxu0 }
 0x4f1   :  { %v4019_v63 = vadd.f32 %v3940_v9, %v3753_v3 }
 0x4f2   :  { %v3132_v25 = vpop.f32.mrf.mxu1 }
 0x4f3   :  { %v4087_v60 = vadd.f32 %v7314_v22, %v4019_v63  ;;  %v3205_v44 = vadd.f32 %v3132_v25, %v6940_v57 }
 0x4f5   :  { %v4151_v58 = vmax.f32 %v4087_v60, 0.0  ;;  %v3459_v12 = vadd.f32 %v3386_v19, %v3205_v44  ;;  %v4351_v44 = vld [vmem:[%s7513_s5 + $0x8] sm:$0xff] }
 0x4f6   :  { %v3676_v38 = vpop.f32.mrf.mxu3  ;;  %4372 = vmatpush.msrb.mxu2 %v4351_v44  ;;  %v5106_v44 = vmov 0.0  }
 0x4f7   :  { %v4274_v46 = vsel %vm4161_vm8, %v4151_v58, 0.0  ;;  %v3754_v47 = vadd.f32 %v3676_v38, %v3456_v2  ;;  %v3388_v20 = vpop.f32.mrf.mxu2 }
 0x4f8   :  { %v4275_v23 = vadd.f32 %v4274_v46, %v4273_v26  ;;  %v3947_v37 = vpop.f32.mrf.mxu0 }
 0x4f9   :  { %v4020_v35 = vadd.f32 %v3942_v14, %v3754_v47 }
 0x4fa   :  { %v3134_v30 = vpop.f32.mrf.mxu1 }
 0x4fb   :  { %v4088_v21 = vadd.f32 %v7314_v22, %v4020_v35  ;;  %v3206_v7 = vadd.f32 %v3134_v30, %v7844_v54 }
 0x4fd   :  { %v4152_v62 = vmax.f32 %v4088_v21, 0.0  ;;  %v3460_v57 = vadd.f32 %v3388_v20, %v3206_v7 }
 0x4fe   :  { %v3679_v8 = vpop.f32.mrf.mxu3 }
 0x4ff   :  { %v4276_v0 = vsel %vm4161_vm8, %v4152_v62, 0.0  ;;  %v3755_v61 = vadd.f32 %v3679_v8, %v3457_v4  ;;  %v3391_v10 = vpop.f32.mrf.mxu2 }
 0x500   :  { %v4277_v15 = vadd.f32 %v4276_v0, %v4275_v23  ;;  %v3950_v27 = vpop.f32.mrf.mxu0 }
 0x501   :  { %v4021_v36 = vadd.f32 %v3945_v24, %v3755_v61 }
 0x502   :  { %v3137_v5 = vpop.f32.mrf.mxu1 }
 0x503   :  { %v4089_v40 = vadd.f32 %v7314_v22, %v4021_v36  ;;  %v3207_v51 = vadd.f32 %v3137_v5, %v6956_v53 }
 0x505   :  { %v4153_v55 = vmax.f32 %v4089_v40, 0.0  ;;  %v3461_v48 = vadd.f32 %v3391_v10, %v3207_v51 }
 0x506   :  { %v3681_v41 = vpop.f32.mrf.mxu3 }
 0x507   :  { %v4278_v9 = vsel %vm4161_vm8, %v4153_v55, 0.0  ;;  %v3756_v59 = vadd.f32 %v3681_v41, %v3458_v56  ;;  %v3393_v46 = vpop.f32.mrf.mxu2 }
 0x508   :  { %v4279_v13 = vadd.f32 %v4278_v9, %v4277_v15  ;;  %v3952_v31 = vpop.f32.mrf.mxu0 }
 0x509   :  { %v4022_v42 = vadd.f32 %v3947_v37, %v3756_v59 }
 0x50a   :  { %v3139_v24 = vpop.f32.mrf.mxu1 }
 0x50b   :  { %v4090_v34 = vadd.f32 %v7314_v22, %v4022_v42  ;;  %v3208_v35 = vadd.f32 %v3139_v24, %v6963_v18 }
 0x50d   :  { %v4154_v16 = vmax.f32 %v4090_v34, 0.0  ;;  %v3462_v4 = vadd.f32 %v3393_v46, %v3208_v35 }
 0x50e   :  { %v3684_v29 = vpop.f32.mrf.mxu3 }
 0x50f   :  { %v4280_v1 = vsel %vm4161_vm8, %v4154_v16, 0.0  ;;  %v3757_v43 = vadd.f32 %v3684_v29, %v3459_v12  ;;  %v3396_v15 = vpop.f32.mrf.mxu2  ;;  %v4225_v12 = vrot.slane %v7290_v17, 4 }
 0x510   :  { %v4281_v14 = vadd.f32 %v4280_v1, %v4279_v13  ;;  %v3955_v2 = vpop.f32.mrf.mxu0 }
 0x511   :  { %v4023_v28 = vadd.f32 %v3950_v27, %v3757_v43 }
 0x512   :  { %v3142_v25 = vpop.f32.mrf.mxu1 }
 0x513   :  { %v4091_v52 = vadd.f32 %v7314_v22, %v4023_v28  ;;  %v3209_v6 = vadd.f32 %v3142_v25, %v6972_v33 }
 0x515   :  { %v4155_v3 = vmax.f32 %v4091_v52, 0.0  ;;  %v3463_v40 = vadd.f32 %v3396_v15, %v3209_v6 }
 0x516   :  { %v3686_v26 = vpop.f32.mrf.mxu3 }
 0x517   :  { %v4282_v50 = vsel %vm4161_vm8, %v4155_v3, 0.0  ;;  %v3758_v45 = vadd.f32 %v3686_v26, %v3460_v57  ;;  %v3398_v33 = vpop.f32.mrf.mxu2 }
 0x518   :  { %v4283_v63 = vadd.f32 %v4282_v50, %v4281_v14  ;;  %v3957_v53 = vpop.f32.mrf.mxu0  ;;  %v4226_v14 = vadd.f32 %v4225_v12, %v7290_v17 }
 0x519   :  { %v4024_v60 = vadd.f32 %v3952_v31, %v3758_v45 }
 0x51a   :  { %v3144_v18 = vpop.f32.mrf.mxu1  ;;  %v4227_v7 = vrot.slane %v4226_v14, 2 }
 0x51b   :  { %v4092_v58 = vadd.f32 %v7314_v22, %v4024_v60  ;;  %v3210_v59 = vadd.f32 %v3144_v18, %v6982_v49  ;;  %v4401_v18 = vlaneseq }
 0x51c   :  { %v4228_v10 = vadd.f32 %v4227_v7, %v4226_v14 }
 0x51d   :  { %v4156_v38 = vmax.f32 %v4092_v58, 0.0  ;;  %v3464_v20 = vadd.f32 %v3398_v33, %v3210_v59  ;;  %v4958_v58 = vld [vmem:[%s7512_s4] ss:$0 sm:$0xff]  ;;  %s5107_s4 = smov [#allocation2]  }
 0x51e   :  { %v3689_v47 = vpop.f32.mrf.mxu3  ;;  %v4229_v26 = vrot.slane %v4228_v10, 1 }
 0x51f   :  { %v4284_v23 = vsel %vm4161_vm8, %v4156_v38, 0.0  ;;  %v3759_v11 = vadd.f32 %v3689_v47, %v3461_v48 }
 0x520   :  { %v4285_v39 = vadd.f32 %v4284_v23, %v4283_v63  ;;  %v3960_v55 = vpop.f32.mrf.mxu0  ;;  %v4230_v51 = vadd.f32 %v4229_v26, %v4228_v10  ;;  %v4403_v23 = vld [vmem:[%s7514_s6] sm:$0x3] }
 0x521   :  { %v4025_v21 = vadd.f32 %v3955_v2, %v3759_v11  ;;  %v5105_v11 = vmov 0  }
 0x522   :  { %v4300_v60 = vmul.f32 0.00390625, %v4230_v51  ;;  %4956 = vset.pattern.permute.xlu0 %v5105_v11 }
 0x523   :  { %v4093_v37 = vadd.f32 %v7314_v22, %v4025_v21 }
 0x525   :  { %v4157_v62 = vmax.f32 %v4093_v37, 0.0 }
 0x526   :  { %v3691_v8 = vpop.f32.mrf.mxu3 }
 0x527   :  { %v4286_v0 = vsel %vm4161_vm8, %v4157_v62, 0.0  ;;  %v3760_v61 = vadd.f32 %v3691_v8, %v3462_v4 }
 0x528   :  { %v4287_v19 = vadd.f32 %v4286_v0, %v4285_v39  ;;  %v3962_v43 = vpop.f32.mrf.mxu0 }
 0x529   :  { %v4026_v32 = vadd.f32 %v3957_v53, %v3760_v61 }
 0x52b   :  { %v4094_v36 = vadd.f32 %v7314_v22, %v4026_v32 }
 0x52d   :  { %v4158_v56 = vmax.f32 %v4094_v36, 0.0 }
 0x52e   :  { %v3694_v30 = vpop.f32.mrf.mxu3 }
 0x52f   :  { %v4288_v41 = vsel %vm4161_vm8, %v4158_v56, 0.0  ;;  %v3761_v27 = vadd.f32 %v3694_v30, %v3463_v40  ;;  %v4402_v30 = vand.u32 127, %v4401_v18 }
 0x530   :  { %v4289_v9 = vadd.f32 %v4288_v41, %v4287_v19 }
 0x531   :  { %v4027_v13 = vadd.f32 %v3960_v55, %v3761_v27 }
 0x533   :  { %v4095_v42 = vadd.f32 %v7314_v22, %v4027_v13 }
 0x535   :  { %v4159_v34 = vmax.f32 %v4095_v42, 0.0 }
 0x536   :  { %v3696_v16 = vpop.f32.mrf.mxu3 }
 0x537   :  { %v4290_v29 = vsel %vm4161_vm8, %v4159_v34, 0.0  ;;  %v3762_v1 = vadd.f32 %v3696_v16, %v3464_v20 }
 0x538   :  { %v4291_v5 = vadd.f32 %v4290_v29, %v4289_v9 }
 0x539   :  { %v4028_v49 = vadd.f32 %v3962_v43, %v3762_v1 }
 0x53b   :  { %v4096_v31 = vadd.f32 %v7314_v22, %v4028_v49  ;;  %v4350_v22 = vld [vmem:[%s7513_s5] sm:$0xff]  ;;  %s4422_s5 = sshll.u32 %s5107_s4, 4  ;;  %s4423_s5 = int_to_ptr.vmem [resolvable:$true] %s4422_s5 }
 0x53c   :  { %4373 = vmatpush.msrb.mxu2 %v4350_v22 }
 0x53d   :  { %v4160_v54 = vmax.f32 %v4096_v31, 0.0 }
 0x53f   :  { %v4292_v28 = vsel %vm4161_vm8, %v4160_v54, 0.0 }
 0x540   :  { %v4293_v52 = vadd.f32 %v4292_v28, %v4291_v5 }
 0x542   :  { %v4294_v57 = vrot.slane %v4293_v52, 4 }
 0x544   :  { %v4295_v3 = vadd.f32 %v4294_v57, %v4293_v52 }
 0x546   :  { %v4296_v50 = vrot.slane %v4295_v3, 2 }
 0x548   :  { %v4297_v45 = vadd.f32 %v4296_v50, %v4295_v3 }
 0x54a   :  { %v4298_v63 = vrot.slane %v4297_v45, 1 }
 0x54c   :  { %v4299_v24 = vadd.f32 %v4298_v63, %v4297_v45 }
 0x54e   :  { %v4301_v2 = vmul.f32 0.00390625, %v4299_v24 }
 0x550   :  { %v4310_v17 = vsel %vm4309_vm9, %v4301_v2, %v4300_v60 }
 0x551   :  { %4909 = vmatmul.msk.f32.vlgmr.msrb.gmra.mxu1 %vm4161_vm8, %v4310_v17 }
 0x5ce   :  { %v4330_v48 = vpop.f32.mrf.mxu1 }
 0x5cf   :  { %v4331_v38 = vadd.f32 %v4958_v58, %v4330_v48 }
 0x5d1   :  { %v4333_v46 = vmul.f32 %v4331_v38, %v4331_v38 }
 0x5d3   :  { %v4335_v47 = vsel %vm4334_vm10, %v4333_v46, 0.0 }
 0x5d4   :  { %4336 = vadd.xlane.f32.xlu0 %v4335_v47 }
 0x5e8   :  { %4405 = vperm.xlu0 %4956, %v4403_v23  }
 0x647   :  { %v4337_v39 = vpop.xlane.xlu0 %4336 }
 0x648   :  { %v4338_v35 = vadd.f32 1e-12, %v4337_v39 }
 0x64a   :  { %4959 = vrsqrt.f32 %v4338_v35  ;;  %vm4345_vm12 = vweird.f32 %v4338_v35 }
 0x650   :  { %v4960_v21 = vpop.eup %4959 }
 0x651   :  { %v4340_v25 = vmul.f32 %v4960_v21, %v4338_v35  ;;  %vm4346_vm11 = vweird.f32 %v4960_v21 }
 0x652   :  { %vm4347_vm13 = vmor %vm4345_vm12, %vm4346_vm11 }
 0x653   :  { %v4341_v37 = vmul.f32 %v4960_v21, %v4340_v25 }
 0x655   :  { %v4342_v53 = vmul.f32 0.5, %v4341_v37 }
 0x657   :  { %v4343_v4 = vsub.f32 1.5, %v4342_v53 }
 0x659   :  { %v4344_v62 = vmul.f32 %v4960_v21, %v4343_v4 }
 0x65a   :  { %v4406_v41 = vpop.permute.xlu0 %4405 }
 0x65b   :  { %v4348_v8 = vsel %vm4347_vm13, %v4960_v21, %v4344_v62  ;;  %vm4407_vm15 = vcmp.eq.s32.totalorder %v4402_v30, %v4406_v41 }
 0x65c   :  { %v4349_v0 = vmul.f32 %v4348_v8, %v4331_v38  ;;  %v4913_v33 = vsel %vm4407_vm15, 1.0, %v5106_v44 }
 0x65d   :  { %v4411_v16 = vsub.f32 1.0, %v4913_v33 }
 0x65e   :  { %4910 = vmatmul.msk.f32.vlgmr.msrb.gmra.mxu2 %vm4354_vm14, %v4349_v0 }
 0x6e1   :  { %v4375_v61 = vpop.f32.mrf.mxu2 }
 0x6e2   :  { %v4911_v15 = vclamps-f32 %v4375_v61, 1.0 }
 0x6e4   :  { %v4380_v19 = vmul.f32 %v4911_v15, %v4911_v15  ;;  %v4395_v34 = vmul.f32 0.87758255, %v4911_v15  ;;  %v4912_v29 = vadd.f32 -0.23971277, %v4911_v15  ;;  %vm4398_vm2 = vcmp.gt.f32.partialorder %v4911_v15, -0.87758255 }
 0x6e5   :  { %v4412_v49 = vmul.f32 %v4911_v15, %v4411_v16 }
 0x6e6   :  { %v4381_v6 = vsub.f32 1.0, %v4380_v19 }
 0x6e8   :  { %v4382_v32 = vmax.f32 %v4381_v6, 0.0 }
 0x6ea   :  { %4961 = vrsqrt.f32 %v4382_v32  ;;  %vm4390_vm0 = vcmp.eq.f32.partialorder %v4382_v32, inf  ;;  %v4393_v13 = vand.u32 2147483648, %v4382_v32  ;;  %vm4392_vm1 = vcmp.eq.f32.partialorder %v4382_v32, 0.0 }
 0x6f0   :  { %v4962_v36 = vpop.eup %4961 }
 0x6f1   :  { %v4384_v40 = vmul.f32 %v4962_v36, %v4382_v32 }
 0x6f3   :  { %v4385_v56 = vmul.f32 %v4962_v36, %v4384_v40 }
 0x6f5   :  { %v4386_v55 = vmul.f32 0.5, %v4385_v56 }
 0x6f7   :  { %v4387_v27 = vsub.f32 1.5, %v4386_v55 }
 0x6f9   :  { %v4388_v9 = vmul.f32 %v4962_v36, %v4387_v27 }
 0x6fb   :  { %v4389_v59 = vmul.f32 %v4388_v9, %v4382_v32 }
 0x6fd   :  { %v4391_v42 = vsel %vm4390_vm0, %v4382_v32, %v4389_v59 }
 0x6fe   :  { %v4394_v20 = vsel %vm4392_vm1, %v4393_v13, %v4391_v42 }
 0x6ff   :  { %v4396_v12 = vmul.f32 0.47942555, %v4394_v20 }
 0x701   :  { %v4397_v1 = vsub.f32 %v4395_v34, %v4396_v12 }
 0x703   :  { %v4400_v5 = vsel %vm4398_vm2, %v4397_v1, %v4912_v29 }
 0x704   :  { %v4410_v43 = vmul.f32 %v4913_v33, %v4400_v5 }
 0x706   :  { %v4413_v14 = vadd.f32 %v4412_v49, %v4410_v43 }
 0x708   :  { %v4414_v31 = vmul.f32 32.0, %v4413_v14 }
 0x70a   :  { %4416 = vst.msk [vmem:[#allocation2] sm:$0x3] %vm4415_vm3, %v4414_v31 }
 0x70b   :  { %4427 = dma.vmem_to_hbm [thread:$0]  %s4423_s5, 32, %s4425_s29, [#allocation3]  }
 0x70c   :  { %5103 = dma.done.wait [#allocation3], 32  }
 0x70d   :  { %5104 = vsyncadd [#allocation3], 4294967264 }
 0x70e   :  { %4432 = vsyncpa [#allocation3], 1 }

</bundles_post_ra>
